<compile_context>
chip_gen: v7x
topology: tpu7x:2x2x1
jax: 0.10.0
libtpu: 0.0.40
codegen_flags: <defaults>
</compile_context>

<pallas_src>
import functools

import numpy as np
import jax
import jax.numpy as jnp
from jax.experimental import pallas as pl
from jax.experimental.pallas import tpu as pltpu

# ----------------------- small config (consistent with the module) ----------
IMG_SIZE = 16
PATCH = 4
IN_CHANS = 3
EMB = 32            # encoder embedding dim
DEC_EMB = 16        # decoder embedding dim
NUM_HEADS = 4
DEC_HEADS = 2
ENC_DEPTH = 2
DEC_DEPTH = 1
MLP_RATIO = 4
BATCH = 2
MASK_RATIO = 0.75
GRID = IMG_SIZE // PATCH
NUM_PATCHES = GRID * GRID                              # 16
PATCH_DIM = PATCH * PATCH * IN_CHANS                   # 48
LEN_KEEP = int(NUM_PATCHES * (1 - MASK_RATIO))         # 4
ENC_SEQ_REAL = 1 + LEN_KEEP                            # 5  (cls + kept)
ENC_SEQ = ((ENC_SEQ_REAL + 7) // 8) * 8                # 8  (sublane padded)
DEC_SEQ_REAL = 1 + NUM_PATCHES                         # 17 (cls + all patches)
DEC_SEQ = ((DEC_SEQ_REAL + 7) // 8) * 8                # 24 (sublane padded)
NEG_INF = -1e30

BLOCK_PARAM_NAMES = ("ln1g", "ln1b", "wqkv", "bqkv", "wproj", "bproj",
                     "ln2g", "ln2b", "w1", "b1", "w2", "b2")


# ----------------------- sincos positional embedding (init-time, numpy) -----
def _sincos_1d(embed_dim, pos):
    omega = np.arange(embed_dim // 2, dtype=np.float64)
    omega /= embed_dim / 2.0
    omega = 1.0 / 10000 ** omega
    out = np.einsum("m,d->md", pos.reshape(-1).astype(np.float64), omega)
    return np.concatenate([np.sin(out), np.cos(out)], axis=1)


def get_2d_sincos_pos_embed(embed_dim, grid_size, cls_token=False):
    grid_h = np.arange(grid_size, dtype=np.float32)
    grid_w = np.arange(grid_size, dtype=np.float32)
    grid = np.meshgrid(grid_w, grid_h)
    grid = np.stack(grid, axis=0).reshape([2, 1, grid_size, grid_size])
    emb_h = _sincos_1d(embed_dim // 2, grid[0])
    emb_w = _sincos_1d(embed_dim // 2, grid[1])
    pos = np.concatenate([emb_h, emb_w], axis=1)
    if cls_token:
        pos = np.concatenate([np.zeros([1, embed_dim]), pos], axis=0)
    return pos.astype(np.float32)


# ----------------------- weight packing --------------------------------------
class _WeightPacker:
    """Row-packs many small [r, c<=128] f32 params into one [R, 128] buffer.

    Every param starts at an 8-aligned row offset so the in-kernel static slices
    are sublane-aligned.  Offsets are plain python ints (static in the kernel).
    Collapses ~45 tiny per-param input DMAs into a single DMA blob (~480 KB).
    """
    COLS = 128

    def __init__(self):
        self._chunks = []
        self._rows = 0
        self.offsets = {}

    def add(self, name, arr):
        a = np.asarray(arr, dtype=np.float32)
        if a.ndim == 1:
            a = a[None, :]
        r, c = a.shape
        assert c <= self.COLS, (name, a.shape)
        buf = np.zeros((r, self.COLS), np.float32)
        buf[:, :c] = a
        self.offsets[name] = (self._rows, r, c)
        self._chunks.append(buf)
        pad = (-r) % 8
        if pad:
            self._chunks.append(np.zeros((pad, self.COLS), np.float32))
        self._rows += r + pad

    def pack(self):
        return jnp.asarray(np.concatenate(self._chunks, axis=0))


# ----------------------- in-kernel helpers ------------------------------------
def _layernorm(x, g, b, eps=1e-5):
    mu = jnp.mean(x, axis=-1, keepdims=True)
    var = jnp.mean((x - mu) * (x - mu), axis=-1, keepdims=True)
    return (x - mu) * jax.lax.rsqrt(var + eps) * g + b


def _gelu(x):
    # exact (erf-based) GELU, matching torch.nn.GELU() default
    return 0.5 * x * (1.0 + jax.lax.erf(x * 0.7071067811865476))


def _block(x2d, batch, seq, num_heads, key_bias, W):
    """Pre-norm transformer block on batch-folded, seq-padded activations.

    x2d: [batch*seq, D] with seq a multiple of 8 (all per-batch slices aligned).
    One fused QKV matmul per layer; per-head 8-lane strips sliced statically.
    key_bias: [1, seq] additive bias (-inf on padded key columns).
    """
    D = x2d.shape[-1]
    dh = D // num_heads
    scale = dh ** -0.5

    h = _layernorm(x2d, W["ln1g"], W["ln1b"])
    qkv = jnp.dot(h, W["wqkv"], preferred_element_type=jnp.float32) + W["bqkv"]

    per_batch = []
    for b in range(batch):
        rows = slice(b * seq, (b + 1) * seq)       # 8-aligned static slice
        heads = []
        for hi in range(num_heads):
            q = qkv[rows, hi * dh:(hi + 1) * dh]
            k = qkv[rows, D + hi * dh:D + (hi + 1) * dh]
            v = qkv[rows, 2 * D + hi * dh:2 * D + (hi + 1) * dh]
            att = jax.lax.dot_general(q, k, (((1,), (1,)), ((), ())),
                                      preferred_element_type=jnp.float32) * scale
            att = att + key_bias                   # mask padded key positions
            att = att - jnp.max(att, axis=-1, keepdims=True)
            att = jnp.exp(att)
            att = att * pl.reciprocal(jnp.sum(att, axis=-1, keepdims=True),
                                      approx=True)
            heads.append(jnp.dot(att, v, preferred_element_type=jnp.float32))
        per_batch.append(jnp.concatenate(heads, axis=-1))       # [seq, D]
    attn = jnp.concatenate(per_batch, axis=0)                   # [B*seq, D]

    x2d = x2d + (jnp.dot(attn, W["wproj"], preferred_element_type=jnp.float32)
                 + W["bproj"])
    h2 = _layernorm(x2d, W["ln2g"], W["ln2b"])
    m = jnp.dot(h2, W["w1"], preferred_element_type=jnp.float32) + W["b1"]
    m = _gelu(m)
    m = jnp.dot(m, W["w2"], preferred_element_type=jnp.float32) + W["b2"]
    return x2d + m


# ----------------------- the single fused kernel ------------------------------
def mae_kernel(offs, batch,
               ids_ref,                 # scalar-prefetch: [B, LEN_KEEP] int32 (SMEM)
               xp_ref,                  # [B*L, PATCH_DIM]
               tgt_ref,                 # [B*L, PATCH_DIM]
               const_ref,               # [R, 128] packed weights
               pred_ref,                # out: [B*L, PATCH_DIM]
               loss_ref):               # out: [1, 1]
    def g(name):
        r0, r, c = offs[name]
        return const_ref[r0:r0 + r, 0:c]        # static, 8-aligned ref slice

    L, E, Dd = NUM_PATCHES, EMB, DEC_EMB

    # ---------- patch embed (batch folded into matmul M) -----------------------
    emb = (jnp.dot(xp_ref[...], g("patch_w"), preferred_element_type=jnp.float32)
           + g("patch_b"))                                      # [B*L, E]
    pos = g("pos_embed")                                        # [L, E]
    cls = g("cls_token")                                        # [1, E]

    iota_row = jax.lax.broadcasted_iota(jnp.int32, (1, L), 1)   # [1, L]
    iota_col = jax.lax.broadcasted_iota(jnp.int32, (L, 1), 0)   # [L, 1]

    # ---------- random-masking gather (one-hot matmuls from SMEM ids) ----------
    enc_tokens, gathers, keep_cols = [], [], []
    for b in range(batch):
        emb_b = emb[b * L:(b + 1) * L, :] + pos                 # [L, E]
        grows = []
        keep_col = jnp.zeros((L, 1), jnp.float32)
        for k in range(LEN_KEEP):
            idx = ids_ref[b, k]
            grows.append((iota_row == idx).astype(jnp.float32))
            keep_col = keep_col + (iota_col == idx).astype(jnp.float32)
        G = jnp.concatenate(grows, axis=0)                      # [LEN_KEEP, L]
        kept = jnp.dot(G, emb_b, preferred_element_type=jnp.float32)  # gather
        pad = jnp.zeros((ENC_SEQ - ENC_SEQ_REAL, E), jnp.float32)
        enc_tokens.append(jnp.concatenate([cls, kept, pad], axis=0))  # [ENC_SEQ, E]
        gathers.append(G)
        keep_cols.append(keep_col)                              # [L,1] 1 = kept
    x2d = jnp.concatenate(enc_tokens, axis=0)                   # [B*ENC_SEQ, E]

    enc_kb = jnp.where(
        jax.lax.broadcasted_iota(jnp.int32, (1, ENC_SEQ), 1) < ENC_SEQ_REAL,
        0.0, NEG_INF).astype(jnp.float32)

    # ---------- encoder blocks (reference applies self.norm after EVERY block) -
    norm_g, norm_b = g("norm_g"), g("norm_b")
    for li in range(ENC_DEPTH):
        W = {n: g(f"enc{li}_{n}") for n in BLOCK_PARAM_NAMES}
        x2d = _block(x2d, batch, ENC_SEQ, NUM_HEADS, enc_kb, W)
        x2d = _layernorm(x2d, norm_g, norm_b)

    # ---------- decoder embed + token unshuffle (one-hot scatter) --------------
    dec2d = (jnp.dot(x2d, g("dec_embed_w"), preferred_element_type=jnp.float32)
             + g("dec_embed_b"))                                # [B*ENC_SEQ, Dd]
    dec_pos = g("dec_pos")                                      # [1+L, Dd]
    mask_tok = g("mask_token")                                  # [1, Dd]

    dec_tokens, mask_cols = [], []
    for b in range(batch):
        db = dec2d[b * ENC_SEQ:(b + 1) * ENC_SEQ, :]            # [ENC_SEQ, Dd]
        cls_d = db[0:1, :] + dec_pos[0:1, :]
        kept_d = db[1:1 + LEN_KEEP, :]                          # [LEN_KEEP, Dd]
        keep_col = keep_cols[b]
        # scatter kept tokens back to their original patch positions (G^T @ kept)
        patches = jax.lax.dot_general(gathers[b], kept_d,
                                      (((0,), (0,)), ((), ())),
                                      preferred_element_type=jnp.float32)  # [L, Dd]
        patches = patches + (1.0 - keep_col) * mask_tok + dec_pos[1:1 + L, :]
        pad = jnp.zeros((DEC_SEQ - DEC_SEQ_REAL, Dd), jnp.float32)
        dec_tokens.append(jnp.concatenate([cls_d, patches, pad], axis=0))
        mask_cols.append(1.0 - keep_col)                        # [L,1] 1 = removed
    y2d = jnp.concatenate(dec_tokens, axis=0)                   # [B*DEC_SEQ, Dd]

    dec_kb = jnp.where(
        jax.lax.broadcasted_iota(jnp.int32, (1, DEC_SEQ), 1) < DEC_SEQ_REAL,
        0.0, NEG_INF).astype(jnp.float32)

    for li in range(DEC_DEPTH):
        W = {n: g(f"dec{li}_{n}") for n in BLOCK_PARAM_NAMES}
        y2d = _block(y2d, batch, DEC_SEQ, DEC_HEADS, dec_kb, W)
    y2d = _layernorm(y2d, g("dec_norm_g"), g("dec_norm_b"))

    # ---------- prediction head + masked-MSE loss ------------------------------
    p2d = (jnp.dot(y2d, g("pred_w"), preferred_element_type=jnp.float32)
           + g("pred_b"))                                       # [B*DEC_SEQ, P]

    num = jnp.zeros((1, 1), jnp.float32)
    den = jnp.zeros((1, 1), jnp.float32)
    preds = []
    for b in range(batch):
        pb = p2d[b * DEC_SEQ + 1:b * DEC_SEQ + 1 + L, :]        # drop cls -> [L, P]
        preds.append(pb)
        d = pb - tgt_ref[b * L:(b + 1) * L, :]
        per_patch = jnp.mean(d * d, axis=-1, keepdims=True)     # [L, 1]
        m = mask_cols[b]
        num = num + jnp.sum(per_patch * m, axis=0, keepdims=True)
        den = den + jnp.sum(m, axis=0, keepdims=True)
    pred_ref[...] = jnp.concatenate(preds, axis=0)              # one [B*L, P] store
    loss_ref[...] = num / den                                   # exact divide


# ----------------------- wrapper ----------------------------------------------
def run_mae(ids_keep, xp2d, target2d, consts, offsets, batch):
    n_rows = batch * NUM_PATCHES
    kernel = functools.partial(mae_kernel, offsets, batch)
    pred2d, loss = pl.pallas_call(
        kernel,
        out_shape=(jax.ShapeDtypeStruct((n_rows, PATCH_DIM), jnp.float32),
                   jax.ShapeDtypeStruct((1, 1), jnp.float32)),
        grid_spec=pltpu.PrefetchScalarGridSpec(
            num_scalar_prefetch=1,
            grid=(1,),
            in_specs=[
                pl.BlockSpec(xp2d.shape, lambda i, ids: (0, 0)),
                pl.BlockSpec(target2d.shape, lambda i, ids: (0, 0)),
                pl.BlockSpec(consts.shape, lambda i, ids: (0, 0)),
            ],
            out_specs=(
                pl.BlockSpec((n_rows, PATCH_DIM), lambda i, ids: (0, 0)),
                pl.BlockSpec((1, 1), lambda i, ids: (0, 0)),
            ),
        ),
        compiler_params=pltpu.CompilerParams(
            dimension_semantics=("arbitrary",)),
    )(ids_keep, xp2d, target2d, consts)
    return pred2d, loss


# ----------------------- glue (plain JAX) --------------------------------------
def patchify_conv(imgs, p):
    # per-patch feature ordering (c, ph, pw) — matches Conv2d weight flattening
    B, C, H, W = imgs.shape
    h, w = H // p, W // p
    x = imgs.reshape(B, C, h, p, w, p)
    x = jnp.transpose(x, (0, 2, 4, 1, 3, 5))
    return x.reshape(B, h * w, C * p * p)


def patchify_target(imgs, p):
    # matches MAE patchify: einsum('nchpwq->nhwpqc')
    B, C, H, W = imgs.shape
    h, w = H // p, W // p
    x = imgs.reshape(B, C, h, p, w, p)
    x = jnp.transpose(x, (0, 2, 4, 3, 5, 1))
    return x.reshape(B, h * w, p * p * C)


def random_masking_ids(key, batch, L, mask_ratio):
    len_keep = int(L * (1 - mask_ratio))
    noise = jax.random.uniform(key, (batch, L))
    ids_shuffle = jnp.argsort(noise, axis=1)
    ids_restore = jnp.argsort(ids_shuffle, axis=1)
    ids_keep = ids_shuffle[:, :len_keep].astype(jnp.int32)
    mask = jnp.ones((batch, L), jnp.float32)
    mask = mask.at[:, :len_keep].set(0.0)
    mask = jnp.take_along_axis(mask, ids_restore, axis=1)   # 0 = keep, 1 = remove
    return ids_keep, mask


# ----------------------- parameters --------------------------------------------
def init_params(key):
    ks = iter(jax.random.split(key, 64))

    def xavier(shape):
        fan_in, fan_out = shape
        lim = float(np.sqrt(6.0 / (fan_in + fan_out)))
        return np.asarray(jax.random.uniform(next(ks), shape, jnp.float32, -lim, lim))

    def normal(shape, std=0.02):
        return np.asarray(std * jax.random.normal(next(ks), shape), dtype=np.float32)

    zeros = lambda s: np.zeros(s, np.float32)
    ones = lambda s: np.ones(s, np.float32)

    pk = _WeightPacker()
    # patch embed / encoder misc
    pk.add("patch_w", xavier((PATCH_DIM, EMB)))
    pk.add("patch_b", zeros((EMB,)))
    pk.add("pos_embed", get_2d_sincos_pos_embed(EMB, GRID, cls_token=True)[1:, :])
    pk.add("cls_token", normal((EMB,)))
    pk.add("norm_g", ones((EMB,)))
    pk.add("norm_b", zeros((EMB,)))
    # decoder misc
    pk.add("dec_embed_w", xavier((EMB, DEC_EMB)))
    pk.add("dec_embed_b", zeros((DEC_EMB,)))
    pk.add("mask_token", normal((DEC_EMB,)))
    pk.add("dec_pos", get_2d_sincos_pos_embed(DEC_EMB, GRID, cls_token=True))
    pk.add("dec_norm_g", ones((DEC_EMB,)))
    pk.add("dec_norm_b", zeros((DEC_EMB,)))
    pk.add("pred_w", xavier((DEC_EMB, PATCH_DIM)))
    pk.add("pred_b", zeros((PATCH_DIM,)))

    def add_block(prefix, D, hidden):
        pk.add(prefix + "ln1g", ones((D,)))
        pk.add(prefix + "ln1b", zeros((D,)))
        pk.add(prefix + "wqkv", xavier((D, 3 * D)))     # fused qkv, qkv_bias=True
        pk.add(prefix + "bqkv", zeros((3 * D,)))
        pk.add(prefix + "wproj", xavier((D, D)))
        pk.add(prefix + "bproj", zeros((D,)))
        pk.add(prefix + "ln2g", ones((D,)))
        pk.add(prefix + "ln2b", zeros((D,)))
        pk.add(prefix + "w1", xavier((D, hidden)))
        pk.add(prefix + "b1", zeros((hidden,)))
        pk.add(prefix + "w2", xavier((hidden, D)))
        pk.add(prefix + "b2", zeros((D,)))

    for li in range(ENC_DEPTH):
        add_block(f"enc{li}_", EMB, EMB * MLP_RATIO)
    for li in range(DEC_DEPTH):
        add_block(f"dec{li}_", DEC_EMB, DEC_EMB * MLP_RATIO)

    return pk.pack(), pk.offsets


# ----------------------- full forward -------------------------------------------
def mae_forward(imgs, consts, offsets, mask_key, mask_ratio=MASK_RATIO):
    B = imgs.shape[0]
    xp = patchify_conv(imgs, PATCH).reshape(B * NUM_PATCHES, PATCH_DIM)
    target = patchify_target(imgs, PATCH).reshape(B * NUM_PATCHES, PATCH_DIM)
    ids_keep, mask = random_masking_ids(mask_key, B, NUM_PATCHES, mask_ratio)
    pred2d, loss = run_mae(ids_keep, xp, target, consts, offsets, B)
    pred = pred2d.reshape(B, NUM_PATCHES, PATCH_DIM)
    return loss[0, 0], pred, mask


# ----------------------- main -----------------------------------------------------
if __name__ == "__main__":
    key = jax.random.PRNGKey(0)
    pkey, dkey, mkey = jax.random.split(key, 3)
    consts, offsets = init_params(pkey)
    imgs = jax.random.normal(dkey, (BATCH, IN_CHANS, IMG_SIZE, IMG_SIZE), jnp.float32)

    fwd = jax.jit(lambda im, cs, mk: mae_forward(im, cs, offsets, mk))
    loss, pred, mask = fwd(imgs, consts, mkey)
    jax.block_until_ready((loss, pred, mask))

    assert pred.shape == (BATCH, NUM_PATCHES, PATCH_DIM)
    assert mask.shape == (BATCH, NUM_PATCHES)
    assert bool(jnp.isfinite(loss))
    print("KERNEL_OK")
</pallas_src>

<mosaic_0001>
module attributes {stable_mosaic.version = 11 : i64} {
  func.func @mae_kernel(%arg0: i32, %arg1: memref<2x4xi32, #tpu.memory_space<smem>>, %arg2: memref<32x48xf32, #tpu.memory_space<vmem>>, %arg3: memref<32x48xf32, #tpu.memory_space<vmem>>, %arg4: memref<960x128xf32, #tpu.memory_space<vmem>>, %arg5: memref<32x48xf32, #tpu.memory_space<vmem>>, %arg6: memref<1x1xf32, #tpu.memory_space<vmem>>) attributes {dimension_semantics = [#tpu.dimension_semantics<arbitrary>], iteration_bounds = array<i64: 1>, scalar_prefetch = 1 : i64, scratch_operands = 0 : i64, tpu.core_type = #tpu.core_type<tc>, window_params = [{pipeline_mode = #tpu.pipeline_mode<synchronous>, transform_indices = @transform_0, window_bounds = array<i64: 32, 48>}, {pipeline_mode = #tpu.pipeline_mode<synchronous>, transform_indices = @transform_1, window_bounds = array<i64: 32, 48>}, {pipeline_mode = #tpu.pipeline_mode<synchronous>, transform_indices = @transform_2, window_bounds = array<i64: 960, 128>}, {pipeline_mode = #tpu.pipeline_mode<synchronous>, transform_indices = @transform_3, window_bounds = array<i64: 32, 48>}, {pipeline_mode = #tpu.pipeline_mode<synchronous>, transform_indices = @transform_4, window_bounds = array<i64: 1, 1>}]} {
    %c0 = arith.constant 0 : index
    %c0_0 = arith.constant 0 : index
    %0 = vector.load %arg2[%c0, %c0_0] : memref<32x48xf32, #tpu.memory_space<vmem>>, vector<32x48xf32>
    %c0_1 = arith.constant 0 : index
    %c0_2 = arith.constant 0 : index
    %1 = vector.load %arg4[%c0_1, %c0_2] : memref<960x128xf32, #tpu.memory_space<vmem>>, vector<48x32xf32>
    %cst = arith.constant dense<0.000000e+00> : vector<32x32xf32>
    %2 = tpu.matmul %0, %1, %cst {dimension_numbers = #tpu.dot_dimension_numbers<[1], [0], [0], [1], [0, 0, 1, 1], [], []>} : vector<32x48xf32>, vector<48x32xf32>, vector<32x32xf32> -> vector<32x32xf32>
    %c48 = arith.constant 48 : index
    %c0_3 = arith.constant 0 : index
    %3 = vector.load %arg4[%c48, %c0_3] : memref<960x128xf32, #tpu.memory_space<vmem>>, vector<1x32xf32>
    %4 = vector.broadcast %3 : vector<1x32xf32> to vector<32x32xf32>
    %5 = arith.addf %2, %4 : vector<32x32xf32>
    %c56 = arith.constant 56 : index
    %c0_4 = arith.constant 0 : index
    %6 = vector.load %arg4[%c56, %c0_4] : memref<960x128xf32, #tpu.memory_space<vmem>>, vector<16x32xf32>
    %c72 = arith.constant 72 : index
    %c0_5 = arith.constant 0 : index
    %7 = vector.load %arg4[%c72, %c0_5] : memref<960x128xf32, #tpu.memory_space<vmem>>, vector<1x32xf32>
    %8 = tpu.iota {dimensions = array<i32: 1>} : vector<1x16xi32>
    %9 = tpu.iota {dimensions = array<i32: 0>} : vector<16x1xi32>
    %10 = vector.extract_strided_slice %5 {offsets = [0, 0], sizes = [16, 32], strides = [1, 1]} : vector<32x32xf32> to vector<16x32xf32>
    %11 = arith.addf %10, %6 : vector<16x32xf32>
    %cst_6 = arith.constant 0.000000e+00 : f32
    %12 = vector.broadcast %cst_6 : f32 to vector<16x1xf32>
    %c0_7 = arith.constant 0 : index
    %c0_8 = arith.constant 0 : index
    %13 = memref.load %arg1[%c0_7, %c0_8] : memref<2x4xi32, #tpu.memory_space<smem>>
    %14 = vector.broadcast %13 : i32 to vector<1x16xi32>
    %15 = arith.cmpi eq, %8, %14 : vector<1x16xi32>
    %16 = arith.extui %15 : vector<1x16xi1> to vector<1x16xi32>
    %17 = arith.sitofp %16 : vector<1x16xi32> to vector<1x16xf32>
    %18 = vector.broadcast %13 : i32 to vector<16x1xi32>
    %19 = arith.cmpi eq, %9, %18 : vector<16x1xi32>
    %20 = arith.extui %19 : vector<16x1xi1> to vector<16x1xi32>
    %21 = arith.sitofp %20 : vector<16x1xi32> to vector<16x1xf32>
    %22 = arith.addf %12, %21 : vector<16x1xf32>
    %c0_9 = arith.constant 0 : index
    %c1 = arith.constant 1 : index
    %23 = memref.load %arg1[%c0_9, %c1] : memref<2x4xi32, #tpu.memory_space<smem>>
    %24 = vector.broadcast %23 : i32 to vector<1x16xi32>
    %25 = arith.cmpi eq, %8, %24 : vector<1x16xi32>
    %26 = arith.extui %25 : vector<1x16xi1> to vector<1x16xi32>
    %27 = arith.sitofp %26 : vector<1x16xi32> to vector<1x16xf32>
    %28 = vector.broadcast %23 : i32 to vector<16x1xi32>
    %29 = arith.cmpi eq, %9, %28 : vector<16x1xi32>
    %30 = arith.extui %29 : vector<16x1xi1> to vector<16x1xi32>
    %31 = arith.sitofp %30 : vector<16x1xi32> to vector<16x1xf32>
    %32 = arith.addf %22, %31 : vector<16x1xf32>
    %c0_10 = arith.constant 0 : index
    %c2 = arith.constant 2 : index
    %33 = memref.load %arg1[%c0_10, %c2] : memref<2x4xi32, #tpu.memory_space<smem>>
    %34 = vector.broadcast %33 : i32 to vector<1x16xi32>
    %35 = arith.cmpi eq, %8, %34 : vector<1x16xi32>
    %36 = arith.extui %35 : vector<1x16xi1> to vector<1x16xi32>
    %37 = arith.sitofp %36 : vector<1x16xi32> to vector<1x16xf32>
    %38 = vector.broadcast %33 : i32 to vector<16x1xi32>
    %39 = arith.cmpi eq, %9, %38 : vector<16x1xi32>
    %40 = arith.extui %39 : vector<16x1xi1> to vector<16x1xi32>
    %41 = arith.sitofp %40 : vector<16x1xi32> to vector<16x1xf32>
    %42 = arith.addf %32, %41 : vector<16x1xf32>
    %c0_11 = arith.constant 0 : index
    %c3 = arith.constant 3 : index
    %43 = memref.load %arg1[%c0_11, %c3] : memref<2x4xi32, #tpu.memory_space<smem>>
    %44 = vector.broadcast %43 : i32 to vector<1x16xi32>
    %45 = arith.cmpi eq, %8, %44 : vector<1x16xi32>
    %46 = arith.extui %45 : vector<1x16xi1> to vector<1x16xi32>
    %47 = arith.sitofp %46 : vector<1x16xi32> to vector<1x16xf32>
    %48 = vector.broadcast %43 : i32 to vector<16x1xi32>
    %49 = arith.cmpi eq, %9, %48 : vector<16x1xi32>
    %50 = arith.extui %49 : vector<16x1xi1> to vector<16x1xi32>
    %51 = arith.sitofp %50 : vector<16x1xi32> to vector<16x1xf32>
    %52 = arith.addf %42, %51 : vector<16x1xf32>
    %53 = tpu.concatenate %17, %27, %37, %47 in 0 : vector<1x16xf32>, vector<1x16xf32>, vector<1x16xf32>, vector<1x16xf32> -> vector<4x16xf32>
    %cst_12 = arith.constant dense<0.000000e+00> : vector<4x32xf32>
    %54 = tpu.matmul %53, %11, %cst_12 {dimension_numbers = #tpu.dot_dimension_numbers<[1], [0], [0], [1], [0, 0, 1, 1], [], []>} : vector<4x16xf32>, vector<16x32xf32>, vector<4x32xf32> -> vector<4x32xf32>
    %cst_13 = arith.constant 0.000000e+00 : f32
    %55 = vector.broadcast %cst_13 : f32 to vector<3x32xf32>
    %56 = tpu.concatenate %7, %54, %55 in 0 : vector<1x32xf32>, vector<4x32xf32>, vector<3x32xf32> -> vector<8x32xf32>
    %57 = vector.extract_strided_slice %5 {offsets = [16, 0], sizes = [16, 32], strides = [1, 1]} : vector<32x32xf32> to vector<16x32xf32>
    %58 = arith.addf %57, %6 : vector<16x32xf32>
    %cst_14 = arith.constant 0.000000e+00 : f32
    %59 = vector.broadcast %cst_14 : f32 to vector<16x1xf32>
    %c1_15 = arith.constant 1 : index
    %c0_16 = arith.constant 0 : index
    %60 = memref.load %arg1[%c1_15, %c0_16] : memref<2x4xi32, #tpu.memory_space<smem>>
    %61 = vector.broadcast %60 : i32 to vector<1x16xi32>
    %62 = arith.cmpi eq, %8, %61 : vector<1x16xi32>
    %63 = arith.extui %62 : vector<1x16xi1> to vector<1x16xi32>
    %64 = arith.sitofp %63 : vector<1x16xi32> to vector<1x16xf32>
    %65 = vector.broadcast %60 : i32 to vector<16x1xi32>
    %66 = arith.cmpi eq, %9, %65 : vector<16x1xi32>
    %67 = arith.extui %66 : vector<16x1xi1> to vector<16x1xi32>
    %68 = arith.sitofp %67 : vector<16x1xi32> to vector<16x1xf32>
    %69 = arith.addf %59, %68 : vector<16x1xf32>
    %c1_17 = arith.constant 1 : index
    %c1_18 = arith.constant 1 : index
    %70 = memref.load %arg1[%c1_17, %c1_18] : memref<2x4xi32, #tpu.memory_space<smem>>
    %71 = vector.broadcast %70 : i32 to vector<1x16xi32>
    %72 = arith.cmpi eq, %8, %71 : vector<1x16xi32>
    %73 = arith.extui %72 : vector<1x16xi1> to vector<1x16xi32>
    %74 = arith.sitofp %73 : vector<1x16xi32> to vector<1x16xf32>
    %75 = vector.broadcast %70 : i32 to vector<16x1xi32>
    %76 = arith.cmpi eq, %9, %75 : vector<16x1xi32>
    %77 = arith.extui %76 : vector<16x1xi1> to vector<16x1xi32>
    %78 = arith.sitofp %77 : vector<16x1xi32> to vector<16x1xf32>
    %79 = arith.addf %69, %78 : vector<16x1xf32>
    %c1_19 = arith.constant 1 : index
    %c2_20 = arith.constant 2 : index
    %80 = memref.load %arg1[%c1_19, %c2_20] : memref<2x4xi32, #tpu.memory_space<smem>>
    %81 = vector.broadcast %80 : i32 to vector<1x16xi32>
    %82 = arith.cmpi eq, %8, %81 : vector<1x16xi32>
    %83 = arith.extui %82 : vector<1x16xi1> to vector<1x16xi32>
    %84 = arith.sitofp %83 : vector<1x16xi32> to vector<1x16xf32>
    %85 = vector.broadcast %80 : i32 to vector<16x1xi32>
    %86 = arith.cmpi eq, %9, %85 : vector<16x1xi32>
    %87 = arith.extui %86 : vector<16x1xi1> to vector<16x1xi32>
    %88 = arith.sitofp %87 : vector<16x1xi32> to vector<16x1xf32>
    %89 = arith.addf %79, %88 : vector<16x1xf32>
    %c1_21 = arith.constant 1 : index
    %c3_22 = arith.constant 3 : index
    %90 = memref.load %arg1[%c1_21, %c3_22] : memref<2x4xi32, #tpu.memory_space<smem>>
    %91 = vector.broadcast %90 : i32 to vector<1x16xi32>
    %92 = arith.cmpi eq, %8, %91 : vector<1x16xi32>
    %93 = arith.extui %92 : vector<1x16xi1> to vector<1x16xi32>
    %94 = arith.sitofp %93 : vector<1x16xi32> to vector<1x16xf32>
    %95 = vector.broadcast %90 : i32 to vector<16x1xi32>
    %96 = arith.cmpi eq, %9, %95 : vector<16x1xi32>
    %97 = arith.extui %96 : vector<16x1xi1> to vector<16x1xi32>
    %98 = arith.sitofp %97 : vector<16x1xi32> to vector<16x1xf32>
    %99 = arith.addf %89, %98 : vector<16x1xf32>
    %100 = tpu.concatenate %64, %74, %84, %94 in 0 : vector<1x16xf32>, vector<1x16xf32>, vector<1x16xf32>, vector<1x16xf32> -> vector<4x16xf32>
    %cst_23 = arith.constant dense<0.000000e+00> : vector<4x32xf32>
    %101 = tpu.matmul %100, %58, %cst_23 {dimension_numbers = #tpu.dot_dimension_numbers<[1], [0], [0], [1], [0, 0, 1, 1], [], []>} : vector<4x16xf32>, vector<16x32xf32>, vector<4x32xf32> -> vector<4x32xf32>
    %cst_24 = arith.constant 0.000000e+00 : f32
    %102 = vector.broadcast %cst_24 : f32 to vector<3x32xf32>
    %103 = tpu.concatenate %7, %101, %102 in 0 : vector<1x32xf32>, vector<4x32xf32>, vector<3x32xf32> -> vector<8x32xf32>
    %104 = tpu.concatenate %56, %103 in 0 : vector<8x32xf32>, vector<8x32xf32> -> vector<16x32xf32>
    %105 = tpu.iota {dimensions = array<i32: 1>} : vector<1x8xi32>
    %c5_i32 = arith.constant 5 : i32
    %106 = vector.broadcast %c5_i32 : i32 to vector<1x8xi32>
    %107 = arith.cmpi slt, %105, %106 : vector<1x8xi32>
    %cst_25 = arith.constant 0.000000e+00 : f32
    %cst_26 = arith.constant -1.000000e+30 : f32
    %108 = vector.broadcast %cst_25 : f32 to vector<1x8xf32>
    %109 = vector.broadcast %cst_26 : f32 to vector<1x8xf32>
    %110 = arith.select %107, %108, %109 : vector<1x8xi1>, vector<1x8xf32>
    %c80 = arith.constant 80 : index
    %c0_27 = arith.constant 0 : index
    %111 = vector.load %arg4[%c80, %c0_27] : memref<960x128xf32, #tpu.memory_space<vmem>>, vector<1x32xf32>
    %c88 = arith.constant 88 : index
    %c0_28 = arith.constant 0 : index
    %112 = vector.load %arg4[%c88, %c0_28] : memref<960x128xf32, #tpu.memory_space<vmem>>, vector<1x32xf32>
    %c208 = arith.constant 208 : index
    %c0_29 = arith.constant 0 : index
    %113 = vector.load %arg4[%c208, %c0_29] : memref<960x128xf32, #tpu.memory_space<vmem>>, vector<1x32xf32>
    %c216 = arith.constant 216 : index
    %c0_30 = arith.constant 0 : index
    %114 = vector.load %arg4[%c216, %c0_30] : memref<960x128xf32, #tpu.memory_space<vmem>>, vector<1x32xf32>
    %c224 = arith.constant 224 : index
    %c0_31 = arith.constant 0 : index
    %115 = vector.load %arg4[%c224, %c0_31] : memref<960x128xf32, #tpu.memory_space<vmem>>, vector<32x96xf32>
    %c256 = arith.constant 256 : index
    %c0_32 = arith.constant 0 : index
    %116 = vector.load %arg4[%c256, %c0_32] : memref<960x128xf32, #tpu.memory_space<vmem>>, vector<1x96xf32>
    %c264 = arith.constant 264 : index
    %c0_33 = arith.constant 0 : index
    %117 = vector.load %arg4[%c264, %c0_33] : memref<960x128xf32, #tpu.memory_space<vmem>>, vector<32x32xf32>
    %c296 = arith.constant 296 : index
    %c0_34 = arith.constant 0 : index
    %118 = vector.load %arg4[%c296, %c0_34] : memref<960x128xf32, #tpu.memory_space<vmem>>, vector<1x32xf32>
    %c304 = arith.constant 304 : index
    %c0_35 = arith.constant 0 : index
    %119 = vector.load %arg4[%c304, %c0_35] : memref<960x128xf32, #tpu.memory_space<vmem>>, vector<1x32xf32>
    %c312 = arith.constant 312 : index
    %c0_36 = arith.constant 0 : index
    %120 = vector.load %arg4[%c312, %c0_36] : memref<960x128xf32, #tpu.memory_space<vmem>>, vector<1x32xf32>
    %c320 = arith.constant 320 : index
    %c0_37 = arith.constant 0 : index
    %121 = vector.load %arg4[%c320, %c0_37] : memref<960x128xf32, #tpu.memory_space<vmem>>, vector<32x128xf32>
    %c352 = arith.constant 352 : index
    %c0_38 = arith.constant 0 : index
    %122 = vector.load %arg4[%c352, %c0_38] : memref<960x128xf32, #tpu.memory_space<vmem>>, vector<1x128xf32>
    %c360 = arith.constant 360 : index
    %c0_39 = arith.constant 0 : index
    %123 = vector.load %arg4[%c360, %c0_39] : memref<960x128xf32, #tpu.memory_space<vmem>>, vector<128x32xf32>
    %c488 = arith.constant 488 : index
    %c0_40 = arith.constant 0 : index
    %124 = vector.load %arg4[%c488, %c0_40] : memref<960x128xf32, #tpu.memory_space<vmem>>, vector<1x32xf32>
    %cst_41 = arith.constant dense<0.000000e+00> : vector<16xf32>
    %125 = vector.multi_reduction <add>, %104, %cst_41 [1] : vector<16x32xf32> to vector<16xf32>
    %126 = vector.shape_cast %125 : vector<16xf32> to vector<16x1xf32>
    %cst_42 = arith.constant 3.200000e+01 : f32
    %127 = vector.broadcast %cst_42 : f32 to vector<16x1xf32>
    %128 = arith.divf %126, %127 : vector<16x1xf32>
    %129 = vector.broadcast %128 : vector<16x1xf32> to vector<16x32xf32>
    %130 = arith.subf %104, %129 : vector<16x32xf32>
    %131 = vector.broadcast %128 : vector<16x1xf32> to vector<16x32xf32>
    %132 = arith.subf %104, %131 : vector<16x32xf32>
    %133 = arith.mulf %130, %132 : vector<16x32xf32>
    %cst_43 = arith.constant dense<0.000000e+00> : vector<16xf32>
    %134 = vector.multi_reduction <add>, %133, %cst_43 [1] : vector<16x32xf32> to vector<16xf32>
    %135 = vector.shape_cast %134 : vector<16xf32> to vector<16x1xf32>
    %cst_44 = arith.constant 3.200000e+01 : f32
    %136 = vector.broadcast %cst_44 : f32 to vector<16x1xf32>
    %137 = arith.divf %135, %136 : vector<16x1xf32>
    %138 = vector.broadcast %128 : vector<16x1xf32> to vector<16x32xf32>
    %139 = arith.subf %104, %138 : vector<16x32xf32>
    %cst_45 = arith.constant 9.99999974E-6 : f32
    %140 = vector.broadcast %cst_45 : f32 to vector<16x1xf32>
    %141 = arith.addf %137, %140 : vector<16x1xf32>
    %142 = math.rsqrt %141 : vector<16x1xf32>
    %143 = vector.broadcast %142 : vector<16x1xf32> to vector<16x32xf32>
    %144 = arith.mulf %139, %143 : vector<16x32xf32>
    %145 = vector.broadcast %113 : vector<1x32xf32> to vector<16x32xf32>
    %146 = arith.mulf %144, %145 : vector<16x32xf32>
    %147 = vector.broadcast %114 : vector<1x32xf32> to vector<16x32xf32>
    %148 = arith.addf %146, %147 : vector<16x32xf32>
    %cst_46 = arith.constant dense<0.000000e+00> : vector<16x96xf32>
    %149 = tpu.matmul %148, %115, %cst_46 {dimension_numbers = #tpu.dot_dimension_numbers<[1], [0], [0], [1], [0, 0, 1, 1], [], []>} : vector<16x32xf32>, vector<32x96xf32>, vector<16x96xf32> -> vector<16x96xf32>
    %150 = vector.broadcast %116 : vector<1x96xf32> to vector<16x96xf32>
    %151 = arith.addf %149, %150 : vector<16x96xf32>
    %152 = vector.extract_strided_slice %151 {offsets = [0, 0], sizes = [8, 8], strides = [1, 1]} : vector<16x96xf32> to vector<8x8xf32>
    %153 = vector.extract_strided_slice %151 {offsets = [0, 32], sizes = [8, 8], strides = [1, 1]} : vector<16x96xf32> to vector<8x8xf32>
    %154 = vector.extract_strided_slice %151 {offsets = [0, 64], sizes = [8, 8], strides = [1, 1]} : vector<16x96xf32> to vector<8x8xf32>
    %cst_47 = arith.constant dense<0.000000e+00> : vector<8x8xf32>
    %155 = tpu.matmul %152, %153, %cst_47 {dimension_numbers = #tpu.dot_dimension_numbers<[1], [1], [0], [0], [0, 0, 1, 0], [], []>} : vector<8x8xf32>, vector<8x8xf32>, vector<8x8xf32> -> vector<8x8xf32>
    %cst_48 = arith.constant 0.353553385 : f32
    %156 = vector.broadcast %cst_48 : f32 to vector<8x8xf32>
    %157 = arith.mulf %155, %156 : vector<8x8xf32>
    %158 = vector.broadcast %110 : vector<1x8xf32> to vector<8x8xf32>
    %159 = arith.addf %157, %158 : vector<8x8xf32>
    %cst_49 = arith.constant dense<0xFF800000> : vector<8xf32>
    %160 = vector.multi_reduction <maximumf>, %159, %cst_49 [1] : vector<8x8xf32> to vector<8xf32>
    %161 = vector.shape_cast %160 : vector<8xf32> to vector<8x1xf32>
    %162 = vector.broadcast %161 : vector<8x1xf32> to vector<8x8xf32>
    %163 = arith.subf %159, %162 : vector<8x8xf32>
    %164 = math.exp %163 : vector<8x8xf32>
    %cst_50 = arith.constant dense<0.000000e+00> : vector<8xf32>
    %165 = vector.multi_reduction <add>, %164, %cst_50 [1] : vector<8x8xf32> to vector<8xf32>
    %166 = vector.shape_cast %165 : vector<8xf32> to vector<8x1xf32>
    %167 = tpu.reciprocal %166 {approx = true} : vector<8x1xf32> -> vector<8x1xf32>
    %168 = vector.broadcast %167 : vector<8x1xf32> to vector<8x8xf32>
    %169 = arith.mulf %164, %168 : vector<8x8xf32>
    %cst_51 = arith.constant dense<0.000000e+00> : vector<8x8xf32>
    %170 = tpu.matmul %169, %154, %cst_51 {dimension_numbers = #tpu.dot_dimension_numbers<[1], [0], [0], [1], [0, 0, 1, 1], [], []>} : vector<8x8xf32>, vector<8x8xf32>, vector<8x8xf32> -> vector<8x8xf32>
    %171 = vector.extract_strided_slice %151 {offsets = [0, 8], sizes = [8, 8], strides = [1, 1]} : vector<16x96xf32> to vector<8x8xf32>
    %172 = vector.extract_strided_slice %151 {offsets = [0, 40], sizes = [8, 8], strides = [1, 1]} : vector<16x96xf32> to vector<8x8xf32>
    %173 = vector.extract_strided_slice %151 {offsets = [0, 72], sizes = [8, 8], strides = [1, 1]} : vector<16x96xf32> to vector<8x8xf32>
    %cst_52 = arith.constant dense<0.000000e+00> : vector<8x8xf32>
    %174 = tpu.matmul %171, %172, %cst_52 {dimension_numbers = #tpu.dot_dimension_numbers<[1], [1], [0], [0], [0, 0, 1, 0], [], []>} : vector<8x8xf32>, vector<8x8xf32>, vector<8x8xf32> -> vector<8x8xf32>
    %cst_53 = arith.constant 0.353553385 : f32
    %175 = vector.broadcast %cst_53 : f32 to vector<8x8xf32>
    %176 = arith.mulf %174, %175 : vector<8x8xf32>
    %177 = vector.broadcast %110 : vector<1x8xf32> to vector<8x8xf32>
    %178 = arith.addf %176, %177 : vector<8x8xf32>
    %cst_54 = arith.constant dense<0xFF800000> : vector<8xf32>
    %179 = vector.multi_reduction <maximumf>, %178, %cst_54 [1] : vector<8x8xf32> to vector<8xf32>
    %180 = vector.shape_cast %179 : vector<8xf32> to vector<8x1xf32>
    %181 = vector.broadcast %180 : vector<8x1xf32> to vector<8x8xf32>
    %182 = arith.subf %178, %181 : vector<8x8xf32>
    %183 = math.exp %182 : vector<8x8xf32>
    %cst_55 = arith.constant dense<0.000000e+00> : vector<8xf32>
    %184 = vector.multi_reduction <add>, %183, %cst_55 [1] : vector<8x8xf32> to vector<8xf32>
    %185 = vector.shape_cast %184 : vector<8xf32> to vector<8x1xf32>
    %186 = tpu.reciprocal %185 {approx = true} : vector<8x1xf32> -> vector<8x1xf32>
    %187 = vector.broadcast %186 : vector<8x1xf32> to vector<8x8xf32>
    %188 = arith.mulf %183, %187 : vector<8x8xf32>
    %cst_56 = arith.constant dense<0.000000e+00> : vector<8x8xf32>
    %189 = tpu.matmul %188, %173, %cst_56 {dimension_numbers = #tpu.dot_dimension_numbers<[1], [0], [0], [1], [0, 0, 1, 1], [], []>} : vector<8x8xf32>, vector<8x8xf32>, vector<8x8xf32> -> vector<8x8xf32>
    %190 = vector.extract_strided_slice %151 {offsets = [0, 16], sizes = [8, 8], strides = [1, 1]} : vector<16x96xf32> to vector<8x8xf32>
    %191 = vector.extract_strided_slice %151 {offsets = [0, 48], sizes = [8, 8], strides = [1, 1]} : vector<16x96xf32> to vector<8x8xf32>
    %192 = vector.extract_strided_slice %151 {offsets = [0, 80], sizes = [8, 8], strides = [1, 1]} : vector<16x96xf32> to vector<8x8xf32>
    %cst_57 = arith.constant dense<0.000000e+00> : vector<8x8xf32>
    %193 = tpu.matmul %190, %191, %cst_57 {dimension_numbers = #tpu.dot_dimension_numbers<[1], [1], [0], [0], [0, 0, 1, 0], [], []>} : vector<8x8xf32>, vector<8x8xf32>, vector<8x8xf32> -> vector<8x8xf32>
    %cst_58 = arith.constant 0.353553385 : f32
    %194 = vector.broadcast %cst_58 : f32 to vector<8x8xf32>
    %195 = arith.mulf %193, %194 : vector<8x8xf32>
    %196 = vector.broadcast %110 : vector<1x8xf32> to vector<8x8xf32>
    %197 = arith.addf %195, %196 : vector<8x8xf32>
    %cst_59 = arith.constant dense<0xFF800000> : vector<8xf32>
    %198 = vector.multi_reduction <maximumf>, %197, %cst_59 [1] : vector<8x8xf32> to vector<8xf32>
    %199 = vector.shape_cast %198 : vector<8xf32> to vector<8x1xf32>
    %200 = vector.broadcast %199 : vector<8x1xf32> to vector<8x8xf32>
    %201 = arith.subf %197, %200 : vector<8x8xf32>
    %202 = math.exp %201 : vector<8x8xf32>
    %cst_60 = arith.constant dense<0.000000e+00> : vector<8xf32>
    %203 = vector.multi_reduction <add>, %202, %cst_60 [1] : vector<8x8xf32> to vector<8xf32>
    %204 = vector.shape_cast %203 : vector<8xf32> to vector<8x1xf32>
    %205 = tpu.reciprocal %204 {approx = true} : vector<8x1xf32> -> vector<8x1xf32>
    %206 = vector.broadcast %205 : vector<8x1xf32> to vector<8x8xf32>
    %207 = arith.mulf %202, %206 : vector<8x8xf32>
    %cst_61 = arith.constant dense<0.000000e+00> : vector<8x8xf32>
    %208 = tpu.matmul %207, %192, %cst_61 {dimension_numbers = #tpu.dot_dimension_numbers<[1], [0], [0], [1], [0, 0, 1, 1], [], []>} : vector<8x8xf32>, vector<8x8xf32>, vector<8x8xf32> -> vector<8x8xf32>
    %209 = vector.extract_strided_slice %151 {offsets = [0, 24], sizes = [8, 8], strides = [1, 1]} : vector<16x96xf32> to vector<8x8xf32>
    %210 = vector.extract_strided_slice %151 {offsets = [0, 56], sizes = [8, 8], strides = [1, 1]} : vector<16x96xf32> to vector<8x8xf32>
    %211 = vector.extract_strided_slice %151 {offsets = [0, 88], sizes = [8, 8], strides = [1, 1]} : vector<16x96xf32> to vector<8x8xf32>
    %cst_62 = arith.constant dense<0.000000e+00> : vector<8x8xf32>
    %212 = tpu.matmul %209, %210, %cst_62 {dimension_numbers = #tpu.dot_dimension_numbers<[1], [1], [0], [0], [0, 0, 1, 0], [], []>} : vector<8x8xf32>, vector<8x8xf32>, vector<8x8xf32> -> vector<8x8xf32>
    %cst_63 = arith.constant 0.353553385 : f32
    %213 = vector.broadcast %cst_63 : f32 to vector<8x8xf32>
    %214 = arith.mulf %212, %213 : vector<8x8xf32>
    %215 = vector.broadcast %110 : vector<1x8xf32> to vector<8x8xf32>
    %216 = arith.addf %214, %215 : vector<8x8xf32>
    %cst_64 = arith.constant dense<0xFF800000> : vector<8xf32>
    %217 = vector.multi_reduction <maximumf>, %216, %cst_64 [1] : vector<8x8xf32> to vector<8xf32>
    %218 = vector.shape_cast %217 : vector<8xf32> to vector<8x1xf32>
    %219 = vector.broadcast %218 : vector<8x1xf32> to vector<8x8xf32>
    %220 = arith.subf %216, %219 : vector<8x8xf32>
    %221 = math.exp %220 : vector<8x8xf32>
    %cst_65 = arith.constant dense<0.000000e+00> : vector<8xf32>
    %222 = vector.multi_reduction <add>, %221, %cst_65 [1] : vector<8x8xf32> to vector<8xf32>
    %223 = vector.shape_cast %222 : vector<8xf32> to vector<8x1xf32>
    %224 = tpu.reciprocal %223 {approx = true} : vector<8x1xf32> -> vector<8x1xf32>
    %225 = vector.broadcast %224 : vector<8x1xf32> to vector<8x8xf32>
    %226 = arith.mulf %221, %225 : vector<8x8xf32>
    %cst_66 = arith.constant dense<0.000000e+00> : vector<8x8xf32>
    %227 = tpu.matmul %226, %211, %cst_66 {dimension_numbers = #tpu.dot_dimension_numbers<[1], [0], [0], [1], [0, 0, 1, 1], [], []>} : vector<8x8xf32>, vector<8x8xf32>, vector<8x8xf32> -> vector<8x8xf32>
    %228 = tpu.concatenate %170, %189, %208, %227 in 1 : vector<8x8xf32>, vector<8x8xf32>, vector<8x8xf32>, vector<8x8xf32> -> vector<8x32xf32>
    %229 = vector.extract_strided_slice %151 {offsets = [8, 0], sizes = [8, 8], strides = [1, 1]} : vector<16x96xf32> to vector<8x8xf32>
    %230 = vector.extract_strided_slice %151 {offsets = [8, 32], sizes = [8, 8], strides = [1, 1]} : vector<16x96xf32> to vector<8x8xf32>
    %231 = vector.extract_strided_slice %151 {offsets = [8, 64], sizes = [8, 8], strides = [1, 1]} : vector<16x96xf32> to vector<8x8xf32>
    %cst_67 = arith.constant dense<0.000000e+00> : vector<8x8xf32>
    %232 = tpu.matmul %229, %230, %cst_67 {dimension_numbers = #tpu.dot_dimension_numbers<[1], [1], [0], [0], [0, 0, 1, 0], [], []>} : vector<8x8xf32>, vector<8x8xf32>, vector<8x8xf32> -> vector<8x8xf32>
    %cst_68 = arith.constant 0.353553385 : f32
    %233 = vector.broadcast %cst_68 : f32 to vector<8x8xf32>
    %234 = arith.mulf %232, %233 : vector<8x8xf32>
    %235 = vector.broadcast %110 : vector<1x8xf32> to vector<8x8xf32>
    %236 = arith.addf %234, %235 : vector<8x8xf32>
    %cst_69 = arith.constant dense<0xFF800000> : vector<8xf32>
    %237 = vector.multi_reduction <maximumf>, %236, %cst_69 [1] : vector<8x8xf32> to vector<8xf32>
    %238 = vector.shape_cast %237 : vector<8xf32> to vector<8x1xf32>
    %239 = vector.broadcast %238 : vector<8x1xf32> to vector<8x8xf32>
    %240 = arith.subf %236, %239 : vector<8x8xf32>
    %241 = math.exp %240 : vector<8x8xf32>
    %cst_70 = arith.constant dense<0.000000e+00> : vector<8xf32>
    %242 = vector.multi_reduction <add>, %241, %cst_70 [1] : vector<8x8xf32> to vector<8xf32>
    %243 = vector.shape_cast %242 : vector<8xf32> to vector<8x1xf32>
    %244 = tpu.reciprocal %243 {approx = true} : vector<8x1xf32> -> vector<8x1xf32>
    %245 = vector.broadcast %244 : vector<8x1xf32> to vector<8x8xf32>
    %246 = arith.mulf %241, %245 : vector<8x8xf32>
    %cst_71 = arith.constant dense<0.000000e+00> : vector<8x8xf32>
    %247 = tpu.matmul %246, %231, %cst_71 {dimension_numbers = #tpu.dot_dimension_numbers<[1], [0], [0], [1], [0, 0, 1, 1], [], []>} : vector<8x8xf32>, vector<8x8xf32>, vector<8x8xf32> -> vector<8x8xf32>
    %248 = vector.extract_strided_slice %151 {offsets = [8, 8], sizes = [8, 8], strides = [1, 1]} : vector<16x96xf32> to vector<8x8xf32>
    %249 = vector.extract_strided_slice %151 {offsets = [8, 40], sizes = [8, 8], strides = [1, 1]} : vector<16x96xf32> to vector<8x8xf32>
    %250 = vector.extract_strided_slice %151 {offsets = [8, 72], sizes = [8, 8], strides = [1, 1]} : vector<16x96xf32> to vector<8x8xf32>
    %cst_72 = arith.constant dense<0.000000e+00> : vector<8x8xf32>
    %251 = tpu.matmul %248, %249, %cst_72 {dimension_numbers = #tpu.dot_dimension_numbers<[1], [1], [0], [0], [0, 0, 1, 0], [], []>} : vector<8x8xf32>, vector<8x8xf32>, vector<8x8xf32> -> vector<8x8xf32>
    %cst_73 = arith.constant 0.353553385 : f32
    %252 = vector.broadcast %cst_73 : f32 to vector<8x8xf32>
    %253 = arith.mulf %251, %252 : vector<8x8xf32>
    %254 = vector.broadcast %110 : vector<1x8xf32> to vector<8x8xf32>
    %255 = arith.addf %253, %254 : vector<8x8xf32>
    %cst_74 = arith.constant dense<0xFF800000> : vector<8xf32>
    %256 = vector.multi_reduction <maximumf>, %255, %cst_74 [1] : vector<8x8xf32> to vector<8xf32>
    %257 = vector.shape_cast %256 : vector<8xf32> to vector<8x1xf32>
    %258 = vector.broadcast %257 : vector<8x1xf32> to vector<8x8xf32>
    %259 = arith.subf %255, %258 : vector<8x8xf32>
    %260 = math.exp %259 : vector<8x8xf32>
    %cst_75 = arith.constant dense<0.000000e+00> : vector<8xf32>
    %261 = vector.multi_reduction <add>, %260, %cst_75 [1] : vector<8x8xf32> to vector<8xf32>
    %262 = vector.shape_cast %261 : vector<8xf32> to vector<8x1xf32>
    %263 = tpu.reciprocal %262 {approx = true} : vector<8x1xf32> -> vector<8x1xf32>
    %264 = vector.broadcast %263 : vector<8x1xf32> to vector<8x8xf32>
    %265 = arith.mulf %260, %264 : vector<8x8xf32>
    %cst_76 = arith.constant dense<0.000000e+00> : vector<8x8xf32>
    %266 = tpu.matmul %265, %250, %cst_76 {dimension_numbers = #tpu.dot_dimension_numbers<[1], [0], [0], [1], [0, 0, 1, 1], [], []>} : vector<8x8xf32>, vector<8x8xf32>, vector<8x8xf32> -> vector<8x8xf32>
    %267 = vector.extract_strided_slice %151 {offsets = [8, 16], sizes = [8, 8], strides = [1, 1]} : vector<16x96xf32> to vector<8x8xf32>
    %268 = vector.extract_strided_slice %151 {offsets = [8, 48], sizes = [8, 8], strides = [1, 1]} : vector<16x96xf32> to vector<8x8xf32>
    %269 = vector.extract_strided_slice %151 {offsets = [8, 80], sizes = [8, 8], strides = [1, 1]} : vector<16x96xf32> to vector<8x8xf32>
    %cst_77 = arith.constant dense<0.000000e+00> : vector<8x8xf32>
    %270 = tpu.matmul %267, %268, %cst_77 {dimension_numbers = #tpu.dot_dimension_numbers<[1], [1], [0], [0], [0, 0, 1, 0], [], []>} : vector<8x8xf32>, vector<8x8xf32>, vector<8x8xf32> -> vector<8x8xf32>
    %cst_78 = arith.constant 0.353553385 : f32
    %271 = vector.broadcast %cst_78 : f32 to vector<8x8xf32>
    %272 = arith.mulf %270, %271 : vector<8x8xf32>
    %273 = vector.broadcast %110 : vector<1x8xf32> to vector<8x8xf32>
    %274 = arith.addf %272, %273 : vector<8x8xf32>
    %cst_79 = arith.constant dense<0xFF800000> : vector<8xf32>
    %275 = vector.multi_reduction <maximumf>, %274, %cst_79 [1] : vector<8x8xf32> to vector<8xf32>
    %276 = vector.shape_cast %275 : vector<8xf32> to vector<8x1xf32>
    %277 = vector.broadcast %276 : vector<8x1xf32> to vector<8x8xf32>
    %278 = arith.subf %274, %277 : vector<8x8xf32>
    %279 = math.exp %278 : vector<8x8xf32>
    %cst_80 = arith.constant dense<0.000000e+00> : vector<8xf32>
    %280 = vector.multi_reduction <add>, %279, %cst_80 [1] : vector<8x8xf32> to vector<8xf32>
    %281 = vector.shape_cast %280 : vector<8xf32> to vector<8x1xf32>
    %282 = tpu.reciprocal %281 {approx = true} : vector<8x1xf32> -> vector<8x1xf32>
    %283 = vector.broadcast %282 : vector<8x1xf32> to vector<8x8xf32>
    %284 = arith.mulf %279, %283 : vector<8x8xf32>
    %cst_81 = arith.constant dense<0.000000e+00> : vector<8x8xf32>
    %285 = tpu.matmul %284, %269, %cst_81 {dimension_numbers = #tpu.dot_dimension_numbers<[1], [0], [0], [1], [0, 0, 1, 1], [], []>} : vector<8x8xf32>, vector<8x8xf32>, vector<8x8xf32> -> vector<8x8xf32>
    %286 = vector.extract_strided_slice %151 {offsets = [8, 24], sizes = [8, 8], strides = [1, 1]} : vector<16x96xf32> to vector<8x8xf32>
    %287 = vector.extract_strided_slice %151 {offsets = [8, 56], sizes = [8, 8], strides = [1, 1]} : vector<16x96xf32> to vector<8x8xf32>
    %288 = vector.extract_strided_slice %151 {offsets = [8, 88], sizes = [8, 8], strides = [1, 1]} : vector<16x96xf32> to vector<8x8xf32>
    %cst_82 = arith.constant dense<0.000000e+00> : vector<8x8xf32>
    %289 = tpu.matmul %286, %287, %cst_82 {dimension_numbers = #tpu.dot_dimension_numbers<[1], [1], [0], [0], [0, 0, 1, 0], [], []>} : vector<8x8xf32>, vector<8x8xf32>, vector<8x8xf32> -> vector<8x8xf32>
    %cst_83 = arith.constant 0.353553385 : f32
    %290 = vector.broadcast %cst_83 : f32 to vector<8x8xf32>
    %291 = arith.mulf %289, %290 : vector<8x8xf32>
    %292 = vector.broadcast %110 : vector<1x8xf32> to vector<8x8xf32>
    %293 = arith.addf %291, %292 : vector<8x8xf32>
    %cst_84 = arith.constant dense<0xFF800000> : vector<8xf32>
    %294 = vector.multi_reduction <maximumf>, %293, %cst_84 [1] : vector<8x8xf32> to vector<8xf32>
    %295 = vector.shape_cast %294 : vector<8xf32> to vector<8x1xf32>
    %296 = vector.broadcast %295 : vector<8x1xf32> to vector<8x8xf32>
    %297 = arith.subf %293, %296 : vector<8x8xf32>
    %298 = math.exp %297 : vector<8x8xf32>
    %cst_85 = arith.constant dense<0.000000e+00> : vector<8xf32>
    %299 = vector.multi_reduction <add>, %298, %cst_85 [1] : vector<8x8xf32> to vector<8xf32>
    %300 = vector.shape_cast %299 : vector<8xf32> to vector<8x1xf32>
    %301 = tpu.reciprocal %300 {approx = true} : vector<8x1xf32> -> vector<8x1xf32>
    %302 = vector.broadcast %301 : vector<8x1xf32> to vector<8x8xf32>
    %303 = arith.mulf %298, %302 : vector<8x8xf32>
    %cst_86 = arith.constant dense<0.000000e+00> : vector<8x8xf32>
    %304 = tpu.matmul %303, %288, %cst_86 {dimension_numbers = #tpu.dot_dimension_numbers<[1], [0], [0], [1], [0, 0, 1, 1], [], []>} : vector<8x8xf32>, vector<8x8xf32>, vector<8x8xf32> -> vector<8x8xf32>
    %305 = tpu.concatenate %247, %266, %285, %304 in 1 : vector<8x8xf32>, vector<8x8xf32>, vector<8x8xf32>, vector<8x8xf32> -> vector<8x32xf32>
    %306 = tpu.concatenate %228, %305 in 0 : vector<8x32xf32>, vector<8x32xf32> -> vector<16x32xf32>
    %cst_87 = arith.constant dense<0.000000e+00> : vector<16x32xf32>
    %307 = tpu.matmul %306, %117, %cst_87 {dimension_numbers = #tpu.dot_dimension_numbers<[1], [0], [0], [1], [0, 0, 1, 1], [], []>} : vector<16x32xf32>, vector<32x32xf32>, vector<16x32xf32> -> vector<16x32xf32>
    %308 = vector.broadcast %118 : vector<1x32xf32> to vector<16x32xf32>
    %309 = arith.addf %307, %308 : vector<16x32xf32>
    %310 = arith.addf %104, %309 : vector<16x32xf32>
    %cst_88 = arith.constant dense<0.000000e+00> : vector<16xf32>
    %311 = vector.multi_reduction <add>, %310, %cst_88 [1] : vector<16x32xf32> to vector<16xf32>
    %312 = vector.shape_cast %311 : vector<16xf32> to vector<16x1xf32>
    %cst_89 = arith.constant 3.200000e+01 : f32
    %313 = vector.broadcast %cst_89 : f32 to vector<16x1xf32>
    %314 = arith.divf %312, %313 : vector<16x1xf32>
    %315 = vector.broadcast %314 : vector<16x1xf32> to vector<16x32xf32>
    %316 = arith.subf %310, %315 : vector<16x32xf32>
    %317 = vector.broadcast %314 : vector<16x1xf32> to vector<16x32xf32>
    %318 = arith.subf %310, %317 : vector<16x32xf32>
    %319 = arith.mulf %316, %318 : vector<16x32xf32>
    %cst_90 = arith.constant dense<0.000000e+00> : vector<16xf32>
    %320 = vector.multi_reduction <add>, %319, %cst_90 [1] : vector<16x32xf32> to vector<16xf32>
    %321 = vector.shape_cast %320 : vector<16xf32> to vector<16x1xf32>
    %cst_91 = arith.constant 3.200000e+01 : f32
    %322 = vector.broadcast %cst_91 : f32 to vector<16x1xf32>
    %323 = arith.divf %321, %322 : vector<16x1xf32>
    %324 = vector.broadcast %314 : vector<16x1xf32> to vector<16x32xf32>
    %325 = arith.subf %310, %324 : vector<16x32xf32>
    %cst_92 = arith.constant 9.99999974E-6 : f32
    %326 = vector.broadcast %cst_92 : f32 to vector<16x1xf32>
    %327 = arith.addf %323, %326 : vector<16x1xf32>
    %328 = math.rsqrt %327 : vector<16x1xf32>
    %329 = vector.broadcast %328 : vector<16x1xf32> to vector<16x32xf32>
    %330 = arith.mulf %325, %329 : vector<16x32xf32>
    %331 = vector.broadcast %119 : vector<1x32xf32> to vector<16x32xf32>
    %332 = arith.mulf %330, %331 : vector<16x32xf32>
    %333 = vector.broadcast %120 : vector<1x32xf32> to vector<16x32xf32>
    %334 = arith.addf %332, %333 : vector<16x32xf32>
    %cst_93 = arith.constant dense<0.000000e+00> : vector<16x128xf32>
    %335 = tpu.matmul %334, %121, %cst_93 {dimension_numbers = #tpu.dot_dimension_numbers<[1], [0], [0], [1], [0, 0, 1, 1], [], []>} : vector<16x32xf32>, vector<32x128xf32>, vector<16x128xf32> -> vector<16x128xf32>
    %336 = vector.broadcast %122 : vector<1x128xf32> to vector<16x128xf32>
    %337 = arith.addf %335, %336 : vector<16x128xf32>
    %cst_94 = arith.constant 5.000000e-01 : f32
    %338 = vector.broadcast %cst_94 : f32 to vector<16x128xf32>
    %339 = arith.mulf %338, %337 : vector<16x128xf32>
    %cst_95 = arith.constant 0.707106769 : f32
    %340 = vector.broadcast %cst_95 : f32 to vector<16x128xf32>
    %341 = arith.mulf %337, %340 : vector<16x128xf32>
    %342 = math.erf %341 : vector<16x128xf32>
    %cst_96 = arith.constant 1.000000e+00 : f32
    %343 = vector.broadcast %cst_96 : f32 to vector<16x128xf32>
    %344 = arith.addf %343, %342 : vector<16x128xf32>
    %345 = arith.mulf %339, %344 : vector<16x128xf32>
    %cst_97 = arith.constant dense<0.000000e+00> : vector<16x32xf32>
    %346 = tpu.matmul %345, %123, %cst_97 {dimension_numbers = #tpu.dot_dimension_numbers<[1], [0], [0], [1], [0, 0, 1, 1], [], []>} : vector<16x128xf32>, vector<128x32xf32>, vector<16x32xf32> -> vector<16x32xf32>
    %347 = vector.broadcast %124 : vector<1x32xf32> to vector<16x32xf32>
    %348 = arith.addf %346, %347 : vector<16x32xf32>
    %349 = arith.addf %310, %348 : vector<16x32xf32>
    %cst_98 = arith.constant dense<0.000000e+00> : vector<16xf32>
    %350 = vector.multi_reduction <add>, %349, %cst_98 [1] : vector<16x32xf32> to vector<16xf32>
    %351 = vector.shape_cast %350 : vector<16xf32> to vector<16x1xf32>
    %cst_99 = arith.constant 3.200000e+01 : f32
    %352 = vector.broadcast %cst_99 : f32 to vector<16x1xf32>
    %353 = arith.divf %351, %352 : vector<16x1xf32>
    %354 = vector.broadcast %353 : vector<16x1xf32> to vector<16x32xf32>
    %355 = arith.subf %349, %354 : vector<16x32xf32>
    %356 = vector.broadcast %353 : vector<16x1xf32> to vector<16x32xf32>
    %357 = arith.subf %349, %356 : vector<16x32xf32>
    %358 = arith.mulf %355, %357 : vector<16x32xf32>
    %cst_100 = arith.constant dense<0.000000e+00> : vector<16xf32>
    %359 = vector.multi_reduction <add>, %358, %cst_100 [1] : vector<16x32xf32> to vector<16xf32>
    %360 = vector.shape_cast %359 : vector<16xf32> to vector<16x1xf32>
    %cst_101 = arith.constant 3.200000e+01 : f32
    %361 = vector.broadcast %cst_101 : f32 to vector<16x1xf32>
    %362 = arith.divf %360, %361 : vector<16x1xf32>
    %363 = vector.broadcast %353 : vector<16x1xf32> to vector<16x32xf32>
    %364 = arith.subf %349, %363 : vector<16x32xf32>
    %cst_102 = arith.constant 9.99999974E-6 : f32
    %365 = vector.broadcast %cst_102 : f32 to vector<16x1xf32>
    %366 = arith.addf %362, %365 : vector<16x1xf32>
    %367 = math.rsqrt %366 : vector<16x1xf32>
    %368 = vector.broadcast %367 : vector<16x1xf32> to vector<16x32xf32>
    %369 = arith.mulf %364, %368 : vector<16x32xf32>
    %370 = vector.broadcast %111 : vector<1x32xf32> to vector<16x32xf32>
    %371 = arith.mulf %369, %370 : vector<16x32xf32>
    %372 = vector.broadcast %112 : vector<1x32xf32> to vector<16x32xf32>
    %373 = arith.addf %371, %372 : vector<16x32xf32>
    %c496 = arith.constant 496 : index
    %c0_103 = arith.constant 0 : index
    %374 = vector.load %arg4[%c496, %c0_103] : memref<960x128xf32, #tpu.memory_space<vmem>>, vector<1x32xf32>
    %c504 = arith.constant 504 : index
    %c0_104 = arith.constant 0 : index
    %375 = vector.load %arg4[%c504, %c0_104] : memref<960x128xf32, #tpu.memory_space<vmem>>, vector<1x32xf32>
    %c512 = arith.constant 512 : index
    %c0_105 = arith.constant 0 : index
    %376 = vector.load %arg4[%c512, %c0_105] : memref<960x128xf32, #tpu.memory_space<vmem>>, vector<32x96xf32>
    %c544 = arith.constant 544 : index
    %c0_106 = arith.constant 0 : index
    %377 = vector.load %arg4[%c544, %c0_106] : memref<960x128xf32, #tpu.memory_space<vmem>>, vector<1x96xf32>
    %c552 = arith.constant 552 : index
    %c0_107 = arith.constant 0 : index
    %378 = vector.load %arg4[%c552, %c0_107] : memref<960x128xf32, #tpu.memory_space<vmem>>, vector<32x32xf32>
    %c584 = arith.constant 584 : index
    %c0_108 = arith.constant 0 : index
    %379 = vector.load %arg4[%c584, %c0_108] : memref<960x128xf32, #tpu.memory_space<vmem>>, vector<1x32xf32>
    %c592 = arith.constant 592 : index
    %c0_109 = arith.constant 0 : index
    %380 = vector.load %arg4[%c592, %c0_109] : memref<960x128xf32, #tpu.memory_space<vmem>>, vector<1x32xf32>
    %c600 = arith.constant 600 : index
    %c0_110 = arith.constant 0 : index
    %381 = vector.load %arg4[%c600, %c0_110] : memref<960x128xf32, #tpu.memory_space<vmem>>, vector<1x32xf32>
    %c608 = arith.constant 608 : index
    %c0_111 = arith.constant 0 : index
    %382 = vector.load %arg4[%c608, %c0_111] : memref<960x128xf32, #tpu.memory_space<vmem>>, vector<32x128xf32>
    %c640 = arith.constant 640 : index
    %c0_112 = arith.constant 0 : index
    %383 = vector.load %arg4[%c640, %c0_112] : memref<960x128xf32, #tpu.memory_space<vmem>>, vector<1x128xf32>
    %c648 = arith.constant 648 : index
    %c0_113 = arith.constant 0 : index
    %384 = vector.load %arg4[%c648, %c0_113] : memref<960x128xf32, #tpu.memory_space<vmem>>, vector<128x32xf32>
    %c776 = arith.constant 776 : index
    %c0_114 = arith.constant 0 : index
    %385 = vector.load %arg4[%c776, %c0_114] : memref<960x128xf32, #tpu.memory_space<vmem>>, vector<1x32xf32>
    %cst_115 = arith.constant dense<0.000000e+00> : vector<16xf32>
    %386 = vector.multi_reduction <add>, %373, %cst_115 [1] : vector<16x32xf32> to vector<16xf32>
    %387 = vector.shape_cast %386 : vector<16xf32> to vector<16x1xf32>
    %cst_116 = arith.constant 3.200000e+01 : f32
    %388 = vector.broadcast %cst_116 : f32 to vector<16x1xf32>
    %389 = arith.divf %387, %388 : vector<16x1xf32>
    %390 = vector.broadcast %389 : vector<16x1xf32> to vector<16x32xf32>
    %391 = arith.subf %373, %390 : vector<16x32xf32>
    %392 = vector.broadcast %389 : vector<16x1xf32> to vector<16x32xf32>
    %393 = arith.subf %373, %392 : vector<16x32xf32>
    %394 = arith.mulf %391, %393 : vector<16x32xf32>
    %cst_117 = arith.constant dense<0.000000e+00> : vector<16xf32>
    %395 = vector.multi_reduction <add>, %394, %cst_117 [1] : vector<16x32xf32> to vector<16xf32>
    %396 = vector.shape_cast %395 : vector<16xf32> to vector<16x1xf32>
    %cst_118 = arith.constant 3.200000e+01 : f32
    %397 = vector.broadcast %cst_118 : f32 to vector<16x1xf32>
    %398 = arith.divf %396, %397 : vector<16x1xf32>
    %399 = vector.broadcast %389 : vector<16x1xf32> to vector<16x32xf32>
    %400 = arith.subf %373, %399 : vector<16x32xf32>
    %cst_119 = arith.constant 9.99999974E-6 : f32
    %401 = vector.broadcast %cst_119 : f32 to vector<16x1xf32>
    %402 = arith.addf %398, %401 : vector<16x1xf32>
    %403 = math.rsqrt %402 : vector<16x1xf32>
    %404 = vector.broadcast %403 : vector<16x1xf32> to vector<16x32xf32>
    %405 = arith.mulf %400, %404 : vector<16x32xf32>
    %406 = vector.broadcast %374 : vector<1x32xf32> to vector<16x32xf32>
    %407 = arith.mulf %405, %406 : vector<16x32xf32>
    %408 = vector.broadcast %375 : vector<1x32xf32> to vector<16x32xf32>
    %409 = arith.addf %407, %408 : vector<16x32xf32>
    %cst_120 = arith.constant dense<0.000000e+00> : vector<16x96xf32>
    %410 = tpu.matmul %409, %376, %cst_120 {dimension_numbers = #tpu.dot_dimension_numbers<[1], [0], [0], [1], [0, 0, 1, 1], [], []>} : vector<16x32xf32>, vector<32x96xf32>, vector<16x96xf32> -> vector<16x96xf32>
    %411 = vector.broadcast %377 : vector<1x96xf32> to vector<16x96xf32>
    %412 = arith.addf %410, %411 : vector<16x96xf32>
    %413 = vector.extract_strided_slice %412 {offsets = [0, 0], sizes = [8, 8], strides = [1, 1]} : vector<16x96xf32> to vector<8x8xf32>
    %414 = vector.extract_strided_slice %412 {offsets = [0, 32], sizes = [8, 8], strides = [1, 1]} : vector<16x96xf32> to vector<8x8xf32>
    %415 = vector.extract_strided_slice %412 {offsets = [0, 64], sizes = [8, 8], strides = [1, 1]} : vector<16x96xf32> to vector<8x8xf32>
    %cst_121 = arith.constant dense<0.000000e+00> : vector<8x8xf32>
    %416 = tpu.matmul %413, %414, %cst_121 {dimension_numbers = #tpu.dot_dimension_numbers<[1], [1], [0], [0], [0, 0, 1, 0], [], []>} : vector<8x8xf32>, vector<8x8xf32>, vector<8x8xf32> -> vector<8x8xf32>
    %cst_122 = arith.constant 0.353553385 : f32
    %417 = vector.broadcast %cst_122 : f32 to vector<8x8xf32>
    %418 = arith.mulf %416, %417 : vector<8x8xf32>
    %419 = vector.broadcast %110 : vector<1x8xf32> to vector<8x8xf32>
    %420 = arith.addf %418, %419 : vector<8x8xf32>
    %cst_123 = arith.constant dense<0xFF800000> : vector<8xf32>
    %421 = vector.multi_reduction <maximumf>, %420, %cst_123 [1] : vector<8x8xf32> to vector<8xf32>
    %422 = vector.shape_cast %421 : vector<8xf32> to vector<8x1xf32>
    %423 = vector.broadcast %422 : vector<8x1xf32> to vector<8x8xf32>
    %424 = arith.subf %420, %423 : vector<8x8xf32>
    %425 = math.exp %424 : vector<8x8xf32>
    %cst_124 = arith.constant dense<0.000000e+00> : vector<8xf32>
    %426 = vector.multi_reduction <add>, %425, %cst_124 [1] : vector<8x8xf32> to vector<8xf32>
    %427 = vector.shape_cast %426 : vector<8xf32> to vector<8x1xf32>
    %428 = tpu.reciprocal %427 {approx = true} : vector<8x1xf32> -> vector<8x1xf32>
    %429 = vector.broadcast %428 : vector<8x1xf32> to vector<8x8xf32>
    %430 = arith.mulf %425, %429 : vector<8x8xf32>
    %cst_125 = arith.constant dense<0.000000e+00> : vector<8x8xf32>
    %431 = tpu.matmul %430, %415, %cst_125 {dimension_numbers = #tpu.dot_dimension_numbers<[1], [0], [0], [1], [0, 0, 1, 1], [], []>} : vector<8x8xf32>, vector<8x8xf32>, vector<8x8xf32> -> vector<8x8xf32>
    %432 = vector.extract_strided_slice %412 {offsets = [0, 8], sizes = [8, 8], strides = [1, 1]} : vector<16x96xf32> to vector<8x8xf32>
    %433 = vector.extract_strided_slice %412 {offsets = [0, 40], sizes = [8, 8], strides = [1, 1]} : vector<16x96xf32> to vector<8x8xf32>
    %434 = vector.extract_strided_slice %412 {offsets = [0, 72], sizes = [8, 8], strides = [1, 1]} : vector<16x96xf32> to vector<8x8xf32>
    %cst_126 = arith.constant dense<0.000000e+00> : vector<8x8xf32>
    %435 = tpu.matmul %432, %433, %cst_126 {dimension_numbers = #tpu.dot_dimension_numbers<[1], [1], [0], [0], [0, 0, 1, 0], [], []>} : vector<8x8xf32>, vector<8x8xf32>, vector<8x8xf32> -> vector<8x8xf32>
    %cst_127 = arith.constant 0.353553385 : f32
    %436 = vector.broadcast %cst_127 : f32 to vector<8x8xf32>
    %437 = arith.mulf %435, %436 : vector<8x8xf32>
    %438 = vector.broadcast %110 : vector<1x8xf32> to vector<8x8xf32>
    %439 = arith.addf %437, %438 : vector<8x8xf32>
    %cst_128 = arith.constant dense<0xFF800000> : vector<8xf32>
    %440 = vector.multi_reduction <maximumf>, %439, %cst_128 [1] : vector<8x8xf32> to vector<8xf32>
    %441 = vector.shape_cast %440 : vector<8xf32> to vector<8x1xf32>
    %442 = vector.broadcast %441 : vector<8x1xf32> to vector<8x8xf32>
    %443 = arith.subf %439, %442 : vector<8x8xf32>
    %444 = math.exp %443 : vector<8x8xf32>
    %cst_129 = arith.constant dense<0.000000e+00> : vector<8xf32>
    %445 = vector.multi_reduction <add>, %444, %cst_129 [1] : vector<8x8xf32> to vector<8xf32>
    %446 = vector.shape_cast %445 : vector<8xf32> to vector<8x1xf32>
    %447 = tpu.reciprocal %446 {approx = true} : vector<8x1xf32> -> vector<8x1xf32>
    %448 = vector.broadcast %447 : vector<8x1xf32> to vector<8x8xf32>
    %449 = arith.mulf %444, %448 : vector<8x8xf32>
    %cst_130 = arith.constant dense<0.000000e+00> : vector<8x8xf32>
    %450 = tpu.matmul %449, %434, %cst_130 {dimension_numbers = #tpu.dot_dimension_numbers<[1], [0], [0], [1], [0, 0, 1, 1], [], []>} : vector<8x8xf32>, vector<8x8xf32>, vector<8x8xf32> -> vector<8x8xf32>
    %451 = vector.extract_strided_slice %412 {offsets = [0, 16], sizes = [8, 8], strides = [1, 1]} : vector<16x96xf32> to vector<8x8xf32>
    %452 = vector.extract_strided_slice %412 {offsets = [0, 48], sizes = [8, 8], strides = [1, 1]} : vector<16x96xf32> to vector<8x8xf32>
    %453 = vector.extract_strided_slice %412 {offsets = [0, 80], sizes = [8, 8], strides = [1, 1]} : vector<16x96xf32> to vector<8x8xf32>
    %cst_131 = arith.constant dense<0.000000e+00> : vector<8x8xf32>
    %454 = tpu.matmul %451, %452, %cst_131 {dimension_numbers = #tpu.dot_dimension_numbers<[1], [1], [0], [0], [0, 0, 1, 0], [], []>} : vector<8x8xf32>, vector<8x8xf32>, vector<8x8xf32> -> vector<8x8xf32>
    %cst_132 = arith.constant 0.353553385 : f32
    %455 = vector.broadcast %cst_132 : f32 to vector<8x8xf32>
    %456 = arith.mulf %454, %455 : vector<8x8xf32>
    %457 = vector.broadcast %110 : vector<1x8xf32> to vector<8x8xf32>
    %458 = arith.addf %456, %457 : vector<8x8xf32>
    %cst_133 = arith.constant dense<0xFF800000> : vector<8xf32>
    %459 = vector.multi_reduction <maximumf>, %458, %cst_133 [1] : vector<8x8xf32> to vector<8xf32>
    %460 = vector.shape_cast %459 : vector<8xf32> to vector<8x1xf32>
    %461 = vector.broadcast %460 : vector<8x1xf32> to vector<8x8xf32>
    %462 = arith.subf %458, %461 : vector<8x8xf32>
    %463 = math.exp %462 : vector<8x8xf32>
    %cst_134 = arith.constant dense<0.000000e+00> : vector<8xf32>
    %464 = vector.multi_reduction <add>, %463, %cst_134 [1] : vector<8x8xf32> to vector<8xf32>
    %465 = vector.shape_cast %464 : vector<8xf32> to vector<8x1xf32>
    %466 = tpu.reciprocal %465 {approx = true} : vector<8x1xf32> -> vector<8x1xf32>
    %467 = vector.broadcast %466 : vector<8x1xf32> to vector<8x8xf32>
    %468 = arith.mulf %463, %467 : vector<8x8xf32>
    %cst_135 = arith.constant dense<0.000000e+00> : vector<8x8xf32>
    %469 = tpu.matmul %468, %453, %cst_135 {dimension_numbers = #tpu.dot_dimension_numbers<[1], [0], [0], [1], [0, 0, 1, 1], [], []>} : vector<8x8xf32>, vector<8x8xf32>, vector<8x8xf32> -> vector<8x8xf32>
    %470 = vector.extract_strided_slice %412 {offsets = [0, 24], sizes = [8, 8], strides = [1, 1]} : vector<16x96xf32> to vector<8x8xf32>
    %471 = vector.extract_strided_slice %412 {offsets = [0, 56], sizes = [8, 8], strides = [1, 1]} : vector<16x96xf32> to vector<8x8xf32>
    %472 = vector.extract_strided_slice %412 {offsets = [0, 88], sizes = [8, 8], strides = [1, 1]} : vector<16x96xf32> to vector<8x8xf32>
    %cst_136 = arith.constant dense<0.000000e+00> : vector<8x8xf32>
    %473 = tpu.matmul %470, %471, %cst_136 {dimension_numbers = #tpu.dot_dimension_numbers<[1], [1], [0], [0], [0, 0, 1, 0], [], []>} : vector<8x8xf32>, vector<8x8xf32>, vector<8x8xf32> -> vector<8x8xf32>
    %cst_137 = arith.constant 0.353553385 : f32
    %474 = vector.broadcast %cst_137 : f32 to vector<8x8xf32>
    %475 = arith.mulf %473, %474 : vector<8x8xf32>
    %476 = vector.broadcast %110 : vector<1x8xf32> to vector<8x8xf32>
    %477 = arith.addf %475, %476 : vector<8x8xf32>
    %cst_138 = arith.constant dense<0xFF800000> : vector<8xf32>
    %478 = vector.multi_reduction <maximumf>, %477, %cst_138 [1] : vector<8x8xf32> to vector<8xf32>
    %479 = vector.shape_cast %478 : vector<8xf32> to vector<8x1xf32>
    %480 = vector.broadcast %479 : vector<8x1xf32> to vector<8x8xf32>
    %481 = arith.subf %477, %480 : vector<8x8xf32>
    %482 = math.exp %481 : vector<8x8xf32>
    %cst_139 = arith.constant dense<0.000000e+00> : vector<8xf32>
    %483 = vector.multi_reduction <add>, %482, %cst_139 [1] : vector<8x8xf32> to vector<8xf32>
    %484 = vector.shape_cast %483 : vector<8xf32> to vector<8x1xf32>
    %485 = tpu.reciprocal %484 {approx = true} : vector<8x1xf32> -> vector<8x1xf32>
    %486 = vector.broadcast %485 : vector<8x1xf32> to vector<8x8xf32>
    %487 = arith.mulf %482, %486 : vector<8x8xf32>
    %cst_140 = arith.constant dense<0.000000e+00> : vector<8x8xf32>
    %488 = tpu.matmul %487, %472, %cst_140 {dimension_numbers = #tpu.dot_dimension_numbers<[1], [0], [0], [1], [0, 0, 1, 1], [], []>} : vector<8x8xf32>, vector<8x8xf32>, vector<8x8xf32> -> vector<8x8xf32>
    %489 = tpu.concatenate %431, %450, %469, %488 in 1 : vector<8x8xf32>, vector<8x8xf32>, vector<8x8xf32>, vector<8x8xf32> -> vector<8x32xf32>
    %490 = vector.extract_strided_slice %412 {offsets = [8, 0], sizes = [8, 8], strides = [1, 1]} : vector<16x96xf32> to vector<8x8xf32>
    %491 = vector.extract_strided_slice %412 {offsets = [8, 32], sizes = [8, 8], strides = [1, 1]} : vector<16x96xf32> to vector<8x8xf32>
    %492 = vector.extract_strided_slice %412 {offsets = [8, 64], sizes = [8, 8], strides = [1, 1]} : vector<16x96xf32> to vector<8x8xf32>
    %cst_141 = arith.constant dense<0.000000e+00> : vector<8x8xf32>
    %493 = tpu.matmul %490, %491, %cst_141 {dimension_numbers = #tpu.dot_dimension_numbers<[1], [1], [0], [0], [0, 0, 1, 0], [], []>} : vector<8x8xf32>, vector<8x8xf32>, vector<8x8xf32> -> vector<8x8xf32>
    %cst_142 = arith.constant 0.353553385 : f32
    %494 = vector.broadcast %cst_142 : f32 to vector<8x8xf32>
    %495 = arith.mulf %493, %494 : vector<8x8xf32>
    %496 = vector.broadcast %110 : vector<1x8xf32> to vector<8x8xf32>
    %497 = arith.addf %495, %496 : vector<8x8xf32>
    %cst_143 = arith.constant dense<0xFF800000> : vector<8xf32>
    %498 = vector.multi_reduction <maximumf>, %497, %cst_143 [1] : vector<8x8xf32> to vector<8xf32>
    %499 = vector.shape_cast %498 : vector<8xf32> to vector<8x1xf32>
    %500 = vector.broadcast %499 : vector<8x1xf32> to vector<8x8xf32>
    %501 = arith.subf %497, %500 : vector<8x8xf32>
    %502 = math.exp %501 : vector<8x8xf32>
    %cst_144 = arith.constant dense<0.000000e+00> : vector<8xf32>
    %503 = vector.multi_reduction <add>, %502, %cst_144 [1] : vector<8x8xf32> to vector<8xf32>
    %504 = vector.shape_cast %503 : vector<8xf32> to vector<8x1xf32>
    %505 = tpu.reciprocal %504 {approx = true} : vector<8x1xf32> -> vector<8x1xf32>
    %506 = vector.broadcast %505 : vector<8x1xf32> to vector<8x8xf32>
    %507 = arith.mulf %502, %506 : vector<8x8xf32>
    %cst_145 = arith.constant dense<0.000000e+00> : vector<8x8xf32>
    %508 = tpu.matmul %507, %492, %cst_145 {dimension_numbers = #tpu.dot_dimension_numbers<[1], [0], [0], [1], [0, 0, 1, 1], [], []>} : vector<8x8xf32>, vector<8x8xf32>, vector<8x8xf32> -> vector<8x8xf32>
    %509 = vector.extract_strided_slice %412 {offsets = [8, 8], sizes = [8, 8], strides = [1, 1]} : vector<16x96xf32> to vector<8x8xf32>
    %510 = vector.extract_strided_slice %412 {offsets = [8, 40], sizes = [8, 8], strides = [1, 1]} : vector<16x96xf32> to vector<8x8xf32>
    %511 = vector.extract_strided_slice %412 {offsets = [8, 72], sizes = [8, 8], strides = [1, 1]} : vector<16x96xf32> to vector<8x8xf32>
    %cst_146 = arith.constant dense<0.000000e+00> : vector<8x8xf32>
    %512 = tpu.matmul %509, %510, %cst_146 {dimension_numbers = #tpu.dot_dimension_numbers<[1], [1], [0], [0], [0, 0, 1, 0], [], []>} : vector<8x8xf32>, vector<8x8xf32>, vector<8x8xf32> -> vector<8x8xf32>
    %cst_147 = arith.constant 0.353553385 : f32
    %513 = vector.broadcast %cst_147 : f32 to vector<8x8xf32>
    %514 = arith.mulf %512, %513 : vector<8x8xf32>
    %515 = vector.broadcast %110 : vector<1x8xf32> to vector<8x8xf32>
    %516 = arith.addf %514, %515 : vector<8x8xf32>
    %cst_148 = arith.constant dense<0xFF800000> : vector<8xf32>
    %517 = vector.multi_reduction <maximumf>, %516, %cst_148 [1] : vector<8x8xf32> to vector<8xf32>
    %518 = vector.shape_cast %517 : vector<8xf32> to vector<8x1xf32>
    %519 = vector.broadcast %518 : vector<8x1xf32> to vector<8x8xf32>
    %520 = arith.subf %516, %519 : vector<8x8xf32>
    %521 = math.exp %520 : vector<8x8xf32>
    %cst_149 = arith.constant dense<0.000000e+00> : vector<8xf32>
    %522 = vector.multi_reduction <add>, %521, %cst_149 [1] : vector<8x8xf32> to vector<8xf32>
    %523 = vector.shape_cast %522 : vector<8xf32> to vector<8x1xf32>
    %524 = tpu.reciprocal %523 {approx = true} : vector<8x1xf32> -> vector<8x1xf32>
    %525 = vector.broadcast %524 : vector<8x1xf32> to vector<8x8xf32>
    %526 = arith.mulf %521, %525 : vector<8x8xf32>
    %cst_150 = arith.constant dense<0.000000e+00> : vector<8x8xf32>
    %527 = tpu.matmul %526, %511, %cst_150 {dimension_numbers = #tpu.dot_dimension_numbers<[1], [0], [0], [1], [0, 0, 1, 1], [], []>} : vector<8x8xf32>, vector<8x8xf32>, vector<8x8xf32> -> vector<8x8xf32>
    %528 = vector.extract_strided_slice %412 {offsets = [8, 16], sizes = [8, 8], strides = [1, 1]} : vector<16x96xf32> to vector<8x8xf32>
    %529 = vector.extract_strided_slice %412 {offsets = [8, 48], sizes = [8, 8], strides = [1, 1]} : vector<16x96xf32> to vector<8x8xf32>
    %530 = vector.extract_strided_slice %412 {offsets = [8, 80], sizes = [8, 8], strides = [1, 1]} : vector<16x96xf32> to vector<8x8xf32>
    %cst_151 = arith.constant dense<0.000000e+00> : vector<8x8xf32>
    %531 = tpu.matmul %528, %529, %cst_151 {dimension_numbers = #tpu.dot_dimension_numbers<[1], [1], [0], [0], [0, 0, 1, 0], [], []>} : vector<8x8xf32>, vector<8x8xf32>, vector<8x8xf32> -> vector<8x8xf32>
    %cst_152 = arith.constant 0.353553385 : f32
    %532 = vector.broadcast %cst_152 : f32 to vector<8x8xf32>
    %533 = arith.mulf %531, %532 : vector<8x8xf32>
    %534 = vector.broadcast %110 : vector<1x8xf32> to vector<8x8xf32>
    %535 = arith.addf %533, %534 : vector<8x8xf32>
    %cst_153 = arith.constant dense<0xFF800000> : vector<8xf32>
    %536 = vector.multi_reduction <maximumf>, %535, %cst_153 [1] : vector<8x8xf32> to vector<8xf32>
    %537 = vector.shape_cast %536 : vector<8xf32> to vector<8x1xf32>
    %538 = vector.broadcast %537 : vector<8x1xf32> to vector<8x8xf32>
    %539 = arith.subf %535, %538 : vector<8x8xf32>
    %540 = math.exp %539 : vector<8x8xf32>
    %cst_154 = arith.constant dense<0.000000e+00> : vector<8xf32>
    %541 = vector.multi_reduction <add>, %540, %cst_154 [1] : vector<8x8xf32> to vector<8xf32>
    %542 = vector.shape_cast %541 : vector<8xf32> to vector<8x1xf32>
    %543 = tpu.reciprocal %542 {approx = true} : vector<8x1xf32> -> vector<8x1xf32>
    %544 = vector.broadcast %543 : vector<8x1xf32> to vector<8x8xf32>
    %545 = arith.mulf %540, %544 : vector<8x8xf32>
    %cst_155 = arith.constant dense<0.000000e+00> : vector<8x8xf32>
    %546 = tpu.matmul %545, %530, %cst_155 {dimension_numbers = #tpu.dot_dimension_numbers<[1], [0], [0], [1], [0, 0, 1, 1], [], []>} : vector<8x8xf32>, vector<8x8xf32>, vector<8x8xf32> -> vector<8x8xf32>
    %547 = vector.extract_strided_slice %412 {offsets = [8, 24], sizes = [8, 8], strides = [1, 1]} : vector<16x96xf32> to vector<8x8xf32>
    %548 = vector.extract_strided_slice %412 {offsets = [8, 56], sizes = [8, 8], strides = [1, 1]} : vector<16x96xf32> to vector<8x8xf32>
    %549 = vector.extract_strided_slice %412 {offsets = [8, 88], sizes = [8, 8], strides = [1, 1]} : vector<16x96xf32> to vector<8x8xf32>
    %cst_156 = arith.constant dense<0.000000e+00> : vector<8x8xf32>
    %550 = tpu.matmul %547, %548, %cst_156 {dimension_numbers = #tpu.dot_dimension_numbers<[1], [1], [0], [0], [0, 0, 1, 0], [], []>} : vector<8x8xf32>, vector<8x8xf32>, vector<8x8xf32> -> vector<8x8xf32>
    %cst_157 = arith.constant 0.353553385 : f32
    %551 = vector.broadcast %cst_157 : f32 to vector<8x8xf32>
    %552 = arith.mulf %550, %551 : vector<8x8xf32>
    %553 = vector.broadcast %110 : vector<1x8xf32> to vector<8x8xf32>
    %554 = arith.addf %552, %553 : vector<8x8xf32>
    %cst_158 = arith.constant dense<0xFF800000> : vector<8xf32>
    %555 = vector.multi_reduction <maximumf>, %554, %cst_158 [1] : vector<8x8xf32> to vector<8xf32>
    %556 = vector.shape_cast %555 : vector<8xf32> to vector<8x1xf32>
    %557 = vector.broadcast %556 : vector<8x1xf32> to vector<8x8xf32>
    %558 = arith.subf %554, %557 : vector<8x8xf32>
    %559 = math.exp %558 : vector<8x8xf32>
    %cst_159 = arith.constant dense<0.000000e+00> : vector<8xf32>
    %560 = vector.multi_reduction <add>, %559, %cst_159 [1] : vector<8x8xf32> to vector<8xf32>
    %561 = vector.shape_cast %560 : vector<8xf32> to vector<8x1xf32>
    %562 = tpu.reciprocal %561 {approx = true} : vector<8x1xf32> -> vector<8x1xf32>
    %563 = vector.broadcast %562 : vector<8x1xf32> to vector<8x8xf32>
    %564 = arith.mulf %559, %563 : vector<8x8xf32>
    %cst_160 = arith.constant dense<0.000000e+00> : vector<8x8xf32>
    %565 = tpu.matmul %564, %549, %cst_160 {dimension_numbers = #tpu.dot_dimension_numbers<[1], [0], [0], [1], [0, 0, 1, 1], [], []>} : vector<8x8xf32>, vector<8x8xf32>, vector<8x8xf32> -> vector<8x8xf32>
    %566 = tpu.concatenate %508, %527, %546, %565 in 1 : vector<8x8xf32>, vector<8x8xf32>, vector<8x8xf32>, vector<8x8xf32> -> vector<8x32xf32>
    %567 = tpu.concatenate %489, %566 in 0 : vector<8x32xf32>, vector<8x32xf32> -> vector<16x32xf32>
    %cst_161 = arith.constant dense<0.000000e+00> : vector<16x32xf32>
    %568 = tpu.matmul %567, %378, %cst_161 {dimension_numbers = #tpu.dot_dimension_numbers<[1], [0], [0], [1], [0, 0, 1, 1], [], []>} : vector<16x32xf32>, vector<32x32xf32>, vector<16x32xf32> -> vector<16x32xf32>
    %569 = vector.broadcast %379 : vector<1x32xf32> to vector<16x32xf32>
    %570 = arith.addf %568, %569 : vector<16x32xf32>
    %571 = arith.addf %373, %570 : vector<16x32xf32>
    %cst_162 = arith.constant dense<0.000000e+00> : vector<16xf32>
    %572 = vector.multi_reduction <add>, %571, %cst_162 [1] : vector<16x32xf32> to vector<16xf32>
    %573 = vector.shape_cast %572 : vector<16xf32> to vector<16x1xf32>
    %cst_163 = arith.constant 3.200000e+01 : f32
    %574 = vector.broadcast %cst_163 : f32 to vector<16x1xf32>
    %575 = arith.divf %573, %574 : vector<16x1xf32>
    %576 = vector.broadcast %575 : vector<16x1xf32> to vector<16x32xf32>
    %577 = arith.subf %571, %576 : vector<16x32xf32>
    %578 = vector.broadcast %575 : vector<16x1xf32> to vector<16x32xf32>
    %579 = arith.subf %571, %578 : vector<16x32xf32>
    %580 = arith.mulf %577, %579 : vector<16x32xf32>
    %cst_164 = arith.constant dense<0.000000e+00> : vector<16xf32>
    %581 = vector.multi_reduction <add>, %580, %cst_164 [1] : vector<16x32xf32> to vector<16xf32>
    %582 = vector.shape_cast %581 : vector<16xf32> to vector<16x1xf32>
    %cst_165 = arith.constant 3.200000e+01 : f32
    %583 = vector.broadcast %cst_165 : f32 to vector<16x1xf32>
    %584 = arith.divf %582, %583 : vector<16x1xf32>
    %585 = vector.broadcast %575 : vector<16x1xf32> to vector<16x32xf32>
    %586 = arith.subf %571, %585 : vector<16x32xf32>
    %cst_166 = arith.constant 9.99999974E-6 : f32
    %587 = vector.broadcast %cst_166 : f32 to vector<16x1xf32>
    %588 = arith.addf %584, %587 : vector<16x1xf32>
    %589 = math.rsqrt %588 : vector<16x1xf32>
    %590 = vector.broadcast %589 : vector<16x1xf32> to vector<16x32xf32>
    %591 = arith.mulf %586, %590 : vector<16x32xf32>
    %592 = vector.broadcast %380 : vector<1x32xf32> to vector<16x32xf32>
    %593 = arith.mulf %591, %592 : vector<16x32xf32>
    %594 = vector.broadcast %381 : vector<1x32xf32> to vector<16x32xf32>
    %595 = arith.addf %593, %594 : vector<16x32xf32>
    %cst_167 = arith.constant dense<0.000000e+00> : vector<16x128xf32>
    %596 = tpu.matmul %595, %382, %cst_167 {dimension_numbers = #tpu.dot_dimension_numbers<[1], [0], [0], [1], [0, 0, 1, 1], [], []>} : vector<16x32xf32>, vector<32x128xf32>, vector<16x128xf32> -> vector<16x128xf32>
    %597 = vector.broadcast %383 : vector<1x128xf32> to vector<16x128xf32>
    %598 = arith.addf %596, %597 : vector<16x128xf32>
    %cst_168 = arith.constant 5.000000e-01 : f32
    %599 = vector.broadcast %cst_168 : f32 to vector<16x128xf32>
    %600 = arith.mulf %599, %598 : vector<16x128xf32>
    %cst_169 = arith.constant 0.707106769 : f32
    %601 = vector.broadcast %cst_169 : f32 to vector<16x128xf32>
    %602 = arith.mulf %598, %601 : vector<16x128xf32>
    %603 = math.erf %602 : vector<16x128xf32>
    %cst_170 = arith.constant 1.000000e+00 : f32
    %604 = vector.broadcast %cst_170 : f32 to vector<16x128xf32>
    %605 = arith.addf %604, %603 : vector<16x128xf32>
    %606 = arith.mulf %600, %605 : vector<16x128xf32>
    %cst_171 = arith.constant dense<0.000000e+00> : vector<16x32xf32>
    %607 = tpu.matmul %606, %384, %cst_171 {dimension_numbers = #tpu.dot_dimension_numbers<[1], [0], [0], [1], [0, 0, 1, 1], [], []>} : vector<16x128xf32>, vector<128x32xf32>, vector<16x32xf32> -> vector<16x32xf32>
    %608 = vector.broadcast %385 : vector<1x32xf32> to vector<16x32xf32>
    %609 = arith.addf %607, %608 : vector<16x32xf32>
    %610 = arith.addf %571, %609 : vector<16x32xf32>
    %cst_172 = arith.constant dense<0.000000e+00> : vector<16xf32>
    %611 = vector.multi_reduction <add>, %610, %cst_172 [1] : vector<16x32xf32> to vector<16xf32>
    %612 = vector.shape_cast %611 : vector<16xf32> to vector<16x1xf32>
    %cst_173 = arith.constant 3.200000e+01 : f32
    %613 = vector.broadcast %cst_173 : f32 to vector<16x1xf32>
    %614 = arith.divf %612, %613 : vector<16x1xf32>
    %615 = vector.broadcast %614 : vector<16x1xf32> to vector<16x32xf32>
    %616 = arith.subf %610, %615 : vector<16x32xf32>
    %617 = vector.broadcast %614 : vector<16x1xf32> to vector<16x32xf32>
    %618 = arith.subf %610, %617 : vector<16x32xf32>
    %619 = arith.mulf %616, %618 : vector<16x32xf32>
    %cst_174 = arith.constant dense<0.000000e+00> : vector<16xf32>
    %620 = vector.multi_reduction <add>, %619, %cst_174 [1] : vector<16x32xf32> to vector<16xf32>
    %621 = vector.shape_cast %620 : vector<16xf32> to vector<16x1xf32>
    %cst_175 = arith.constant 3.200000e+01 : f32
    %622 = vector.broadcast %cst_175 : f32 to vector<16x1xf32>
    %623 = arith.divf %621, %622 : vector<16x1xf32>
    %624 = vector.broadcast %614 : vector<16x1xf32> to vector<16x32xf32>
    %625 = arith.subf %610, %624 : vector<16x32xf32>
    %cst_176 = arith.constant 9.99999974E-6 : f32
    %626 = vector.broadcast %cst_176 : f32 to vector<16x1xf32>
    %627 = arith.addf %623, %626 : vector<16x1xf32>
    %628 = math.rsqrt %627 : vector<16x1xf32>
    %629 = vector.broadcast %628 : vector<16x1xf32> to vector<16x32xf32>
    %630 = arith.mulf %625, %629 : vector<16x32xf32>
    %631 = vector.broadcast %111 : vector<1x32xf32> to vector<16x32xf32>
    %632 = arith.mulf %630, %631 : vector<16x32xf32>
    %633 = vector.broadcast %112 : vector<1x32xf32> to vector<16x32xf32>
    %634 = arith.addf %632, %633 : vector<16x32xf32>
    %c96 = arith.constant 96 : index
    %c0_177 = arith.constant 0 : index
    %635 = vector.load %arg4[%c96, %c0_177] : memref<960x128xf32, #tpu.memory_space<vmem>>, vector<32x16xf32>
    %cst_178 = arith.constant dense<0.000000e+00> : vector<16x16xf32>
    %636 = tpu.matmul %634, %635, %cst_178 {dimension_numbers = #tpu.dot_dimension_numbers<[1], [0], [0], [1], [0, 0, 1, 1], [], []>} : vector<16x32xf32>, vector<32x16xf32>, vector<16x16xf32> -> vector<16x16xf32>
    %c128 = arith.constant 128 : index
    %c0_179 = arith.constant 0 : index
    %637 = vector.load %arg4[%c128, %c0_179] : memref<960x128xf32, #tpu.memory_space<vmem>>, vector<1x16xf32>
    %638 = vector.broadcast %637 : vector<1x16xf32> to vector<16x16xf32>
    %639 = arith.addf %636, %638 : vector<16x16xf32>
    %c144 = arith.constant 144 : index
    %c0_180 = arith.constant 0 : index
    %640 = vector.load %arg4[%c144, %c0_180] : memref<960x128xf32, #tpu.memory_space<vmem>>, vector<17x16xf32>
    %c136 = arith.constant 136 : index
    %c0_181 = arith.constant 0 : index
    %641 = vector.load %arg4[%c136, %c0_181] : memref<960x128xf32, #tpu.memory_space<vmem>>, vector<1x16xf32>
    %642 = vector.extract_strided_slice %639 {offsets = [0, 0], sizes = [8, 16], strides = [1, 1]} : vector<16x16xf32> to vector<8x16xf32>
    %643 = vector.extract_strided_slice %642 {offsets = [0, 0], sizes = [1, 16], strides = [1, 1]} : vector<8x16xf32> to vector<1x16xf32>
    %644 = vector.extract_strided_slice %640 {offsets = [0, 0], sizes = [1, 16], strides = [1, 1]} : vector<17x16xf32> to vector<1x16xf32>
    %645 = arith.addf %643, %644 : vector<1x16xf32>
    %646 = vector.extract_strided_slice %642 {offsets = [1, 0], sizes = [4, 16], strides = [1, 1]} : vector<8x16xf32> to vector<4x16xf32>
    %cst_182 = arith.constant dense<0.000000e+00> : vector<16x16xf32>
    %647 = tpu.matmul %53, %646, %cst_182 {dimension_numbers = #tpu.dot_dimension_numbers<[0], [0], [1], [1], [0, 1, 1, 1], [], []>} : vector<4x16xf32>, vector<4x16xf32>, vector<16x16xf32> -> vector<16x16xf32>
    %cst_183 = arith.constant 1.000000e+00 : f32
    %648 = vector.broadcast %cst_183 : f32 to vector<16x1xf32>
    %649 = arith.subf %648, %52 : vector<16x1xf32>
    %650 = vector.broadcast %649 : vector<16x1xf32> to vector<16x16xf32>
    %651 = vector.broadcast %641 : vector<1x16xf32> to vector<16x16xf32>
    %652 = arith.mulf %650, %651 : vector<16x16xf32>
    %653 = arith.addf %647, %652 : vector<16x16xf32>
    %654 = vector.extract_strided_slice %640 {offsets = [1, 0], sizes = [16, 16], strides = [1, 1]} : vector<17x16xf32> to vector<16x16xf32>
    %655 = arith.addf %653, %654 : vector<16x16xf32>
    %cst_184 = arith.constant 0.000000e+00 : f32
    %656 = vector.broadcast %cst_184 : f32 to vector<7x16xf32>
    %657 = tpu.concatenate %645, %655, %656 in 0 : vector<1x16xf32>, vector<16x16xf32>, vector<7x16xf32> -> vector<24x16xf32>
    %cst_185 = arith.constant 1.000000e+00 : f32
    %658 = vector.broadcast %cst_185 : f32 to vector<16x1xf32>
    %659 = arith.subf %658, %52 : vector<16x1xf32>
    %660 = vector.extract_strided_slice %639 {offsets = [8, 0], sizes = [8, 16], strides = [1, 1]} : vector<16x16xf32> to vector<8x16xf32>
    %661 = vector.extract_strided_slice %660 {offsets = [0, 0], sizes = [1, 16], strides = [1, 1]} : vector<8x16xf32> to vector<1x16xf32>
    %662 = vector.extract_strided_slice %640 {offsets = [0, 0], sizes = [1, 16], strides = [1, 1]} : vector<17x16xf32> to vector<1x16xf32>
    %663 = arith.addf %661, %662 : vector<1x16xf32>
    %664 = vector.extract_strided_slice %660 {offsets = [1, 0], sizes = [4, 16], strides = [1, 1]} : vector<8x16xf32> to vector<4x16xf32>
    %cst_186 = arith.constant dense<0.000000e+00> : vector<16x16xf32>
    %665 = tpu.matmul %100, %664, %cst_186 {dimension_numbers = #tpu.dot_dimension_numbers<[0], [0], [1], [1], [0, 1, 1, 1], [], []>} : vector<4x16xf32>, vector<4x16xf32>, vector<16x16xf32> -> vector<16x16xf32>
    %cst_187 = arith.constant 1.000000e+00 : f32
    %666 = vector.broadcast %cst_187 : f32 to vector<16x1xf32>
    %667 = arith.subf %666, %99 : vector<16x1xf32>
    %668 = vector.broadcast %667 : vector<16x1xf32> to vector<16x16xf32>
    %669 = vector.broadcast %641 : vector<1x16xf32> to vector<16x16xf32>
    %670 = arith.mulf %668, %669 : vector<16x16xf32>
    %671 = arith.addf %665, %670 : vector<16x16xf32>
    %672 = vector.extract_strided_slice %640 {offsets = [1, 0], sizes = [16, 16], strides = [1, 1]} : vector<17x16xf32> to vector<16x16xf32>
    %673 = arith.addf %671, %672 : vector<16x16xf32>
    %cst_188 = arith.constant 0.000000e+00 : f32
    %674 = vector.broadcast %cst_188 : f32 to vector<7x16xf32>
    %675 = tpu.concatenate %663, %673, %674 in 0 : vector<1x16xf32>, vector<16x16xf32>, vector<7x16xf32> -> vector<24x16xf32>
    %cst_189 = arith.constant 1.000000e+00 : f32
    %676 = vector.broadcast %cst_189 : f32 to vector<16x1xf32>
    %677 = arith.subf %676, %99 : vector<16x1xf32>
    %678 = tpu.concatenate %657, %675 in 0 : vector<24x16xf32>, vector<24x16xf32> -> vector<48x16xf32>
    %679 = tpu.iota {dimensions = array<i32: 1>} : vector<1x24xi32>
    %c17_i32 = arith.constant 17 : i32
    %680 = vector.broadcast %c17_i32 : i32 to vector<1x24xi32>
    %681 = arith.cmpi slt, %679, %680 : vector<1x24xi32>
    %cst_190 = arith.constant 0.000000e+00 : f32
    %cst_191 = arith.constant -1.000000e+30 : f32
    %682 = vector.broadcast %cst_190 : f32 to vector<1x24xf32>
    %683 = vector.broadcast %cst_191 : f32 to vector<1x24xf32>
    %684 = arith.select %681, %682, %683 : vector<1x24xi1>, vector<1x24xf32>
    %c784 = arith.constant 784 : index
    %c0_192 = arith.constant 0 : index
    %685 = vector.load %arg4[%c784, %c0_192] : memref<960x128xf32, #tpu.memory_space<vmem>>, vector<1x16xf32>
    %c792 = arith.constant 792 : index
    %c0_193 = arith.constant 0 : index
    %686 = vector.load %arg4[%c792, %c0_193] : memref<960x128xf32, #tpu.memory_space<vmem>>, vector<1x16xf32>
    %c800 = arith.constant 800 : index
    %c0_194 = arith.constant 0 : index
    %687 = vector.load %arg4[%c800, %c0_194] : memref<960x128xf32, #tpu.memory_space<vmem>>, vector<16x48xf32>
    %c816 = arith.constant 816 : index
    %c0_195 = arith.constant 0 : index
    %688 = vector.load %arg4[%c816, %c0_195] : memref<960x128xf32, #tpu.memory_space<vmem>>, vector<1x48xf32>
    %c824 = arith.constant 824 : index
    %c0_196 = arith.constant 0 : index
    %689 = vector.load %arg4[%c824, %c0_196] : memref<960x128xf32, #tpu.memory_space<vmem>>, vector<16x16xf32>
    %c840 = arith.constant 840 : index
    %c0_197 = arith.constant 0 : index
    %690 = vector.load %arg4[%c840, %c0_197] : memref<960x128xf32, #tpu.memory_space<vmem>>, vector<1x16xf32>
    %c848 = arith.constant 848 : index
    %c0_198 = arith.constant 0 : index
    %691 = vector.load %arg4[%c848, %c0_198] : memref<960x128xf32, #tpu.memory_space<vmem>>, vector<1x16xf32>
    %c856 = arith.constant 856 : index
    %c0_199 = arith.constant 0 : index
    %692 = vector.load %arg4[%c856, %c0_199] : memref<960x128xf32, #tpu.memory_space<vmem>>, vector<1x16xf32>
    %c864 = arith.constant 864 : index
    %c0_200 = arith.constant 0 : index
    %693 = vector.load %arg4[%c864, %c0_200] : memref<960x128xf32, #tpu.memory_space<vmem>>, vector<16x64xf32>
    %c880 = arith.constant 880 : index
    %c0_201 = arith.constant 0 : index
    %694 = vector.load %arg4[%c880, %c0_201] : memref<960x128xf32, #tpu.memory_space<vmem>>, vector<1x64xf32>
    %c888 = arith.constant 888 : index
    %c0_202 = arith.constant 0 : index
    %695 = vector.load %arg4[%c888, %c0_202] : memref<960x128xf32, #tpu.memory_space<vmem>>, vector<64x16xf32>
    %c952 = arith.constant 952 : index
    %c0_203 = arith.constant 0 : index
    %696 = vector.load %arg4[%c952, %c0_203] : memref<960x128xf32, #tpu.memory_space<vmem>>, vector<1x16xf32>
    %cst_204 = arith.constant dense<0.000000e+00> : vector<48xf32>
    %697 = vector.multi_reduction <add>, %678, %cst_204 [1] : vector<48x16xf32> to vector<48xf32>
    %698 = vector.shape_cast %697 : vector<48xf32> to vector<48x1xf32>
    %cst_205 = arith.constant 1.600000e+01 : f32
    %699 = vector.broadcast %cst_205 : f32 to vector<48x1xf32>
    %700 = arith.divf %698, %699 : vector<48x1xf32>
    %701 = vector.broadcast %700 : vector<48x1xf32> to vector<48x16xf32>
    %702 = arith.subf %678, %701 : vector<48x16xf32>
    %703 = vector.broadcast %700 : vector<48x1xf32> to vector<48x16xf32>
    %704 = arith.subf %678, %703 : vector<48x16xf32>
    %705 = arith.mulf %702, %704 : vector<48x16xf32>
    %cst_206 = arith.constant dense<0.000000e+00> : vector<48xf32>
    %706 = vector.multi_reduction <add>, %705, %cst_206 [1] : vector<48x16xf32> to vector<48xf32>
    %707 = vector.shape_cast %706 : vector<48xf32> to vector<48x1xf32>
    %cst_207 = arith.constant 1.600000e+01 : f32
    %708 = vector.broadcast %cst_207 : f32 to vector<48x1xf32>
    %709 = arith.divf %707, %708 : vector<48x1xf32>
    %710 = vector.broadcast %700 : vector<48x1xf32> to vector<48x16xf32>
    %711 = arith.subf %678, %710 : vector<48x16xf32>
    %cst_208 = arith.constant 9.99999974E-6 : f32
    %712 = vector.broadcast %cst_208 : f32 to vector<48x1xf32>
    %713 = arith.addf %709, %712 : vector<48x1xf32>
    %714 = math.rsqrt %713 : vector<48x1xf32>
    %715 = vector.broadcast %714 : vector<48x1xf32> to vector<48x16xf32>
    %716 = arith.mulf %711, %715 : vector<48x16xf32>
    %717 = vector.broadcast %685 : vector<1x16xf32> to vector<48x16xf32>
    %718 = arith.mulf %716, %717 : vector<48x16xf32>
    %719 = vector.broadcast %686 : vector<1x16xf32> to vector<48x16xf32>
    %720 = arith.addf %718, %719 : vector<48x16xf32>
    %cst_209 = arith.constant dense<0.000000e+00> : vector<48x48xf32>
    %721 = tpu.matmul %720, %687, %cst_209 {dimension_numbers = #tpu.dot_dimension_numbers<[1], [0], [0], [1], [0, 0, 1, 1], [], []>} : vector<48x16xf32>, vector<16x48xf32>, vector<48x48xf32> -> vector<48x48xf32>
    %722 = vector.broadcast %688 : vector<1x48xf32> to vector<48x48xf32>
    %723 = arith.addf %721, %722 : vector<48x48xf32>
    %724 = vector.extract_strided_slice %723 {offsets = [0, 0], sizes = [24, 8], strides = [1, 1]} : vector<48x48xf32> to vector<24x8xf32>
    %725 = vector.extract_strided_slice %723 {offsets = [0, 16], sizes = [24, 8], strides = [1, 1]} : vector<48x48xf32> to vector<24x8xf32>
    %726 = vector.extract_strided_slice %723 {offsets = [0, 32], sizes = [24, 8], strides = [1, 1]} : vector<48x48xf32> to vector<24x8xf32>
    %cst_210 = arith.constant dense<0.000000e+00> : vector<24x24xf32>
    %727 = tpu.matmul %724, %725, %cst_210 {dimension_numbers = #tpu.dot_dimension_numbers<[1], [1], [0], [0], [0, 0, 1, 0], [], []>} : vector<24x8xf32>, vector<24x8xf32>, vector<24x24xf32> -> vector<24x24xf32>
    %cst_211 = arith.constant 0.353553385 : f32
    %728 = vector.broadcast %cst_211 : f32 to vector<24x24xf32>
    %729 = arith.mulf %727, %728 : vector<24x24xf32>
    %730 = vector.broadcast %684 : vector<1x24xf32> to vector<24x24xf32>
    %731 = arith.addf %729, %730 : vector<24x24xf32>
    %cst_212 = arith.constant dense<0xFF800000> : vector<24xf32>
    %732 = vector.multi_reduction <maximumf>, %731, %cst_212 [1] : vector<24x24xf32> to vector<24xf32>
    %733 = vector.shape_cast %732 : vector<24xf32> to vector<24x1xf32>
    %734 = vector.broadcast %733 : vector<24x1xf32> to vector<24x24xf32>
    %735 = arith.subf %731, %734 : vector<24x24xf32>
    %736 = math.exp %735 : vector<24x24xf32>
    %cst_213 = arith.constant dense<0.000000e+00> : vector<24xf32>
    %737 = vector.multi_reduction <add>, %736, %cst_213 [1] : vector<24x24xf32> to vector<24xf32>
    %738 = vector.shape_cast %737 : vector<24xf32> to vector<24x1xf32>
    %739 = tpu.reciprocal %738 {approx = true} : vector<24x1xf32> -> vector<24x1xf32>
    %740 = vector.broadcast %739 : vector<24x1xf32> to vector<24x24xf32>
    %741 = arith.mulf %736, %740 : vector<24x24xf32>
    %cst_214 = arith.constant dense<0.000000e+00> : vector<24x8xf32>
    %742 = tpu.matmul %741, %726, %cst_214 {dimension_numbers = #tpu.dot_dimension_numbers<[1], [0], [0], [1], [0, 0, 1, 1], [], []>} : vector<24x24xf32>, vector<24x8xf32>, vector<24x8xf32> -> vector<24x8xf32>
    %743 = vector.extract_strided_slice %723 {offsets = [0, 8], sizes = [24, 8], strides = [1, 1]} : vector<48x48xf32> to vector<24x8xf32>
    %744 = vector.extract_strided_slice %723 {offsets = [0, 24], sizes = [24, 8], strides = [1, 1]} : vector<48x48xf32> to vector<24x8xf32>
    %745 = vector.extract_strided_slice %723 {offsets = [0, 40], sizes = [24, 8], strides = [1, 1]} : vector<48x48xf32> to vector<24x8xf32>
    %cst_215 = arith.constant dense<0.000000e+00> : vector<24x24xf32>
    %746 = tpu.matmul %743, %744, %cst_215 {dimension_numbers = #tpu.dot_dimension_numbers<[1], [1], [0], [0], [0, 0, 1, 0], [], []>} : vector<24x8xf32>, vector<24x8xf32>, vector<24x24xf32> -> vector<24x24xf32>
    %cst_216 = arith.constant 0.353553385 : f32
    %747 = vector.broadcast %cst_216 : f32 to vector<24x24xf32>
    %748 = arith.mulf %746, %747 : vector<24x24xf32>
    %749 = vector.broadcast %684 : vector<1x24xf32> to vector<24x24xf32>
    %750 = arith.addf %748, %749 : vector<24x24xf32>
    %cst_217 = arith.constant dense<0xFF800000> : vector<24xf32>
    %751 = vector.multi_reduction <maximumf>, %750, %cst_217 [1] : vector<24x24xf32> to vector<24xf32>
    %752 = vector.shape_cast %751 : vector<24xf32> to vector<24x1xf32>
    %753 = vector.broadcast %752 : vector<24x1xf32> to vector<24x24xf32>
    %754 = arith.subf %750, %753 : vector<24x24xf32>
    %755 = math.exp %754 : vector<24x24xf32>
    %cst_218 = arith.constant dense<0.000000e+00> : vector<24xf32>
    %756 = vector.multi_reduction <add>, %755, %cst_218 [1] : vector<24x24xf32> to vector<24xf32>
    %757 = vector.shape_cast %756 : vector<24xf32> to vector<24x1xf32>
    %758 = tpu.reciprocal %757 {approx = true} : vector<24x1xf32> -> vector<24x1xf32>
    %759 = vector.broadcast %758 : vector<24x1xf32> to vector<24x24xf32>
    %760 = arith.mulf %755, %759 : vector<24x24xf32>
    %cst_219 = arith.constant dense<0.000000e+00> : vector<24x8xf32>
    %761 = tpu.matmul %760, %745, %cst_219 {dimension_numbers = #tpu.dot_dimension_numbers<[1], [0], [0], [1], [0, 0, 1, 1], [], []>} : vector<24x24xf32>, vector<24x8xf32>, vector<24x8xf32> -> vector<24x8xf32>
    %762 = tpu.concatenate %742, %761 in 1 : vector<24x8xf32>, vector<24x8xf32> -> vector<24x16xf32>
    %763 = vector.extract_strided_slice %723 {offsets = [24, 0], sizes = [24, 8], strides = [1, 1]} : vector<48x48xf32> to vector<24x8xf32>
    %764 = vector.extract_strided_slice %723 {offsets = [24, 16], sizes = [24, 8], strides = [1, 1]} : vector<48x48xf32> to vector<24x8xf32>
    %765 = vector.extract_strided_slice %723 {offsets = [24, 32], sizes = [24, 8], strides = [1, 1]} : vector<48x48xf32> to vector<24x8xf32>
    %cst_220 = arith.constant dense<0.000000e+00> : vector<24x24xf32>
    %766 = tpu.matmul %763, %764, %cst_220 {dimension_numbers = #tpu.dot_dimension_numbers<[1], [1], [0], [0], [0, 0, 1, 0], [], []>} : vector<24x8xf32>, vector<24x8xf32>, vector<24x24xf32> -> vector<24x24xf32>
    %cst_221 = arith.constant 0.353553385 : f32
    %767 = vector.broadcast %cst_221 : f32 to vector<24x24xf32>
    %768 = arith.mulf %766, %767 : vector<24x24xf32>
    %769 = vector.broadcast %684 : vector<1x24xf32> to vector<24x24xf32>
    %770 = arith.addf %768, %769 : vector<24x24xf32>
    %cst_222 = arith.constant dense<0xFF800000> : vector<24xf32>
    %771 = vector.multi_reduction <maximumf>, %770, %cst_222 [1] : vector<24x24xf32> to vector<24xf32>
    %772 = vector.shape_cast %771 : vector<24xf32> to vector<24x1xf32>
    %773 = vector.broadcast %772 : vector<24x1xf32> to vector<24x24xf32>
    %774 = arith.subf %770, %773 : vector<24x24xf32>
    %775 = math.exp %774 : vector<24x24xf32>
    %cst_223 = arith.constant dense<0.000000e+00> : vector<24xf32>
    %776 = vector.multi_reduction <add>, %775, %cst_223 [1] : vector<24x24xf32> to vector<24xf32>
    %777 = vector.shape_cast %776 : vector<24xf32> to vector<24x1xf32>
    %778 = tpu.reciprocal %777 {approx = true} : vector<24x1xf32> -> vector<24x1xf32>
    %779 = vector.broadcast %778 : vector<24x1xf32> to vector<24x24xf32>
    %780 = arith.mulf %775, %779 : vector<24x24xf32>
    %cst_224 = arith.constant dense<0.000000e+00> : vector<24x8xf32>
    %781 = tpu.matmul %780, %765, %cst_224 {dimension_numbers = #tpu.dot_dimension_numbers<[1], [0], [0], [1], [0, 0, 1, 1], [], []>} : vector<24x24xf32>, vector<24x8xf32>, vector<24x8xf32> -> vector<24x8xf32>
    %782 = vector.extract_strided_slice %723 {offsets = [24, 8], sizes = [24, 8], strides = [1, 1]} : vector<48x48xf32> to vector<24x8xf32>
    %783 = vector.extract_strided_slice %723 {offsets = [24, 24], sizes = [24, 8], strides = [1, 1]} : vector<48x48xf32> to vector<24x8xf32>
    %784 = vector.extract_strided_slice %723 {offsets = [24, 40], sizes = [24, 8], strides = [1, 1]} : vector<48x48xf32> to vector<24x8xf32>
    %cst_225 = arith.constant dense<0.000000e+00> : vector<24x24xf32>
    %785 = tpu.matmul %782, %783, %cst_225 {dimension_numbers = #tpu.dot_dimension_numbers<[1], [1], [0], [0], [0, 0, 1, 0], [], []>} : vector<24x8xf32>, vector<24x8xf32>, vector<24x24xf32> -> vector<24x24xf32>
    %cst_226 = arith.constant 0.353553385 : f32
    %786 = vector.broadcast %cst_226 : f32 to vector<24x24xf32>
    %787 = arith.mulf %785, %786 : vector<24x24xf32>
    %788 = vector.broadcast %684 : vector<1x24xf32> to vector<24x24xf32>
    %789 = arith.addf %787, %788 : vector<24x24xf32>
    %cst_227 = arith.constant dense<0xFF800000> : vector<24xf32>
    %790 = vector.multi_reduction <maximumf>, %789, %cst_227 [1] : vector<24x24xf32> to vector<24xf32>
    %791 = vector.shape_cast %790 : vector<24xf32> to vector<24x1xf32>
    %792 = vector.broadcast %791 : vector<24x1xf32> to vector<24x24xf32>
    %793 = arith.subf %789, %792 : vector<24x24xf32>
    %794 = math.exp %793 : vector<24x24xf32>
    %cst_228 = arith.constant dense<0.000000e+00> : vector<24xf32>
    %795 = vector.multi_reduction <add>, %794, %cst_228 [1] : vector<24x24xf32> to vector<24xf32>
    %796 = vector.shape_cast %795 : vector<24xf32> to vector<24x1xf32>
    %797 = tpu.reciprocal %796 {approx = true} : vector<24x1xf32> -> vector<24x1xf32>
    %798 = vector.broadcast %797 : vector<24x1xf32> to vector<24x24xf32>
    %799 = arith.mulf %794, %798 : vector<24x24xf32>
    %cst_229 = arith.constant dense<0.000000e+00> : vector<24x8xf32>
    %800 = tpu.matmul %799, %784, %cst_229 {dimension_numbers = #tpu.dot_dimension_numbers<[1], [0], [0], [1], [0, 0, 1, 1], [], []>} : vector<24x24xf32>, vector<24x8xf32>, vector<24x8xf32> -> vector<24x8xf32>
    %801 = tpu.concatenate %781, %800 in 1 : vector<24x8xf32>, vector<24x8xf32> -> vector<24x16xf32>
    %802 = tpu.concatenate %762, %801 in 0 : vector<24x16xf32>, vector<24x16xf32> -> vector<48x16xf32>
    %cst_230 = arith.constant dense<0.000000e+00> : vector<48x16xf32>
    %803 = tpu.matmul %802, %689, %cst_230 {dimension_numbers = #tpu.dot_dimension_numbers<[1], [0], [0], [1], [0, 0, 1, 1], [], []>} : vector<48x16xf32>, vector<16x16xf32>, vector<48x16xf32> -> vector<48x16xf32>
    %804 = vector.broadcast %690 : vector<1x16xf32> to vector<48x16xf32>
    %805 = arith.addf %803, %804 : vector<48x16xf32>
    %806 = arith.addf %678, %805 : vector<48x16xf32>
    %cst_231 = arith.constant dense<0.000000e+00> : vector<48xf32>
    %807 = vector.multi_reduction <add>, %806, %cst_231 [1] : vector<48x16xf32> to vector<48xf32>
    %808 = vector.shape_cast %807 : vector<48xf32> to vector<48x1xf32>
    %cst_232 = arith.constant 1.600000e+01 : f32
    %809 = vector.broadcast %cst_232 : f32 to vector<48x1xf32>
    %810 = arith.divf %808, %809 : vector<48x1xf32>
    %811 = vector.broadcast %810 : vector<48x1xf32> to vector<48x16xf32>
    %812 = arith.subf %806, %811 : vector<48x16xf32>
    %813 = vector.broadcast %810 : vector<48x1xf32> to vector<48x16xf32>
    %814 = arith.subf %806, %813 : vector<48x16xf32>
    %815 = arith.mulf %812, %814 : vector<48x16xf32>
    %cst_233 = arith.constant dense<0.000000e+00> : vector<48xf32>
    %816 = vector.multi_reduction <add>, %815, %cst_233 [1] : vector<48x16xf32> to vector<48xf32>
    %817 = vector.shape_cast %816 : vector<48xf32> to vector<48x1xf32>
    %cst_234 = arith.constant 1.600000e+01 : f32
    %818 = vector.broadcast %cst_234 : f32 to vector<48x1xf32>
    %819 = arith.divf %817, %818 : vector<48x1xf32>
    %820 = vector.broadcast %810 : vector<48x1xf32> to vector<48x16xf32>
    %821 = arith.subf %806, %820 : vector<48x16xf32>
    %cst_235 = arith.constant 9.99999974E-6 : f32
    %822 = vector.broadcast %cst_235 : f32 to vector<48x1xf32>
    %823 = arith.addf %819, %822 : vector<48x1xf32>
    %824 = math.rsqrt %823 : vector<48x1xf32>
    %825 = vector.broadcast %824 : vector<48x1xf32> to vector<48x16xf32>
    %826 = arith.mulf %821, %825 : vector<48x16xf32>
    %827 = vector.broadcast %691 : vector<1x16xf32> to vector<48x16xf32>
    %828 = arith.mulf %826, %827 : vector<48x16xf32>
    %829 = vector.broadcast %692 : vector<1x16xf32> to vector<48x16xf32>
    %830 = arith.addf %828, %829 : vector<48x16xf32>
    %cst_236 = arith.constant dense<0.000000e+00> : vector<48x64xf32>
    %831 = tpu.matmul %830, %693, %cst_236 {dimension_numbers = #tpu.dot_dimension_numbers<[1], [0], [0], [1], [0, 0, 1, 1], [], []>} : vector<48x16xf32>, vector<16x64xf32>, vector<48x64xf32> -> vector<48x64xf32>
    %832 = vector.broadcast %694 : vector<1x64xf32> to vector<48x64xf32>
    %833 = arith.addf %831, %832 : vector<48x64xf32>
    %cst_237 = arith.constant 5.000000e-01 : f32
    %834 = vector.broadcast %cst_237 : f32 to vector<48x64xf32>
    %835 = arith.mulf %834, %833 : vector<48x64xf32>
    %cst_238 = arith.constant 0.707106769 : f32
    %836 = vector.broadcast %cst_238 : f32 to vector<48x64xf32>
    %837 = arith.mulf %833, %836 : vector<48x64xf32>
    %838 = math.erf %837 : vector<48x64xf32>
    %cst_239 = arith.constant 1.000000e+00 : f32
    %839 = vector.broadcast %cst_239 : f32 to vector<48x64xf32>
    %840 = arith.addf %839, %838 : vector<48x64xf32>
    %841 = arith.mulf %835, %840 : vector<48x64xf32>
    %cst_240 = arith.constant dense<0.000000e+00> : vector<48x16xf32>
    %842 = tpu.matmul %841, %695, %cst_240 {dimension_numbers = #tpu.dot_dimension_numbers<[1], [0], [0], [1], [0, 0, 1, 1], [], []>} : vector<48x64xf32>, vector<64x16xf32>, vector<48x16xf32> -> vector<48x16xf32>
    %843 = vector.broadcast %696 : vector<1x16xf32> to vector<48x16xf32>
    %844 = arith.addf %842, %843 : vector<48x16xf32>
    %845 = arith.addf %806, %844 : vector<48x16xf32>
    %c168 = arith.constant 168 : index
    %c0_241 = arith.constant 0 : index
    %846 = vector.load %arg4[%c168, %c0_241] : memref<960x128xf32, #tpu.memory_space<vmem>>, vector<1x16xf32>
    %c176 = arith.constant 176 : index
    %c0_242 = arith.constant 0 : index
    %847 = vector.load %arg4[%c176, %c0_242] : memref<960x128xf32, #tpu.memory_space<vmem>>, vector<1x16xf32>
    %cst_243 = arith.constant dense<0.000000e+00> : vector<48xf32>
    %848 = vector.multi_reduction <add>, %845, %cst_243 [1] : vector<48x16xf32> to vector<48xf32>
    %849 = vector.shape_cast %848 : vector<48xf32> to vector<48x1xf32>
    %cst_244 = arith.constant 1.600000e+01 : f32
    %850 = vector.broadcast %cst_244 : f32 to vector<48x1xf32>
    %851 = arith.divf %849, %850 : vector<48x1xf32>
    %852 = vector.broadcast %851 : vector<48x1xf32> to vector<48x16xf32>
    %853 = arith.subf %845, %852 : vector<48x16xf32>
    %854 = vector.broadcast %851 : vector<48x1xf32> to vector<48x16xf32>
    %855 = arith.subf %845, %854 : vector<48x16xf32>
    %856 = arith.mulf %853, %855 : vector<48x16xf32>
    %cst_245 = arith.constant dense<0.000000e+00> : vector<48xf32>
    %857 = vector.multi_reduction <add>, %856, %cst_245 [1] : vector<48x16xf32> to vector<48xf32>
    %858 = vector.shape_cast %857 : vector<48xf32> to vector<48x1xf32>
    %cst_246 = arith.constant 1.600000e+01 : f32
    %859 = vector.broadcast %cst_246 : f32 to vector<48x1xf32>
    %860 = arith.divf %858, %859 : vector<48x1xf32>
    %861 = vector.broadcast %851 : vector<48x1xf32> to vector<48x16xf32>
    %862 = arith.subf %845, %861 : vector<48x16xf32>
    %cst_247 = arith.constant 9.99999974E-6 : f32
    %863 = vector.broadcast %cst_247 : f32 to vector<48x1xf32>
    %864 = arith.addf %860, %863 : vector<48x1xf32>
    %865 = math.rsqrt %864 : vector<48x1xf32>
    %866 = vector.broadcast %865 : vector<48x1xf32> to vector<48x16xf32>
    %867 = arith.mulf %862, %866 : vector<48x16xf32>
    %868 = vector.broadcast %846 : vector<1x16xf32> to vector<48x16xf32>
    %869 = arith.mulf %867, %868 : vector<48x16xf32>
    %870 = vector.broadcast %847 : vector<1x16xf32> to vector<48x16xf32>
    %871 = arith.addf %869, %870 : vector<48x16xf32>
    %c184 = arith.constant 184 : index
    %c0_248 = arith.constant 0 : index
    %872 = vector.load %arg4[%c184, %c0_248] : memref<960x128xf32, #tpu.memory_space<vmem>>, vector<16x48xf32>
    %cst_249 = arith.constant dense<0.000000e+00> : vector<48x48xf32>
    %873 = tpu.matmul %871, %872, %cst_249 {dimension_numbers = #tpu.dot_dimension_numbers<[1], [0], [0], [1], [0, 0, 1, 1], [], []>} : vector<48x16xf32>, vector<16x48xf32>, vector<48x48xf32> -> vector<48x48xf32>
    %c200 = arith.constant 200 : index
    %c0_250 = arith.constant 0 : index
    %874 = vector.load %arg4[%c200, %c0_250] : memref<960x128xf32, #tpu.memory_space<vmem>>, vector<1x48xf32>
    %875 = vector.broadcast %874 : vector<1x48xf32> to vector<48x48xf32>
    %876 = arith.addf %873, %875 : vector<48x48xf32>
    %cst_251 = arith.constant 0.000000e+00 : f32
    %877 = vector.broadcast %cst_251 : f32 to vector<1x1xf32>
    %cst_252 = arith.constant 0.000000e+00 : f32
    %878 = vector.broadcast %cst_252 : f32 to vector<1x1xf32>
    %879 = vector.extract_strided_slice %876 {offsets = [1, 0], sizes = [16, 48], strides = [1, 1]} : vector<48x48xf32> to vector<16x48xf32>
    %c0_253 = arith.constant 0 : index
    %c0_254 = arith.constant 0 : index
    %880 = vector.load %arg3[%c0_253, %c0_254] : memref<32x48xf32, #tpu.memory_space<vmem>>, vector<16x48xf32>
    %881 = arith.subf %879, %880 : vector<16x48xf32>
    %882 = arith.mulf %881, %881 : vector<16x48xf32>
    %cst_255 = arith.constant dense<0.000000e+00> : vector<16xf32>
    %883 = vector.multi_reduction <add>, %882, %cst_255 [1] : vector<16x48xf32> to vector<16xf32>
    %884 = vector.shape_cast %883 : vector<16xf32> to vector<16x1xf32>
    %cst_256 = arith.constant 4.800000e+01 : f32
    %885 = vector.broadcast %cst_256 : f32 to vector<16x1xf32>
    %886 = arith.divf %884, %885 : vector<16x1xf32>
    %887 = arith.mulf %886, %659 : vector<16x1xf32>
    %cst_257 = arith.constant dense<0.000000e+00> : vector<1xf32>
    %888 = vector.multi_reduction <add>, %887, %cst_257 [0] : vector<16x1xf32> to vector<1xf32>
    %889 = vector.shape_cast %888 : vector<1xf32> to vector<1x1xf32>
    %890 = arith.addf %877, %889 : vector<1x1xf32>
    %cst_258 = arith.constant dense<0.000000e+00> : vector<1xf32>
    %891 = vector.multi_reduction <add>, %659, %cst_258 [0] : vector<16x1xf32> to vector<1xf32>
    %892 = vector.shape_cast %891 : vector<1xf32> to vector<1x1xf32>
    %893 = arith.addf %878, %892 : vector<1x1xf32>
    %894 = vector.extract_strided_slice %876 {offsets = [25, 0], sizes = [16, 48], strides = [1, 1]} : vector<48x48xf32> to vector<16x48xf32>
    %c16 = arith.constant 16 : index
    %c0_259 = arith.constant 0 : index
    %895 = vector.load %arg3[%c16, %c0_259] : memref<32x48xf32, #tpu.memory_space<vmem>>, vector<16x48xf32>
    %896 = arith.subf %894, %895 : vector<16x48xf32>
    %897 = arith.mulf %896, %896 : vector<16x48xf32>
    %cst_260 = arith.constant dense<0.000000e+00> : vector<16xf32>
    %898 = vector.multi_reduction <add>, %897, %cst_260 [1] : vector<16x48xf32> to vector<16xf32>
    %899 = vector.shape_cast %898 : vector<16xf32> to vector<16x1xf32>
    %cst_261 = arith.constant 4.800000e+01 : f32
    %900 = vector.broadcast %cst_261 : f32 to vector<16x1xf32>
    %901 = arith.divf %899, %900 : vector<16x1xf32>
    %902 = arith.mulf %901, %677 : vector<16x1xf32>
    %cst_262 = arith.constant dense<0.000000e+00> : vector<1xf32>
    %903 = vector.multi_reduction <add>, %902, %cst_262 [0] : vector<16x1xf32> to vector<1xf32>
    %904 = vector.shape_cast %903 : vector<1xf32> to vector<1x1xf32>
    %905 = arith.addf %890, %904 : vector<1x1xf32>
    %cst_263 = arith.constant dense<0.000000e+00> : vector<1xf32>
    %906 = vector.multi_reduction <add>, %677, %cst_263 [0] : vector<16x1xf32> to vector<1xf32>
    %907 = vector.shape_cast %906 : vector<1xf32> to vector<1x1xf32>
    %908 = arith.addf %893, %907 : vector<1x1xf32>
    %909 = tpu.concatenate %879, %894 in 0 : vector<16x48xf32>, vector<16x48xf32> -> vector<32x48xf32>
    %c0_264 = arith.constant 0 : index
    %c0_265 = arith.constant 0 : index
    %910 = vector.load %arg5[%c0_264, %c0_265] : memref<32x48xf32, #tpu.memory_space<vmem>>, vector<32x48xf32>
    tpu.vector_store %arg5[%c0_264, %c0_265], %909 {strides = array<i32>} : memref<32x48xf32, #tpu.memory_space<vmem>>, vector<32x48xf32>,
    %911 = arith.divf %905, %908 : vector<1x1xf32>
    %c0_266 = arith.constant 0 : index
    %c0_267 = arith.constant 0 : index
    %912 = vector.load %arg6[%c0_266, %c0_267] : memref<1x1xf32, #tpu.memory_space<vmem>>, vector<1x1xf32>
    tpu.vector_store %arg6[%c0_266, %c0_267], %911 {strides = array<i32>} : memref<1x1xf32, #tpu.memory_space<vmem>>, vector<1x1xf32>,
    return
  }
  func.func @transform_0(%arg0: i32, %arg1: memref<2x4xi32, #tpu.memory_space<smem>>) -> (i32, i32) {
    %c0_i32 = arith.constant 0 : i32
    %c0_i32_0 = arith.constant 0 : i32
    %c0_i32_1 = arith.constant 0 : i32
    return %c0_i32, %c0_i32_0 : i32, i32
  }
  func.func @transform_1(%arg0: i32, %arg1: memref<2x4xi32, #tpu.memory_space<smem>>) -> (i32, i32) {
    %c0_i32 = arith.constant 0 : i32
    %c0_i32_0 = arith.constant 0 : i32
    %c0_i32_1 = arith.constant 0 : i32
    return %c0_i32, %c0_i32_0 : i32, i32
  }
  func.func @transform_2(%arg0: i32, %arg1: memref<2x4xi32, #tpu.memory_space<smem>>) -> (i32, i32) {
    %c0_i32 = arith.constant 0 : i32
    %c0_i32_0 = arith.constant 0 : i32
    %c0_i32_1 = arith.constant 0 : i32
    return %c0_i32, %c0_i32_0 : i32, i32
  }
  func.func @transform_3(%arg0: i32, %arg1: memref<2x4xi32, #tpu.memory_space<smem>>) -> (i32, i32) {
    %c0_i32 = arith.constant 0 : i32
    %c0_i32_0 = arith.constant 0 : i32
    %c0_i32_1 = arith.constant 0 : i32
    return %c0_i32, %c0_i32_0 : i32, i32
  }
  func.func @transform_4(%arg0: i32, %arg1: memref<2x4xi32, #tpu.memory_space<smem>>) -> (i32, i32) {
    %c0_i32 = arith.constant 0 : i32
    %c0_i32_0 = arith.constant 0 : i32
    %c0_i32_1 = arith.constant 0 : i32
    return %c0_i32, %c0_i32_0 : i32, i32
  }
}

</mosaic_0001>

<bundles_post_ra>
// kernel: _lambda_.1
= control target key start
LH: loop header
LB: loop body
LE: loop exit
PB: predicated region body
PF: predicated region fallthrough
CT: control target
= control target key end

     0   :  { %s9746_s0 = inlined_call_operand.vmem [shape: s32[2,4], index: 0, kind: input, shape index: {}]   ;;  %s9747_s1 = inlined_call_operand.vmem [shape: f32[32,48], index: 1, kind: input, shape index: {}]   ;;  %s9748_s2 = inlined_call_operand.vmem [shape: f32[32,48], index: 2, kind: input, shape index: {}]   ;;  %s9749_s3 = inlined_call_operand.vmem [shape: f32[960,128], index: 3, kind: input, shape index: {}]   ;;  %s9750_s4 = inlined_call_operand.hbm [shape: f32[32,48], index: 4, kind: output, shape index: {0}]   ;;  %s9751_s5 = inlined_call_operand.hbm [shape: f32[1,1], index: 5, kind: output, shape index: {1}]  }
   0x1   :  { %s11_s20 = sshll.u32 %s9746_s0, 4  ;;  %s12_s20 = int_to_ptr.vmem [resolvable:$true] %s11_s20 }
   0x2   :  { %s8121_s21 = scalar_lea.vmem %s12_s20, 32  ;;  %p8126_p1 = scmp.lt.s32.totalorder %s12_s20, %s12_s20 }
   0x3   :  { %p8122_p0 = scmp.ne.s32.totalorder %s12_s20, %s8121_s21  ;;  %p8127_p2 = scmp.lt.s32.totalorder %s8121_s21, %s8121_s21 }
   0x5   :  { %p8128_p3 = por %p8127_p2, %p8126_p1 }
   0x7   :  { %p8129_p4 = pnand %p8128_p3, %p8122_p0 }
   0x9   :  { %8132 = shalt.err (!%p8129_p4)  }
   0xa   :  { %s8183_s22 = smov [#allocation3]  }
   0xb   :  { %14 = dma.vmem_to_smem %s12_s20, 32, %s8183_s22, [#allocation2] }
   0xc   :  { %8177 = dma.done.wait [#allocation2], 32 }
   0xd   :  { %8178 = vsyncadd [#allocation2], 4294967264 }
   0xe   :  { %16 = sfence }
   0xf   :  { %17 = vsyncpa [#allocation5], 0  ;;  %v29_v0 = vld [vmem:[%s9749_s3] sm:$0xff]  ;;  %v30_v1 = vld [vmem:[%s9749_s3 + $0x8] sm:$0xff]  ;;  %vm40_vm0 = vcmask 392192  }
  0x10   :  { %v31_v2 = vld [vmem:[%s9749_s3 + $0x10] sm:$0xff]  ;;  %v7667_v3 = vpack.c.bf16 %v30_v1, %v29_v0  ;;  %v32_v4 = vld [vmem:[%s9749_s3 + $0x18] sm:$0xff]  ;;  %v33_v6 = vld [vmem:[%s9749_s3 + $0x20] sm:$0xff] }
  0x11   :  { %v7671_v5 = vpack.c.bf16 %v32_v4, %v31_v2  ;;  %v34_v7 = vld [vmem:[%s9749_s3 + $0x28] sm:$0xff]  ;;  %v25_v8 = vld [vmem:[%s9747_s1] sm:$0xff] }
  0x12   :  { %7668 = vmatprep.subr.bf16.mxu0 %v7667_v3  ;;  %7133 = vmatprep.mubr.msk.f32.mxu0 %vm40_vm0, %v25_v8 }
  0x13   :  { %18 = vsyncpa [#allocation7], 0  ;;  %7670 = vmatpush3.bf16.msra.mxu0 %v7667_v3  ;;  %v7675_v9 = vpack.c.bf16 %v34_v7, %v33_v6  ;;  %v26_v10 = vld [vmem:[%s9747_s1 + $0x8] sm:$0xff]  ;;  %v27_v11 = vld [vmem:[%s9747_s1 + $0x10] sm:$0xff]  ;;  %v8184_v13 = vmov 0.0|0.0   ;;  %v8185_v14 = vmov 0.0   ;;  %v141_v15 = vlaneseq }
  0x14   :  { %7672 = vmatprep.subr.bf16.mxu0 %v7671_v5  ;;  %v28_v12 = vld [vmem:[%s9747_s1 + $0x18] sm:$0xff]  ;;  %7679 = vmatprep.subr.bf16.mxu1 %v8184_v13  ;;  %vm8186_vm1 = vmmov 0   ;;  %s148_s17 = sld [smem:[#allocation3]]  ;;  %s6668_s18 = sld [smem:[#allocation3 + $0x1]]  ;;  %v6660_v22 = vld [vmem:[%s9749_s3 + $0x30] ss:$0 sm:$0xff] }
  0x15   :  { %7143 = vmatprep.mubr.msk.f32.mxu1 %vm8186_vm1, %v8185_v14  ;;  %s6672_s19 = sld [smem:[#allocation3 + $0x2]]  ;;  %s6681_s1 = sld [smem:[#allocation3 + $0x80]]  ;;  %v8279_v16 = vand.u32 127, %v141_v15  ;;  %vm200_vm5 = vcmask 1040384   ;;  %v139_v28 = vld [vmem:[%s9749_s3 + $0x40] sm:$0xff]  ;;  %v138_v31 = vld [vmem:[%s9749_s3 + $0x38] sm:$0xff] }
  0x16   :  { %s6685_s20 = sld [smem:[#allocation3 + $0x81]]  ;;  %s6676_s21 = sld [smem:[#allocation3 + $0x3]]  ;;  %vm202_vm9 = vcmask 1041408   ;;  %vm204_vm11 = vcmask 1042432   ;;  %vm206_vm13 = vcmask 130048   ;;  %vm284_vm14 = vcmask 1044480  }
  0x17   :  { %7674 = vmatpush3.bf16.msra.mxu0 %v7671_v5  ;;  %s6689_s22 = sld [smem:[#allocation3 + $0x82]]  ;;  %s6693_s23 = sld [smem:[#allocation3 + $0x83]]  ;;  %v140_v57 = vld [vmem:[%s9749_s3 + $0x48] sm:$0x1]  ;;  %vm461_vm15 = vcmask 261120  }
  0x18   :  { %7676 = vmatprep.subr.bf16.mxu0 %v7675_v9  ;;  %s8192_s24 = smov 104   ;;  %s8193_s25 = smov 72  }
  0x19   :  { %s8195_s0 = smov 64   ;;  %s8196_s26 = smov 48  }
  0x1a   :  { %v8281_v17 = vstv %s148_s17  ;;  %v8283_v18 = vstv %s6668_s18  ;;  %s8197_s27 = smov 40   ;;  %s8198_s28 = smov 56  }
  0x1b   :  { %7678 = vmatpush3.bf16.msra.mxu0 %v7675_v9  ;;  %vm150_vm2 = vcmp.eq.s32.totalorder %v8279_v16, %v8281_v17  ;;  %vm163_vm3 = vcmp.eq.s32.totalorder %v8279_v16, %v8283_v18  ;;  %v8289_v19 = vstv %s6672_s19  ;;  %v8291_v20 = vstv %s6681_s1  ;;  %s8187_s1 = smov 88   ;;  %s8199_s29 = smov 8  }
  0x1c   :  { %7164 = vmatprep.subr.mxu0 %v8185_v14  ;;  %v8293_v21 = vstv %s6685_s20  ;;  %v6665_v23 = vsel %vm150_vm2, 1.0, %v8185_v14  ;;  %v8299_v24 = vstv %s6676_s21  ;;  %v6669_v25 = vsel %vm163_vm3, 1.0, %v8185_v14  ;;  %s8188_s20 = smov 96   ;;  %s8189_s21 = smov 120  }
  0x1d   :  { %vm176_vm4 = vcmp.eq.s32.totalorder %v8279_v16, %v8289_v19  ;;  %v8304_v26 = vstv %s6689_s22  ;;  %vm290_vm6 = vcmp.eq.s32.totalorder %v8279_v16, %v8291_v20  ;;  %vm303_vm7 = vcmp.eq.s32.totalorder %v8279_v16, %v8293_v21  ;;  %s8190_s22 = smov 112   ;;  %s8200_s9 = smov 16  }
  0x1e   :  { %7134 = vmatmul.mubr.msk.f32.vlgmr.msra.gmra.mrb[0].mxu0 %vm40_vm0, %v26_v10  ;;  %vm189_vm8 = vcmp.eq.s32.totalorder %v8279_v16, %v8299_v24  ;;  %v6673_v33 = vsel %vm176_vm4, 1.0, %v8185_v14  ;;  %v201_v34 = vsel %vm200_vm5, %v6665_v23, %v6669_v25  ;;  %vm316_vm10 = vcmp.eq.s32.totalorder %v8279_v16, %v8304_v26  ;;  %v427_v25 = vld [vmem:[%s9749_s3 + $0xe0] sm:$0xff]  ;;  %s8201_s14 = smov 24  }
  0x1f   :  { %7136 = vmatprep.mubr.msk.f32.mxu0 %vm40_vm0, %v27_v11  ;;  %v6682_v36 = vsel %vm290_vm6, 1.0, %v8185_v14  ;;  %v6686_v37 = vsel %vm303_vm7, 1.0, %v8185_v14  ;;  %v8324_v38 = vstv %s6693_s23  ;;  %v6677_v41 = vsel %vm189_vm8, 1.0, %v8185_v14  ;;  %s8191_s23 = smov 80  }
  0x20   :  { %v203_v44 = vsel %vm202_vm9, %v201_v34, %v6673_v33  ;;  %v6690_v45 = vsel %vm316_vm10, 1.0, %v8185_v14  ;;  %vm329_vm12 = vcmp.eq.s32.totalorder %v8279_v16, %v8324_v38  ;;  %v340_v48 = vsel %vm200_vm5, %v6682_v36, %v6686_v37 }
  0x21   :  { %v8333_v51 = vsel %vm204_vm11, %v203_v44, %v6677_v41  ;;  %v6694_v52 = vsel %vm329_vm12, 1.0, %v8185_v14  ;;  %v341_v53 = vsel %vm202_vm9, %v340_v48, %v6690_v45  ;;  %vm589_vm2 = vcmask 64512  }
  0x22   :  { %7137 = vmatmul.mubr.msk.f32.gmra.mrb[2].mxu0 %vm40_vm0, %v28_v12  ;;  %v8343_v55 = vsel %vm204_vm11, %v341_v53, %v6694_v52  ;;  %vm421_vm3 = vcmp.lt.s32.totalorder %v8279_v16, 5  ;;  %vm1268_vm4 = vcmask 195584   ;;  %vm4282_vm6 = vcmask 31744  }
  0x23   :  { %7166 = vmatprep.mubr.msk.f32.mxu0 %vm8186_vm1, %v8185_v14  ;;  %vm4289_vm7 = vcmask 1043456  }
  0xf1   :  { %v7135_v27 = vpop.f32.mrb[0].mxu0 }
  0xf2   :  { %v125_v29 = vadd.f32 %v7135_v27, %v6660_v22  ;;  %v119_v30 = vpop.f32.mrb[1].mxu0  ;;  %v428_v27 = vld [vmem:[%s9749_s3 + $0xe8] sm:$0xff] }
  0xf3   :  { %v120_v32 = vadd.f32 %v6660_v22, %v119_v30  ;;  %v430_v30 = vld [vmem:[%s9749_s3 + $0xf8] sm:$0xff] }
  0xf4   :  { %v147_v35 = vadd.f32 %v139_v28, %v125_v29  ;;  %v7685_v29 = vpack.c.bf16 %v428_v27, %v427_v25 }
  0xf5   :  { %v146_v39 = vadd.f32 %v138_v31, %v120_v32  ;;  %v7138_v40 = vpop.f32.mrb[2].mxu0 }
  0xf6   :  { %v135_v42 = vadd.f32 %v7138_v40, %v6660_v22  ;;  %v129_v43 = vpop.f32.mrb[3].mxu0  ;;  %v6698_v40 = vld [vmem:[%s9749_s3 + $0xd0] ss:$0 sm:$0xff] }
  0xf7   :  { %v130_v46 = vadd.f32 %v6660_v22, %v129_v43  ;;  %v7680_v47 = vpack.c.bf16 %v147_v35, %v146_v39 }
  0xf8   :  { %v287_v49 = vadd.f32 %v139_v28, %v135_v42  ;;  %v429_v28 = vld [vmem:[%s9749_s3 + $0xf0] sm:$0xff]  ;;  %v6699_v42 = vld [vmem:[%s9749_s3 + $0xd8] ss:$0 sm:$0xff] }
  0xf9   :  { %v286_v50 = vadd.f32 %v138_v31, %v130_v46  ;;  %7681 = vmatpush3.bf16.msra.mxu1 %v7680_v47  ;;  %v7689_v31 = vpack.c.bf16 %v430_v30, %v429_v28 }
  0xfa   :  { %7682 = vmatprep.subr.bf16.mxu1 %v8184_v13 }
  0xfb   :  { %v7683_v54 = vpack.c.bf16 %v287_v49, %v286_v50  ;;  %v6700_v49 = vld [vmem:[%s9749_s3 + $0x100] ss:$0 sm:$0xff] }
  0xfc   :  { %7144 = vmatmul.mubr.msk.f32.vlgmr.msra.gmra.mrb[0].mxu1 %vm206_vm13, %v8333_v51 }
  0xfd   :  { %7684 = vmatpush3.bf16.msra.mxu1 %v7683_v54  ;;  %7150 = vmatprep.mubr.msk.f32.mxu1 %vm8186_vm1, %v8185_v14 }
  0xfe   :  { %7686 = vmatprep.subr.bf16.mxu1 %v7685_v29 }
 0x100   :  { %7151 = vmatmul.mubr.msk.f32.vlgmr.msra.gmra.mrb[2].mxu1 %vm206_vm13, %v8343_v55 }
 0x101   :  { %7688 = vmatpush3.bf16.msra.mxu1 %v7685_v29 }
 0x102   :  { %7690 = vmatprep.subr.bf16.mxu1 %v7689_v31 }
 0x105   :  { %7692 = vmatpush3.bf16.msra.mxu1 %v7689_v31 }
 0x106   :  { %7169 = vmatprep.subr.mxu1 %v8185_v14 }
 0x1cf   :  { %v276_v56 = vpop.f32.mrb[0].mxu1 }
 0x1d0   :  { %v281_v58 = vrot.slane %v276_v56, 7  ;;  %v7145_v59 = vpop.f32.mrb[1].mxu1 }
 0x1d2   :  { %v283_v60 = vsel %vm200_vm5, %v140_v57, %v281_v58 }
 0x1d3   :  { %v412_v61 = vpop.f32.mrb[2].mxu1  ;;  %v8351_v62 = vsel %vm284_vm14, %v283_v60, 0.0 }
 0x1d4   :  { %v417_v63 = vrot.slane %v412_v61, 7  ;;  %v7152_v0 = vpop.f32.mrb[3].mxu1  ;;  %v462_v1 = vsel %vm461_vm15, %v8351_v62, 0.0 }
 0x1d5   :  { %463 = vadd.xlane.f32.xlu0 %v462_v1 }
 0x1d6   :  { %v419_v2 = vsel %vm200_vm5, %v140_v57, %v417_v63 }
 0x1d7   :  { %v8356_v3 = vsel %vm284_vm14, %v419_v2, 0.0 }
 0x1d8   :  { %v465_v4 = vsel %vm461_vm15, %v8356_v3, 0.0 }
 0x1d9   :  { %466 = vadd.xlane.f32.xlu0 %v465_v4 }
 0x262   :  { %v464_v5 = vpop.xlane.xlu0 %463 }
 0x263   :  { %v469_v6 = vmul.f32 0.03125, %v464_v5 }
 0x265   :  { %v471_v7 = vsub.f32 %v8351_v62, %v469_v6 }
 0x266   :  { %v467_v8 = vpop.xlane.xlu0 %466 }
 0x267   :  { %v470_v9 = vmul.f32 0.03125, %v467_v8  ;;  %v473_v10 = vmul.f32 %v471_v7, %v471_v7 }
 0x269   :  { %v472_v11 = vsub.f32 %v8356_v3, %v470_v9  ;;  %v475_v12 = vsel %vm461_vm15, %v473_v10, 0.0  ;;  %v8194_v9 = vmov -1e+30  }
 0x26a   :  { %476 = vadd.xlane.f32.xlu1 %v475_v12  ;;  %v8463_v10 = vsel %vm421_vm3, 0.0, %v8194_v9 }
 0x26b   :  { %v474_v22 = vmul.f32 %v472_v11, %v472_v11 }
 0x26d   :  { %v478_v23 = vsel %vm461_vm15, %v474_v22, 0.0 }
 0x26e   :  { %479 = vadd.xlane.f32.xlu1 %v478_v23 }
 0x2f7   :  { %v477_v32 = vpop.xlane.xlu1 %476 }
 0x2f8   :  { %v481_v33 = vmul.f32 0.03125, %v477_v32 }
 0x2fa   :  { %v483_v34 = vadd.f32 1e-05, %v481_v33 }
 0x2fb   :  { %v480_v35 = vpop.xlane.xlu1 %479 }
 0x2fc   :  { %7927 = vrsqrt.f32 %v483_v34  ;;  %v482_v36 = vmul.f32 0.03125, %v480_v35 }
 0x2fe   :  { %v484_v37 = vadd.f32 1e-05, %v482_v36 }
 0x300   :  { %7929 = vrsqrt.f32 %v484_v37 }
 0x306   :  { %v7928_v39 = vpop.eup %7927 }
 0x307   :  { %v487_v41 = vmul.f32 %v7928_v39, %v471_v7 }
 0x309   :  { %v493_v43 = vmul.f32 %v6698_v40, %v487_v41 }
 0x30a   :  { %v7930_v44 = vpop.eup %7929 }
 0x30b   :  { %v488_v45 = vmul.f32 %v7930_v44, %v472_v11  ;;  %v499_v46 = vadd.f32 %v6699_v42, %v493_v43 }
 0x30d   :  { %v494_v47 = vmul.f32 %v6698_v40, %v488_v45  ;;  %7161 = vmatprep.mubr.msk.f32.mxu1 %vm461_vm15, %v499_v46 }
 0x30f   :  { %v500_v48 = vadd.f32 %v6699_v42, %v494_v47 }
 0x311   :  { %7162 = vmatmul.mubr.msk.f32.vlgmr.msra.gmra.mrb[4].mxu1 %vm461_vm15, %v500_v48 }
 0x312   :  { %7171 = vmatprep.mubr.msk.f32.mxu1 %vm8186_vm1, %v8185_v14 }
 0x3e4   :  { %v7163_v50 = vpop.f32.mrb[4].mxu1 }
 0x3e5   :  { %v577_v52 = vpop.f32.mrb[5].mxu1  ;;  %v8404_v54 = vadd.f32 %v7163_v50, %v6700_v49 }
 0x3e6   :  { %v8390_v53 = vadd.f32 %v6700_v49, %v577_v52 }
 0x3e8   :  { %755 = vrot.lane.b32.xlu1 %v8390_v53, %s8187_s1  ;;  %587 = vrot.lane.b32.xlu0 %v8390_v53, %s8188_s20 }
 0x3ec   :  { %753 = vrot.lane.b32.xlu1 %v8390_v53, %s8189_s21  ;;  %920 = vrot.lane.b32.xlu0 %v8390_v53, %s8190_s22 }
 0x3f0   :  { %922 = vrot.lane.b32.xlu1 %v8390_v53, %s8191_s23  ;;  %1087 = vrot.lane.b32.xlu0 %v8390_v53, %s8192_s24 }
 0x3f4   :  { %1089 = vrot.lane.b32.xlu1 %v8390_v53, %s8193_s25  ;;  %1438 = vrot.lane.b32.xlu0 %v8404_v54, %s8187_s1 }
 0x3f8   :  { %1271 = vrot.lane.b32.xlu1 %v8404_v54, %s8188_s20  ;;  %1605 = vrot.lane.b32.xlu0 %v8404_v54, %s8191_s23 }
 0x3fc   :  { %1436 = vrot.lane.b32.xlu1 %v8404_v54, %s8189_s21  ;;  %1772 = vrot.lane.b32.xlu0 %v8404_v54, %s8193_s25 }
 0x400   :  { %1603 = vrot.lane.b32.xlu1 %v8404_v54, %s8190_s22 }
 0x404   :  { %1770 = vrot.lane.b32.xlu1 %v8404_v54, %s8192_s24 }
 0x45a   :  { %v756_v56 = vpop.permute.xlu1 %755  ;;  %v588_v57 = vpop.permute.xlu0 %587 }
 0x45b   :  { %7165 = vmatpush3.xpose.msk.msra.mxu0 %vm589_vm2, %v588_v57 }
 0x45c   :  { %7174 = vmatprep.subr.mxu0 %v8185_v14 }
 0x45e   :  { %v754_v58 = vpop.permute.xlu1 %753  ;;  %7167 = vmatmul.mubr.msk.f32.vlgmr.msra.gmra.mrb[4].mxu0 %vm589_vm2, %v8390_v53  ;;  %v921_v59 = vpop.permute.xlu0 %920 }
 0x45f   :  { %7175 = vmatpush3.xpose.msk.msra.mxu0 %vm589_vm2, %v756_v56  ;;  %7176 = vmatprep.mubr.msk.f32.mxu0 %vm8186_vm1, %v8185_v14 }
 0x460   :  { %7184 = vmatprep.subr.mxu0 %v8185_v14 }
 0x462   :  { %v923_v60 = vpop.permute.xlu1 %922  ;;  %7177 = vmatmul.mubr.msk.f32.vlgmr.msra.gmra.mrb[6].mxu0 %vm589_vm2, %v754_v58  ;;  %v1088_v61 = vpop.permute.xlu0 %1087 }
 0x463   :  { %7185 = vmatpush3.xpose.msk.msra.mxu0 %vm589_vm2, %v923_v60  ;;  %7186 = vmatprep.mubr.msk.f32.mxu0 %vm8186_vm1, %v8185_v14 }
 0x464   :  { %7194 = vmatprep.subr.mxu0 %v8185_v14 }
 0x466   :  { %v1090_v63 = vpop.permute.xlu1 %1089  ;;  %7187 = vmatmul.mubr.msk.f32.vlgmr.msra.gmra.mrb[8].mxu0 %vm589_vm2, %v921_v59  ;;  %v1439_v0 = vpop.permute.xlu0 %1438 }
 0x467   :  { %7195 = vmatpush3.xpose.msk.msra.mxu0 %vm589_vm2, %v1090_v63  ;;  %7196 = vmatprep.mubr.msk.f32.mxu0 %vm8186_vm1, %v8185_v14 }
 0x468   :  { %7204 = vmatprep.subr.mxu0 %v8185_v14 }
 0x46a   :  { %v1272_v1 = vpop.permute.xlu1 %1271  ;;  %7197 = vmatmul.mubr.msk.f32.vlgmr.msra.gmra.mrb[10].mxu0 %vm589_vm2, %v1088_v61  ;;  %v1606_v4 = vpop.permute.xlu0 %1605 }
 0x46b   :  { %7205 = vmatpush3.xpose.msk.msra.mxu0 %vm589_vm2, %v1272_v1  ;;  %7206 = vmatprep.mubr.msk.f32.mxu0 %vm8186_vm1, %v8185_v14 }
 0x46c   :  { %7214 = vmatprep.subr.mxu0 %v8185_v14 }
 0x46e   :  { %v1437_v2 = vpop.permute.xlu1 %1436  ;;  %7207 = vmatmul.mubr.msk.f32.vlgmr.msra.gmra.mrb[12].mxu0 %vm589_vm2, %v8404_v54  ;;  %v1773_v6 = vpop.permute.xlu0 %1772 }
 0x46f   :  { %7215 = vmatpush3.xpose.msk.msra.mxu0 %vm589_vm2, %v1439_v0  ;;  %7216 = vmatprep.mubr.msk.f32.mxu0 %vm8186_vm1, %v8185_v14 }
 0x470   :  { %7224 = vmatprep.subr.mxu0 %v8185_v14 }
 0x472   :  { %7217 = vmatmul.mubr.msk.f32.vlgmr.msra.gmra.mrb[14].mxu0 %vm589_vm2, %v1437_v2  ;;  %v1604_v5 = vpop.permute.xlu1 %1603 }
 0x473   :  { %7225 = vmatpush3.xpose.msk.msra.mxu0 %vm589_vm2, %v1606_v4  ;;  %7226 = vmatprep.mubr.msk.f32.mxu0 %vm8186_vm1, %v8185_v14 }
 0x474   :  { %7234 = vmatprep.subr.mxu0 %v8185_v14 }
 0x476   :  { %7227 = vmatmul.mubr.msk.f32.vlgmr.msra.gmra.mrb[16].mxu0 %vm589_vm2, %v1604_v5  ;;  %v1771_v7 = vpop.permute.xlu1 %1770 }
 0x477   :  { %7235 = vmatpush3.xpose.msk.msra.mxu0 %vm589_vm2, %v1773_v6  ;;  %7236 = vmatprep.mubr.msk.f32.mxu0 %vm8186_vm1, %v8185_v14 }
 0x47a   :  { %7237 = vmatmul.mubr.msk.f32.vlgmr.msra.gmra.mrb[18].mxu0 %vm589_vm2, %v1771_v7 }
 0x531   :  { %v660_v8 = vpop.f32.mrb[4].mxu0 }
 0x532   :  { %v664_v11 = vmul.f32 0.35355338, %v660_v8  ;;  %v7168_v12 = vpop.f32.mrb[5].mxu0 }
 0x534   :  { %v665_v22 = vadd.f32 %v664_v11, %v8463_v10 }
 0x535   :  { %v827_v23 = vpop.f32.mrb[6].mxu0 }
 0x536   :  { %v831_v25 = vmul.f32 0.35355338, %v827_v23  ;;  %v7178_v27 = vpop.f32.mrb[7].mxu0  ;;  %v666_v28 = vsel %vm589_vm2, %v665_v22, -inf }
 0x537   :  { %667 = vmax.xlane.f32.xlu0 %v666_v28 }
 0x538   :  { %v832_v29 = vadd.f32 %v831_v25, %v8463_v10 }
 0x539   :  { %v994_v30 = vpop.f32.mrb[8].mxu0 }
 0x53a   :  { %v998_v31 = vmul.f32 0.35355338, %v994_v30  ;;  %v7188_v32 = vpop.f32.mrb[9].mxu0  ;;  %v833_v33 = vsel %vm589_vm2, %v832_v29, -inf }
 0x53b   :  { %834 = vmax.xlane.f32.xlu1 %v833_v33 }
 0x53c   :  { %v8470_v34 = vadd.f32 %v998_v31, %v8463_v10 }
 0x53d   :  { %v1161_v35 = vpop.f32.mrb[10].mxu0 }
 0x53e   :  { %v1165_v36 = vmul.f32 0.35355338, %v1161_v35  ;;  %v7198_v37 = vpop.f32.mrb[11].mxu0  ;;  %v1000_v39 = vsel %vm589_vm2, %v8470_v34, -inf }
 0x53f   :  { %1001 = vmax.xlane.f32.xlu0 %v1000_v39 }
 0x540   :  { %v1166_v40 = vadd.f32 %v1165_v36, %v8463_v10 }
 0x541   :  { %v1343_v41 = vpop.f32.mrb[12].mxu0 }
 0x542   :  { %v1347_v42 = vmul.f32 0.35355338, %v1343_v41  ;;  %v7208_v43 = vpop.f32.mrb[13].mxu0  ;;  %v1167_v44 = vsel %vm589_vm2, %v1166_v40, -inf }
 0x543   :  { %1168 = vmax.xlane.f32.xlu0 %v1167_v44 }
 0x544   :  { %v8477_v45 = vadd.f32 %v1347_v42, %v8463_v10 }
 0x545   :  { %v1510_v46 = vpop.f32.mrb[14].mxu0 }
 0x546   :  { %v1514_v47 = vmul.f32 0.35355338, %v1510_v46  ;;  %v7218_v48 = vpop.f32.mrb[15].mxu0  ;;  %v1349_v49 = vsel %vm589_vm2, %v8477_v45, -inf }
 0x547   :  { %1350 = vmax.xlane.f32.xlu0 %v1349_v49 }
 0x548   :  { %v1515_v50 = vadd.f32 %v1514_v47, %v8463_v10 }
 0x549   :  { %v1677_v52 = vpop.f32.mrb[16].mxu0 }
 0x54a   :  { %v1681_v56 = vmul.f32 0.35355338, %v1677_v52  ;;  %v7228_v57 = vpop.f32.mrb[17].mxu0  ;;  %v1516_v58 = vsel %vm589_vm2, %v1515_v50, -inf }
 0x54b   :  { %1517 = vmax.xlane.f32.xlu1 %v1516_v58 }
 0x54c   :  { %v1682_v59 = vadd.f32 %v1681_v56, %v8463_v10 }
 0x54d   :  { %v1844_v60 = vpop.f32.mrb[18].mxu0 }
 0x54e   :  { %v7238_v61 = vpop.f32.mrb[19].mxu0  ;;  %v1683_v63 = vsel %vm589_vm2, %v1682_v59, -inf  ;;  %v1848_v0 = vmul.f32 0.35355338, %v1844_v60 }
 0x54f   :  { %1684 = vmax.xlane.f32.xlu0 %v1683_v63 }
 0x550   :  { %v1849_v1 = vadd.f32 %v1848_v0, %v8463_v10 }
 0x552   :  { %v1850_v2 = vsel %vm589_vm2, %v1849_v1, -inf }
 0x55c   :  { %677 = vrot.lane.b32.xlu1 %v8390_v53, %s8195_s0 }
 0x580   :  { %1851 = vmax.xlane.f32.xlu1 %v1850_v2 }
 0x591   :  { %1011 = vrot.lane.b32.xlu1 %v8390_v53, %s8196_s26 }
 0x595   :  { %1178 = vrot.lane.b32.xlu1 %v8390_v53, %s8197_s27 }
 0x599   :  { %1360 = vrot.lane.b32.xlu1 %v8404_v54, %s8195_s0 }
 0x5c4   :  { %v668_v4 = vpop.xlane.xlu0 %667 }
 0x5c5   :  { %v669_v5 = vsub.f32 %v665_v22, %v668_v4 }
 0x5c7   :  { %v670_v6 = vmul.f32 1.442695, %v669_v5 }
 0x5c8   :  { %v835_v7 = vpop.xlane.xlu1 %834 }
 0x5c9   :  { %7931 = vpow2.f32 %v670_v6  ;;  %v836_v8 = vsub.f32 %v832_v29, %v835_v7 }
 0x5cb   :  { %v837_v11 = vmul.f32 1.442695, %v836_v8 }
 0x5cc   :  { %v1002_v12 = vpop.xlane.xlu0 %1001 }
 0x5cd   :  { %7933 = vpow2.f32 %v837_v11  ;;  %v1003_v36 = vsub.f32 %v8470_v34, %v1002_v12 }
 0x5cf   :  { %v1004_v39 = vmul.f32 1.442695, %v1003_v36 }
 0x5d0   :  { %v1169_v23 = vpop.xlane.xlu0 %1168 }
 0x5d1   :  { %v1170_v25 = vsub.f32 %v1166_v40, %v1169_v23 }
 0x5d3   :  { %v7932_v27 = vpop.eup %7931  ;;  %v1171_v28 = vmul.f32 1.442695, %v1170_v25 }
 0x5d4   :  { %v672_v30 = vsel %vm589_vm2, %v7932_v27, 0.0  ;;  %v1351_v37 = vpop.xlane.xlu0 %1350 }
 0x5d5   :  { %7935 = vpow2.f32 %v1171_v28  ;;  %673 = vadd.xlane.f32.xlu0 %v672_v30  ;;  %v1352_v40 = vsub.f32 %v8477_v45, %v1351_v37 }
 0x5d6   :  { %7937 = vpow2.f32 %v1004_v39 }
 0x5d7   :  { %v8496_v31 = vpop.eup %7933  ;;  %v1353_v42 = vmul.f32 1.442695, %v1352_v40 }
 0x5d8   :  { %v1518_v32 = vpop.xlane.xlu1 %1517  ;;  %v839_v22 = vsel %vm589_vm2, %v8496_v31, 0.0 }
 0x5d9   :  { %840 = vadd.xlane.f32.xlu1 %v839_v22  ;;  %7939 = vpow2.f32 %v1353_v42  ;;  %v1519_v44 = vsub.f32 %v1515_v50, %v1518_v32 }
 0x5db   :  { %v1520_v47 = vmul.f32 1.442695, %v1519_v44 }
 0x5dc   :  { %v678_v33 = vpop.permute.xlu1 %677  ;;  %v1685_v41 = vpop.xlane.xlu0 %1684 }
 0x5dd   :  { %7170 = vmatpush3.msra.mxu1 %v678_v33  ;;  %v1686_v43 = vsub.f32 %v1682_v59, %v1685_v41 }
 0x5de   :  { %7179 = vmatprep.subr.mxu1 %v8185_v14 }
 0x5df   :  { %v8501_v29 = vpop.eup %7935  ;;  %v1687_v46 = vmul.f32 1.442695, %v1686_v43 }
 0x5e0   :  { %v1173_v35 = vsel %vm589_vm2, %v8501_v29, 0.0  ;;  %v7938_v48 = vpop.eup %7937 }
 0x5e1   :  { %1174 = vadd.xlane.f32.xlu1 %v1173_v35  ;;  %7941 = vpow2.f32 %v1687_v46 }
 0x5e2   :  { %7943 = vpow2.f32 %v1520_v47 }
 0x5e3   :  { %v8512_v49 = vpop.eup %7939 }
 0x5e4   :  { %v1355_v45 = vsel %vm589_vm2, %v8512_v49, 0.0 }
 0x5eb   :  { %844 = vrot.lane.b32.xlu0 %v8390_v53, %s8198_s28  ;;  %v1006_v53 = vsel %vm589_vm2, %v7938_v48, 0.0  ;;  %v8516_v52 = vpop.eup %7941 }
 0x5ec   :  { %v1689_v50 = vsel %vm589_vm2, %v8516_v52, 0.0  ;;  %v8520_v58 = vpop.eup %7943 }
 0x5ed   :  { %v1522_v59 = vsel %vm589_vm2, %v8520_v58, 0.0 }
 0x5f2   :  { %1527 = vrot.lane.b32.xlu1 %v8404_v54, %s8198_s28 }
 0x60a   :  { %1007 = vadd.xlane.f32.xlu0 %v1006_v53 }
 0x60d   :  { %v1852_v34 = vpop.xlane.xlu1 %1851 }
 0x60e   :  { %v1853_v56 = vsub.f32 %v1849_v1, %v1852_v34  ;;  %1356 = vadd.xlane.f32.xlu0 %v1355_v45  ;;  %v433_v34 = vld [vmem:[%s9749_s3 + $0x110] sm:$0xff] }
 0x610   :  { %v1854_v57 = vmul.f32 1.442695, %v1853_v56 }
 0x611   :  { %v1012_v63 = vpop.permute.xlu1 %1011 }
 0x612   :  { %7945 = vpow2.f32 %v1854_v57  ;;  %1690 = vadd.xlane.f32.xlu0 %v1689_v50  ;;  %v434_v57 = vld [vmem:[%s9749_s3 + $0x118] sm:$0xff]  ;;  %v435_v50 = vld [vmem:[%s9749_s3 + $0x120] sm:$0xff] }
 0x615   :  { %v1179_v0 = vpop.permute.xlu1 %1178 }
 0x616   :  { %1523 = vadd.xlane.f32.xlu1 %v1522_v59  ;;  %v7697_v59 = vpack.c.bf16 %v435_v50, %v434_v57  ;;  %v442_v57 = vld [vmem:[%s9749_s3 + $0x158] sm:$0xff] }
 0x619   :  { %v1361_v1 = vpop.permute.xlu1 %1360 }
 0x61c   :  { %v8524_v60 = vpop.eup %7945 }
 0x61d   :  { %v1856_v61 = vsel %vm589_vm2, %v8524_v60, 0.0 }
 0x61e   :  { %1857 = vadd.xlane.f32.xlu0 %v1856_v61 }
 0x627   :  { %1861 = vrot.lane.b32.xlu1 %v8404_v54, %s8197_s27 }
 0x634   :  { %1694 = vrot.lane.b32.xlu0 %v8404_v54, %s8196_s26 }
 0x662   :  { %v674_v2 = vpop.xlane.xlu0 %673 }
 0x663   :  { %7947 = vrcp.f32 %v674_v2 }
 0x666   :  { %v841_v4 = vpop.xlane.xlu1 %840  ;;  %v845_v7 = vpop.permute.xlu0 %844 }
 0x667   :  { %7949 = vrcp.f32 %v841_v4 }
 0x66d   :  { %v7948_v5 = vpop.eup %7947 }
 0x66e   :  { %v676_v6 = vmul.f32 %v7948_v5, %v7932_v27  ;;  %v1175_v11 = vpop.xlane.xlu1 %1174 }
 0x670   :  { %7172 = vmatmul.mubr.msk.f32.vlgmr.msra.gmra.mrb[6].mxu1 %vm589_vm2, %v676_v6 }
 0x671   :  { %v7950_v8 = vpop.eup %7949  ;;  %7180 = vmatpush3.msra.mxu1 %v845_v7  ;;  %7181 = vmatprep.mubr.msk.f32.mxu1 %vm8186_vm1, %v8185_v14 }
 0x672   :  { %7189 = vmatprep.subr.mxu1 %v8185_v14  ;;  %v843_v54 = vmul.f32 %v7950_v8, %v8496_v31  ;;  %v1528_v25 = vpop.permute.xlu1 %1527 }
 0x674   :  { %7182 = vmatmul.mubr.msk.f32.vlgmr.msra.gmra.mrb[8].mxu1 %vm589_vm2, %v843_v54 }
 0x675   :  { %7190 = vmatpush3.msra.mxu1 %v1012_v63  ;;  %7191 = vmatprep.mubr.msk.f32.mxu1 %vm8186_vm1, %v8185_v14 }
 0x676   :  { %7199 = vmatprep.subr.mxu1 %v8185_v14 }
 0x697   :  { %v1008_v12 = vpop.xlane.xlu0 %1007 }
 0x698   :  { %7951 = vrcp.f32 %v1008_v12 }
 0x699   :  { %7953 = vrcp.f32 %v1175_v11 }
 0x69b   :  { %v1357_v23 = vpop.xlane.xlu0 %1356 }
 0x69c   :  { %7955 = vrcp.f32 %v1357_v23 }
 0x69f   :  { %v1691_v28 = vpop.xlane.xlu0 %1690 }
 0x6a2   :  { %v7952_v27 = vpop.eup %7951 }
 0x6a3   :  { %v1524_v30 = vpop.xlane.xlu1 %1523  ;;  %v1010_v32 = vmul.f32 %v7952_v27, %v7938_v48  ;;  %v7954_v31 = vpop.eup %7953 }
 0x6a4   :  { %7957 = vrcp.f32 %v1524_v30  ;;  %v1177_v22 = vmul.f32 %v7954_v31, %v8501_v29 }
 0x6a5   :  { %7192 = vmatmul.mubr.msk.f32.vlgmr.msra.gmra.mrb[10].mxu1 %vm589_vm2, %v1010_v32  ;;  %7959 = vrcp.f32 %v1691_v28 }
 0x6a6   :  { %7200 = vmatpush3.msra.mxu1 %v1179_v0  ;;  %7201 = vmatprep.mubr.msk.f32.mxu1 %vm8186_vm1, %v8185_v14  ;;  %v7956_v33 = vpop.eup %7955 }
 0x6a7   :  { %7209 = vmatprep.subr.mxu1 %v8185_v14  ;;  %v1359_v36 = vmul.f32 %v7956_v33, %v8512_v49  ;;  %v1862_v42 = vpop.permute.xlu1 %1861  ;;  %v432_v49 = vld [vmem:[%s9749_s3 + $0x108] sm:$0xff] }
 0x6a9   :  { %7202 = vmatmul.mubr.msk.f32.vlgmr.msra.gmra.mrb[12].mxu1 %vm589_vm2, %v1177_v22  ;;  %v6727_v22 = vld [vmem:[%s9749_s3 + $0x128] ss:$0 sm:$0xff] }
 0x6aa   :  { %7210 = vmatpush3.msra.mxu1 %v1361_v1  ;;  %7211 = vmatprep.mubr.msk.f32.mxu1 %vm8186_vm1, %v8185_v14 }
 0x6ab   :  { %v1858_v35 = vpop.xlane.xlu0 %1857  ;;  %7219 = vmatprep.subr.mxu1 %v8185_v14 }
 0x6ac   :  { %7961 = vrcp.f32 %v1858_v35 }
 0x6ad   :  { %7212 = vmatmul.mubr.msk.f32.vlgmr.msra.gmra.mrb[14].mxu1 %vm589_vm2, %v1359_v36 }
 0x6ae   :  { %v7958_v37 = vpop.eup %7957  ;;  %7220 = vmatpush3.msra.mxu1 %v1528_v25  ;;  %7221 = vmatprep.mubr.msk.f32.mxu1 %vm8186_vm1, %v8185_v14 }
 0x6af   :  { %v1695_v29 = vpop.permute.xlu0 %1694  ;;  %7229 = vmatprep.subr.mxu1 %v8185_v14  ;;  %v1526_v39 = vmul.f32 %v7958_v37, %v8520_v58  ;;  %v7960_v40 = vpop.eup %7959 }
 0x6b0   :  { %v1693_v41 = vmul.f32 %v7960_v40, %v8516_v52  ;;  %v7693_v52 = vpack.c.bf16 %v433_v34, %v432_v49  ;;  %v439_v34 = vld [vmem:[%s9749_s3 + $0x140] sm:$0xff] }
 0x6b1   :  { %7222 = vmatmul.mubr.msk.f32.vlgmr.msra.gmra.mrb[16].mxu1 %vm589_vm2, %v1526_v39 }
 0x6b2   :  { %7230 = vmatpush3.msra.mxu1 %v1695_v29  ;;  %7231 = vmatprep.mubr.msk.f32.mxu1 %vm8186_vm1, %v8185_v14 }
 0x6b3   :  { %7239 = vmatprep.subr.mxu1 %v8185_v14  ;;  %7694 = vmatprep.subr.bf16.mxu0 %v7693_v52 }
 0x6b4   :  { %7696 = vmatpush3.bf16.msra.mxu0 %v7693_v52  ;;  %v441_v52 = vld [vmem:[%s9749_s3 + $0x150] sm:$0xff] }
 0x6b5   :  { %7232 = vmatmul.mubr.msk.f32.vlgmr.msra.gmra.mrb[18].mxu1 %vm589_vm2, %v1693_v41  ;;  %7698 = vmatprep.subr.bf16.mxu0 %v7697_v59  ;;  %v7705_v50 = vpack.c.bf16 %v442_v57, %v441_v52 }
 0x6b6   :  { %v7962_v43 = vpop.eup %7961  ;;  %7240 = vmatpush3.msra.mxu1 %v1862_v42  ;;  %7241 = vmatprep.mubr.msk.f32.mxu1 %vm8186_vm1, %v8185_v14 }
 0x6b7   :  { %v1860_v44 = vmul.f32 %v7962_v43, %v8524_v60 }
 0x6b8   :  { %7700 = vmatpush3.bf16.msra.mxu0 %v7697_v59  ;;  %v445_v59 = vld [vmem:[%s9749_s3 + $0x170] sm:$0xff] }
 0x6b9   :  { %7242 = vmatmul.mubr.msk.f32.vlgmr.msra.gmra.mrb[20].mxu1 %vm589_vm2, %v1860_v44 }
 0x743   :  { %v749_v46 = vpop.f32.mrb[6].mxu1 }
 0x744   :  { %v7173_v47 = vpop.f32.mrb[7].mxu1 }
 0x747   :  { %v916_v48 = vpop.f32.mrb[8].mxu1 }
 0x748   :  { %1255 = vrot.lane.b32.xlu0 %v916_v48, %s8199_s29  ;;  %v7183_v53 = vpop.f32.mrb[9].mxu1 }
 0x778   :  { %v1083_v45 = vpop.f32.mrb[10].mxu1 }
 0x779   :  { %1259 = vrot.lane.b32.xlu1 %v1083_v45, %s8200_s9  ;;  %v7193_v56 = vpop.f32.mrb[11].mxu1  ;;  %v440_v45 = vld [vmem:[%s9749_s3 + $0x148] sm:$0xff] }
 0x77a   :  { %v7701_v56 = vpack.c.bf16 %v440_v45, %v439_v34  ;;  %v6732_v34 = vld [vmem:[%s9749_s3 + $0x160] ss:$0 sm:$0xff] }
 0x77c   :  { %v1250_v58 = vpop.f32.mrb[12].mxu1  ;;  %7702 = vmatprep.subr.bf16.mxu1 %v7701_v56 }
 0x77d   :  { %1263 = vrot.lane.b32.xlu1 %v1250_v58, %s8201_s14  ;;  %v7203_v60 = vpop.f32.mrb[13].mxu1  ;;  %7704 = vmatpush3.bf16.msra.mxu1 %v7701_v56  ;;  %v444_v58 = vld [vmem:[%s9749_s3 + $0x168] sm:$0xff] }
 0x77e   :  { %7706 = vmatprep.subr.bf16.mxu1 %v7705_v50  ;;  %v446_v60 = vld [vmem:[%s9749_s3 + $0x178] sm:$0xff] }
 0x780   :  { %v1432_v61 = vpop.f32.mrb[14].mxu1 }
 0x781   :  { %v7213_v63 = vpop.f32.mrb[15].mxu1  ;;  %7708 = vmatpush3.bf16.msra.mxu1 %v7705_v50 }
 0x782   :  { %v447_v63 = vld [vmem:[%s9749_s3 + $0x180] sm:$0xff] }
 0x784   :  { %v1599_v0 = vpop.f32.mrb[16].mxu1 }
 0x785   :  { %1938 = vrot.lane.b32.xlu0 %v1599_v0, %s8199_s29  ;;  %v7223_v1 = vpop.f32.mrb[17].mxu1  ;;  %v7713_v0 = vpack.c.bf16 %v447_v63, %v446_v60 }
 0x786   :  { %v448_v1 = vld [vmem:[%s9749_s3 + $0x188] sm:$0xff] }
 0x788   :  { %v1766_v2 = vpop.f32.mrb[18].mxu1 }
 0x789   :  { %1942 = vrot.lane.b32.xlu0 %v1766_v2, %s8200_s9  ;;  %v7233_v4 = vpop.f32.mrb[19].mxu1  ;;  %v449_v2 = vld [vmem:[%s9749_s3 + $0x190] sm:$0xff] }
 0x78a   :  { %v7717_v4 = vpack.c.bf16 %v449_v2, %v448_v1 }
 0x78c   :  { %v1933_v5 = vpop.f32.mrb[20].mxu1 }
 0x78d   :  { %1946 = vrot.lane.b32.xlu1 %v1933_v5, %s8201_s14  ;;  %v7243_v6 = vpop.f32.mrb[21].mxu1 }
 0x7ba   :  { %v1256_v7 = vpop.permute.xlu0 %1255 }
 0x7bb   :  { %v1266_v54 = vsel %vm589_vm2, %v749_v46, %v1256_v7 }
 0x7eb   :  { %v1260_v8 = vpop.permute.xlu1 %1259 }
 0x7ec   :  { %v1267_v11 = vsel %vm206_vm13, %v1266_v54, %v1260_v8 }
 0x7ef   :  { %v1264_v12 = vpop.permute.xlu1 %1263 }
 0x7f0   :  { %v1269_v23 = vsel %vm1268_vm4, %v1267_v11, %v1264_v12 }
 0x7f1   :  { %7252 = vmatprep.mubr.msk.f32.mxu0 %vm461_vm15, %v1269_v23  ;;  %v6730_v23 = vld [vmem:[%s9749_s3 + $0x130] ss:$0 sm:$0xff] }
 0x7f7   :  { %v1939_v25 = vpop.permute.xlu0 %1938 }
 0x7f8   :  { %v1949_v28 = vsel %vm589_vm2, %v1432_v61, %v1939_v25  ;;  %v7709_v61 = vpack.c.bf16 %v445_v59, %v444_v58 }
 0x7fa   :  { %7710 = vmatprep.subr.bf16.mxu0 %v7709_v61 }
 0x7fb   :  { %v1943_v27 = vpop.permute.xlu0 %1942 }
 0x7fc   :  { %v1950_v30 = vsel %vm206_vm13, %v1949_v28, %v1943_v27  ;;  %v6731_v27 = vld [vmem:[%s9749_s3 + $0x138] ss:$0 sm:$0xff] }
 0x7ff   :  { %v1947_v32 = vpop.permute.xlu1 %1946 }
 0x800   :  { %v1951_v31 = vsel %vm1268_vm4, %v1950_v30, %v1947_v32 }
 0x801   :  { %7253 = vmatmul.mubr.msk.f32.vlgmr.msra.gmra.mrb[20].mxu0 %vm461_vm15, %v1951_v31 }
 0x802   :  { %7712 = vmatpush3.bf16.msra.mxu0 %v7709_v61 }
 0x803   :  { %7714 = vmatprep.subr.bf16.mxu0 %v7713_v0 }
 0x806   :  { %7716 = vmatpush3.bf16.msra.mxu0 %v7713_v0 }
 0x807   :  { %7718 = vmatprep.subr.bf16.mxu0 %v7717_v4 }
 0x80a   :  { %7720 = vmatpush3.bf16.msra.mxu0 %v7717_v4 }
 0x8d4   :  { %v7254_v33 = vpop.f32.mrb[20].mxu0 }
 0x8d5   :  { %v2034_v35 = vadd.f32 %v7254_v33, %v6727_v22  ;;  %v2028_v36 = vpop.f32.mrb[21].mxu0 }
 0x8d6   :  { %v2029_v37 = vadd.f32 %v6727_v22, %v2028_v36  ;;  %v451_v36 = vld [vmem:[%s9749_s3 + $0x1a0] sm:$0xff] }
 0x8d7   :  { %v8596_v29 = vadd.f32 %v2034_v35, %v8356_v3  ;;  %v450_v35 = vld [vmem:[%s9749_s3 + $0x198] sm:$0xff] }
 0x8d8   :  { %v8599_v39 = vadd.f32 %v2029_v37, %v8351_v62  ;;  %v7721_v37 = vpack.c.bf16 %v451_v36, %v450_v35 }
 0x8d9   :  { %v2042_v40 = vsel %vm461_vm15, %v8596_v29, 0.0 }
 0x8da   :  { %2043 = vadd.xlane.f32.xlu1 %v2042_v40  ;;  %v2039_v41 = vsel %vm461_vm15, %v8599_v39, 0.0  ;;  %7722 = vmatprep.subr.bf16.mxu0 %v7721_v37  ;;  %v452_v40 = vld [vmem:[%s9749_s3 + $0x1a8] sm:$0xff] }
 0x8db   :  { %2040 = vadd.xlane.f32.xlu0 %v2039_v41  ;;  %7724 = vmatpush3.bf16.msra.mxu0 %v7721_v37  ;;  %v453_v41 = vld [vmem:[%s9749_s3 + $0x1b0] sm:$0xff] }
 0x967   :  { %v2044_v42 = vpop.xlane.xlu1 %2043 }
 0x968   :  { %v2046_v43 = vmul.f32 0.03125, %v2044_v42  ;;  %v2041_v44 = vpop.xlane.xlu0 %2040  ;;  %v7725_v42 = vpack.c.bf16 %v453_v41, %v452_v40 }
 0x969   :  { %v2045_v46 = vmul.f32 0.03125, %v2041_v44  ;;  %v455_v44 = vld [vmem:[%s9749_s3 + $0x1c0] sm:$0xff] }
 0x96a   :  { %v2048_v47 = vsub.f32 %v8596_v29, %v2046_v43  ;;  %7726 = vmatprep.subr.bf16.mxu0 %v7725_v42  ;;  %v454_v43 = vld [vmem:[%s9749_s3 + $0x1b8] sm:$0xff] }
 0x96b   :  { %v2047_v3 = vsub.f32 %v8599_v39, %v2045_v46  ;;  %7728 = vmatpush3.bf16.msra.mxu0 %v7725_v42  ;;  %v7729_v46 = vpack.c.bf16 %v455_v44, %v454_v43 }
 0x96c   :  { %v2050_v53 = vmul.f32 %v2048_v47, %v2048_v47 }
 0x96d   :  { %v2049_v48 = vmul.f32 %v2047_v3, %v2047_v3  ;;  %7730 = vmatprep.subr.bf16.mxu0 %v7729_v46 }
 0x96e   :  { %v2054_v49 = vsel %vm461_vm15, %v2050_v53, 0.0  ;;  %v459_v53 = vld [vmem:[%s9749_s3 + $0x1e0] sm:$0xff] }
 0x96f   :  { %v2051_v62 = vsel %vm461_vm15, %v2049_v48, 0.0  ;;  %7732 = vmatpush3.bf16.msra.mxu0 %v7729_v46  ;;  %v8695_v46 = vld [vmem:[%s9749_s3 + $0x50] ss:$0 sm:$0xff] }
 0x970   :  { %2052 = vadd.xlane.f32.xlu0 %v2051_v62  ;;  %v458_v62 = vld [vmem:[%s9749_s3 + $0x1d8] sm:$0xff] }
 0x974   :  { %2055 = vadd.xlane.f32.xlu0 %v2054_v49  ;;  %v7737_v49 = vpack.c.bf16 %v459_v53, %v458_v62 }
 0x9fd   :  { %v2053_v5 = vpop.xlane.xlu0 %2052 }
 0x9fe   :  { %v2057_v6 = vmul.f32 0.03125, %v2053_v5  ;;  %v6735_v5 = vld [vmem:[%s9749_s3 + $0x1e8] ss:$0 sm:$0xff] }
 0xa00   :  { %v2059_v7 = vadd.f32 1e-05, %v2057_v6 }
 0xa01   :  { %v2056_v8 = vpop.xlane.xlu0 %2055 }
 0xa02   :  { %7963 = vrsqrt.f32 %v2059_v7  ;;  %v2058_v54 = vmul.f32 0.03125, %v2056_v8 }
 0xa04   :  { %v2060_v11 = vadd.f32 1e-05, %v2058_v54 }
 0xa06   :  { %7965 = vrsqrt.f32 %v2060_v11 }
 0xa0c   :  { %v7964_v12 = vpop.eup %7963 }
 0xa0d   :  { %v2063_v25 = vmul.f32 %v7964_v12, %v2047_v3  ;;  %v457_v3 = vld [vmem:[%s9749_s3 + $0x1d0] sm:$0xff] }
 0xa0f   :  { %v2069_v28 = vmul.f32 %v6730_v23, %v2063_v25 }
 0xa10   :  { %v7966_v30 = vpop.eup %7965 }
 0xa11   :  { %v2064_v32 = vmul.f32 %v7966_v30, %v2048_v47  ;;  %v2075_v31 = vadd.f32 %v6731_v27, %v2069_v28  ;;  %v456_v47 = vld [vmem:[%s9749_s3 + $0x1c8] sm:$0xff] }
 0xa12   :  { %v7733_v48 = vpack.c.bf16 %v457_v3, %v456_v47 }
 0xa13   :  { %v2070_v22 = vmul.f32 %v6730_v23, %v2064_v32  ;;  %7263 = vmatprep.mubr.msk.f32.mxu1 %vm461_vm15, %v2075_v31 }
 0xa14   :  { %7734 = vmatprep.subr.bf16.mxu0 %v7733_v48 }
 0xa15   :  { %v2076_v33 = vadd.f32 %v6731_v27, %v2070_v22  ;;  %7736 = vmatpush3.bf16.msra.mxu0 %v7733_v48  ;;  %v8700_v48 = vld [vmem:[%s9749_s3 + $0x58] ss:$0 sm:$0xff] }
 0xa16   :  { %7738 = vmatprep.subr.bf16.mxu0 %v7737_v49 }
 0xa17   :  { %7264 = vmatmul.mubr.msk.f32.vlgmr.msra.gmra.mrb[22].mxu1 %vm461_vm15, %v2076_v33 }
 0xa19   :  { %7740 = vmatpush3.bf16.msra.mxu0 %v7737_v49 }
 0xa1a   :  { %7342 = vmatprep.subr.mxu0 %v8185_v14 }
 0xaea   :  { %v7265_v45 = vpop.f32.mrb[22].mxu1 }
 0xaeb   :  { %v2159_v52 = vadd.f32 %v7265_v45, %v6732_v34  ;;  %v2153_v56 = vpop.f32.mrb[23].mxu1 }
 0xaec   :  { %v2154_v57 = vadd.f32 %v6732_v34, %v2153_v56 }
 0xaed   :  { %v2165_v50 = vmul.f32 0.70710677, %v2159_v52  ;;  %v2163_v1 = vmul.f32 0.5, %v2159_v52 }
 0xaee   :  { %v2164_v58 = vmul.f32 0.70710677, %v2154_v57  ;;  %v2162_v63 = vmul.f32 0.5, %v2154_v57 }
 0xaef   :  { %7967 = verf.f32 %v2165_v50 }
 0xaf0   :  { %7969 = verf.f32 %v2164_v58 }
 0xaf9   :  { %v7968_v59 = vpop.eup %7967 }
 0xafa   :  { %v7970_v60 = vpop.eup %7969  ;;  %v2169_v61 = vadd.f32 1.0, %v7968_v59 }
 0xafb   :  { %v2168_v0 = vadd.f32 1.0, %v7970_v60 }
 0xafc   :  { %v2171_v4 = vmul.f32 %v2169_v61, %v2163_v1 }
 0xafd   :  { %v2170_v2 = vmul.f32 %v2168_v0, %v2162_v63 }
 0xaff   :  { %7298 = vmatprep.mubr.f32.mxu0 %v2170_v2 }
 0xb00   :  { %7299 = vmatmul.mubr.f32.vlgmr.msra.gmra.mrb[22].mxu0 %v2171_v4  ;;  %v2293_v4 = vld [vmem:[%s9749_s3 + $0x200] sm:$0xff] }
 0xb01   :  { %7344 = vmatprep.mubr.msk.f32.mxu0 %vm8186_vm1, %v8185_v14 }
 0xbd3   :  { %v7300_v6 = vpop.f32.mrb[22].mxu0 }
 0xbd4   :  { %v2248_v7 = vadd.f32 %v7300_v6, %v6735_v5  ;;  %v2242_v8 = vpop.f32.mrb[23].mxu0  ;;  %v2295_v6 = vld [vmem:[%s9749_s3 + $0x210] sm:$0xff] }
 0xbd5   :  { %v2243_v54 = vadd.f32 %v6735_v5, %v2242_v8  ;;  %v2294_v5 = vld [vmem:[%s9749_s3 + $0x208] sm:$0xff]  ;;  %v2296_v8 = vld [vmem:[%s9749_s3 + $0x218] sm:$0xff] }
 0xbd6   :  { %v2252_v11 = vadd.f32 %v2248_v7, %v8596_v29  ;;  %v7741_v7 = vpack.c.bf16 %v2294_v5, %v2293_v4 }
 0xbd7   :  { %v2251_v12 = vadd.f32 %v2243_v54, %v8599_v39  ;;  %v7745_v54 = vpack.c.bf16 %v2296_v8, %v2295_v6 }
 0xbd8   :  { %v2256_v23 = vsel %vm461_vm15, %v2252_v11, 0.0  ;;  %7742 = vmatprep.subr.bf16.mxu1 %v7741_v7 }
 0xbd9   :  { %2257 = vadd.xlane.f32.xlu1 %v2256_v23  ;;  %v2253_v25 = vsel %vm461_vm15, %v2251_v12, 0.0  ;;  %7744 = vmatpush3.bf16.msra.mxu1 %v7741_v7 }
 0xbda   :  { %2254 = vadd.xlane.f32.xlu0 %v2253_v25  ;;  %7746 = vmatprep.subr.bf16.mxu1 %v7745_v54 }
 0xbdd   :  { %7748 = vmatpush3.bf16.msra.mxu1 %v7745_v54 }
 0xbde   :  { %7312 = vmatprep.subr.mxu1 %v8185_v14 }
 0xc66   :  { %v2258_v27 = vpop.xlane.xlu1 %2257 }
 0xc67   :  { %v2260_v28 = vmul.f32 0.03125, %v2258_v27  ;;  %v2255_v30 = vpop.xlane.xlu0 %2254 }
 0xc68   :  { %v2259_v32 = vmul.f32 0.03125, %v2255_v30 }
 0xc69   :  { %v2262_v31 = vsub.f32 %v2252_v11, %v2260_v28 }
 0xc6a   :  { %v2261_v22 = vsub.f32 %v2251_v12, %v2259_v32  ;;  %v6738_v32 = vld [vmem:[%s9749_s3 + $0x1f0] ss:$0 sm:$0xff] }
 0xc6b   :  { %v2264_v33 = vmul.f32 %v2262_v31, %v2262_v31 }
 0xc6c   :  { %v2263_v35 = vmul.f32 %v2261_v22, %v2261_v22 }
 0xc6d   :  { %v2268_v36 = vsel %vm461_vm15, %v2264_v33, 0.0 }
 0xc6e   :  { %2269 = vadd.xlane.f32.xlu1 %v2268_v36  ;;  %v2265_v29 = vsel %vm461_vm15, %v2263_v35, 0.0  ;;  %v6739_v35 = vld [vmem:[%s9749_s3 + $0x1f8] ss:$0 sm:$0xff] }
 0xc6f   :  { %2266 = vadd.xlane.f32.xlu0 %v2265_v29 }
 0xcfb   :  { %v2270_v39 = vpop.xlane.xlu1 %2269 }
 0xcfc   :  { %v2272_v37 = vmul.f32 0.03125, %v2270_v39  ;;  %v2267_v40 = vpop.xlane.xlu0 %2266 }
 0xcfd   :  { %v2271_v41 = vmul.f32 0.03125, %v2267_v40  ;;  %v6740_v40 = vld [vmem:[%s9749_s3 + $0x220] ss:$0 sm:$0xff] }
 0xcfe   :  { %v2274_v42 = vadd.f32 1e-05, %v2272_v37 }
 0xcff   :  { %v2273_v43 = vadd.f32 1e-05, %v2271_v41 }
 0xd00   :  { %7971 = vrsqrt.f32 %v2274_v42 }
 0xd01   :  { %7973 = vrsqrt.f32 %v2273_v43 }
 0xd0a   :  { %v7972_v44 = vpop.eup %7971 }
 0xd0b   :  { %v7974_v47 = vpop.eup %7973  ;;  %v2278_v3 = vmul.f32 %v7972_v44, %v2262_v31 }
 0xd0c   :  { %v2277_v62 = vmul.f32 %v7974_v47, %v2261_v22 }
 0xd0d   :  { %v2284_v53 = vmul.f32 %v8695_v46, %v2278_v3 }
 0xd0e   :  { %v2283_v49 = vmul.f32 %v8695_v46, %v2277_v62 }
 0xd0f   :  { %v8705_v34 = vadd.f32 %v8700_v48, %v2284_v53 }
 0xd10   :  { %v8708_v45 = vadd.f32 %v8700_v48, %v2283_v49 }
 0xd11   :  { %v2330_v52 = vsel %vm461_vm15, %v8705_v34, 0.0 }
 0xd12   :  { %2331 = vadd.xlane.f32.xlu1 %v2330_v52  ;;  %v2327_v56 = vsel %vm461_vm15, %v8708_v45, 0.0 }
 0xd13   :  { %2328 = vadd.xlane.f32.xlu0 %v2327_v56 }
 0xd9f   :  { %v2332_v57 = vpop.xlane.xlu1 %2331 }
 0xda0   :  { %v2334_v50 = vmul.f32 0.03125, %v2332_v57  ;;  %v2329_v58 = vpop.xlane.xlu0 %2328 }
 0xda1   :  { %v2333_v59 = vmul.f32 0.03125, %v2329_v58 }
 0xda2   :  { %v2336_v60 = vsub.f32 %v8705_v34, %v2334_v50 }
 0xda3   :  { %v2335_v61 = vsub.f32 %v8708_v45, %v2333_v59 }
 0xda4   :  { %v2338_v63 = vmul.f32 %v2336_v60, %v2336_v60 }
 0xda5   :  { %v2337_v0 = vmul.f32 %v2335_v61, %v2335_v61 }
 0xda6   :  { %v2342_v1 = vsel %vm461_vm15, %v2338_v63, 0.0 }
 0xda7   :  { %2343 = vadd.xlane.f32.xlu1 %v2342_v1  ;;  %v2339_v2 = vsel %vm461_vm15, %v2337_v0, 0.0 }
 0xda8   :  { %2340 = vadd.xlane.f32.xlu0 %v2339_v2 }
 0xe34   :  { %v2344_v11 = vpop.xlane.xlu1 %2343 }
 0xe35   :  { %v2346_v12 = vmul.f32 0.03125, %v2344_v11  ;;  %v2341_v23 = vpop.xlane.xlu0 %2340 }
 0xe36   :  { %v2345_v25 = vmul.f32 0.03125, %v2341_v23 }
 0xe37   :  { %v2348_v27 = vadd.f32 1e-05, %v2346_v12 }
 0xe38   :  { %v2347_v28 = vadd.f32 1e-05, %v2345_v25 }
 0xe39   :  { %7975 = vrsqrt.f32 %v2348_v27 }
 0xe3a   :  { %7977 = vrsqrt.f32 %v2347_v28 }
 0xe43   :  { %v7976_v30 = vpop.eup %7975 }
 0xe44   :  { %v7978_v31 = vpop.eup %7977  ;;  %v2352_v22 = vmul.f32 %v7976_v30, %v2336_v60 }
 0xe45   :  { %v2351_v33 = vmul.f32 %v7978_v31, %v2335_v61 }
 0xe46   :  { %v2358_v36 = vmul.f32 %v6738_v32, %v2352_v22 }
 0xe47   :  { %v2357_v29 = vmul.f32 %v6738_v32, %v2351_v33 }
 0xe48   :  { %v2364_v37 = vadd.f32 %v6739_v35, %v2358_v36 }
 0xe49   :  { %v2363_v39 = vadd.f32 %v6739_v35, %v2357_v29 }
 0xe4b   :  { %7309 = vmatprep.mubr.msk.f32.mxu1 %vm461_vm15, %v2363_v39 }
 0xe4c   :  { %7310 = vmatmul.mubr.msk.f32.vlgmr.msra.gmra.mrb[24].mxu1 %vm461_vm15, %v2364_v37 }
 0xe4d   :  { %7314 = vmatprep.mubr.msk.f32.mxu1 %vm8186_vm1, %v8185_v14 }
 0xf1f   :  { %v7311_v41 = vpop.f32.mrb[24].mxu1 }
 0xf20   :  { %v8744_v42 = vadd.f32 %v7311_v41, %v6740_v40  ;;  %v2441_v43 = vpop.f32.mrb[25].mxu1 }
 0xf21   :  { %v8746_v44 = vadd.f32 %v6740_v40, %v2441_v43 }
 0xf23   :  { %2451 = vrot.lane.b32.xlu0 %v8746_v44, %s8188_s20 }
 0xf27   :  { %2618 = vrot.lane.b32.xlu0 %v8746_v44, %s8187_s1 }
 0xf95   :  { %v2452_v47 = vpop.permute.xlu0 %2451 }
 0xf96   :  { %7313 = vmatpush3.xpose.msk.msra.mxu1 %vm589_vm2, %v2452_v47 }
 0xf97   :  { %7317 = vmatprep.subr.mxu1 %v8185_v14 }
 0xf99   :  { %7315 = vmatmul.mubr.msk.f32.vlgmr.msra.gmra.mrb[26].mxu1 %vm589_vm2, %v8746_v44  ;;  %v2619_v5 = vpop.permute.xlu0 %2618 }
 0xf9a   :  { %7319 = vmatprep.mubr.msk.f32.mxu1 %vm8186_vm1, %v8185_v14 }
0x106c   :  { %v2523_v3 = vpop.f32.mrb[26].mxu1 }
0x106d   :  { %v2527_v62 = vmul.f32 0.35355338, %v2523_v3  ;;  %v7316_v53 = vpop.f32.mrb[27].mxu1 }
0x106f   :  { %v2528_v49 = vadd.f32 %v2527_v62, %v8463_v10 }
0x1071   :  { %v2529_v52 = vsel %vm589_vm2, %v2528_v49, -inf }
0x1072   :  { %2530 = vmax.xlane.f32.xlu1 %v2529_v52 }
0x1083   :  { %2540 = vrot.lane.b32.xlu1 %v8746_v44, %s8195_s0 }
0x10ff   :  { %v2531_v56 = vpop.xlane.xlu1 %2530 }
0x1100   :  { %v2532_v57 = vsub.f32 %v2528_v49, %v2531_v56 }
0x1102   :  { %v2533_v50 = vmul.f32 1.442695, %v2532_v57 }
0x1103   :  { %v2541_v58 = vpop.permute.xlu1 %2540 }
0x1104   :  { %7979 = vpow2.f32 %v2533_v50  ;;  %7318 = vmatpush3.msra.mxu1 %v2541_v58 }
0x1105   :  { %7322 = vmatprep.subr.mxu1 %v8185_v14 }
0x110e   :  { %v7980_v59 = vpop.eup %7979 }
0x110f   :  { %v2535_v60 = vsel %vm589_vm2, %v7980_v59, 0.0 }
0x1110   :  { %2536 = vadd.xlane.f32.xlu1 %v2535_v60 }
0x1121   :  { %2616 = vrot.lane.b32.xlu1 %v8746_v44, %s8189_s21 }
0x1125   :  { %2785 = vrot.lane.b32.xlu1 %v8746_v44, %s8191_s23 }
0x1129   :  { %2952 = vrot.lane.b32.xlu1 %v8746_v44, %s8193_s25 }
0x119d   :  { %v2537_v61 = vpop.xlane.xlu1 %2536 }
0x119e   :  { %7981 = vrcp.f32 %v2537_v61 }
0x11a1   :  { %v2617_v63 = vpop.permute.xlu1 %2616 }
0x11a5   :  { %v8770_v0 = vpop.permute.xlu1 %2785 }
0x11a8   :  { %v7982_v1 = vpop.eup %7981 }
0x11a9   :  { %v2953_v2 = vpop.permute.xlu1 %2952  ;;  %v2539_v4 = vmul.f32 %v7982_v1, %v7980_v59 }
0x11aa   :  { %7343 = vmatpush3.xpose.msk.msra.mxu0 %vm589_vm2, %v2953_v2 }
0x11ab   :  { %7320 = vmatmul.mubr.msk.f32.vlgmr.msra.gmra.mrb[28].mxu1 %vm589_vm2, %v2539_v4  ;;  %7352 = vmatprep.subr.mxu0 %v8185_v14 }
0x11ac   :  { %7323 = vmatpush3.xpose.msk.msra.mxu1 %vm589_vm2, %v2619_v5  ;;  %7324 = vmatprep.mubr.msk.f32.mxu1 %vm8186_vm1, %v8185_v14 }
0x11ad   :  { %7327 = vmatprep.subr.mxu1 %v8185_v14 }
0x11af   :  { %7325 = vmatmul.mubr.msk.f32.vlgmr.msra.gmra.mrb[30].mxu1 %vm589_vm2, %v2617_v63 }
0x11b0   :  { %7329 = vmatprep.mubr.msk.f32.mxu1 %vm8186_vm1, %v8185_v14 }
0x127e   :  { %v8782_v6 = vpop.f32.mrb[28].mxu1 }
0x127f   :  { %v7321_v7 = vpop.f32.mrb[29].mxu1 }
0x1282   :  { %v2690_v8 = vpop.f32.mrb[30].mxu1 }
0x1283   :  { %v2694_v54 = vmul.f32 0.35355338, %v2690_v8  ;;  %v7326_v11 = vpop.f32.mrb[31].mxu1 }
0x1285   :  { %v2695_v12 = vadd.f32 %v2694_v54, %v8463_v10 }
0x1287   :  { %v2696_v23 = vsel %vm589_vm2, %v2695_v12, -inf }
0x1288   :  { %2697 = vmax.xlane.f32.xlu0 %v2696_v23 }
0x129e   :  { %2707 = vrot.lane.b32.xlu0 %v8746_v44, %s8198_s28 }
0x12a2   :  { %2783 = vrot.lane.b32.xlu0 %v8746_v44, %s8190_s22 }
0x12a6   :  { %2950 = vrot.lane.b32.xlu0 %v8746_v44, %s8192_s24 }
0x12aa   :  { %3300 = vrot.lane.b32.xlu0 %v8744_v42, %s8187_s1 }
0x12ae   :  { %3467 = vrot.lane.b32.xlu0 %v8744_v42, %s8191_s23 }
0x12b2   :  { %3634 = vrot.lane.b32.xlu0 %v8744_v42, %s8193_s25 }
0x1315   :  { %v2698_v25 = vpop.xlane.xlu0 %2697 }
0x1316   :  { %v2699_v27 = vsub.f32 %v2695_v12, %v2698_v25 }
0x1318   :  { %v2700_v28 = vmul.f32 1.442695, %v2699_v27 }
0x1319   :  { %v2708_v30 = vpop.permute.xlu0 %2707 }
0x131a   :  { %7983 = vpow2.f32 %v2700_v28  ;;  %7328 = vmatpush3.msra.mxu1 %v2708_v30 }
0x131b   :  { %7332 = vmatprep.subr.mxu1 %v8185_v14 }
0x131d   :  { %v2784_v32 = vpop.permute.xlu0 %2783 }
0x1321   :  { %v2951_v31 = vpop.permute.xlu0 %2950 }
0x1322   :  { %7345 = vmatmul.mubr.msk.f32.vlgmr.msra.gmra.mrb[24].mxu0 %vm589_vm2, %v2951_v31 }
0x1323   :  { %7354 = vmatprep.mubr.msk.f32.mxu0 %vm8186_vm1, %v8185_v14 }
0x1324   :  { %v7984_v22 = vpop.eup %7983 }
0x1325   :  { %v2702_v33 = vsel %vm589_vm2, %v7984_v22, 0.0  ;;  %v3301_v36 = vpop.permute.xlu0 %3300 }
0x1326   :  { %2703 = vadd.xlane.f32.xlu1 %v2702_v33 }
0x1329   :  { %v3468_v37 = vpop.permute.xlu0 %3467 }
0x132d   :  { %v3635_v47 = vpop.permute.xlu0 %3634 }
0x1337   :  { %3133 = vrot.lane.b32.xlu1 %v8744_v42, %s8188_s20 }
0x133b   :  { %3298 = vrot.lane.b32.xlu1 %v8744_v42, %s8189_s21 }
0x133f   :  { %3465 = vrot.lane.b32.xlu1 %v8744_v42, %s8190_s22 }
0x1343   :  { %3632 = vrot.lane.b32.xlu1 %v8744_v42, %s8192_s24 }
0x13b3   :  { %v2704_v35 = vpop.xlane.xlu1 %2703 }
0x13b4   :  { %7985 = vrcp.f32 %v2704_v35 }
0x13b7   :  { %v3134_v29 = vpop.permute.xlu1 %3133 }
0x13b8   :  { %7353 = vmatpush3.xpose.msk.msra.mxu0 %vm589_vm2, %v3134_v29 }
0x13b9   :  { %7362 = vmatprep.subr.mxu0 %v8185_v14 }
0x13bb   :  { %v3299_v39 = vpop.permute.xlu1 %3298  ;;  %7355 = vmatmul.mubr.msk.f32.vlgmr.msra.gmra.mrb[26].mxu0 %vm589_vm2, %v8744_v42 }
0x13bc   :  { %7363 = vmatpush3.xpose.msk.msra.mxu0 %vm589_vm2, %v3301_v36  ;;  %7364 = vmatprep.mubr.msk.f32.mxu0 %vm8186_vm1, %v8185_v14 }
0x13bd   :  { %7372 = vmatprep.subr.mxu0 %v8185_v14 }
0x13be   :  { %v7986_v40 = vpop.eup %7985 }
0x13bf   :  { %7365 = vmatmul.mubr.msk.f32.vlgmr.msra.gmra.mrb[28].mxu0 %vm589_vm2, %v3299_v39  ;;  %v2706_v41 = vmul.f32 %v7986_v40, %v7984_v22  ;;  %v3466_v43 = vpop.permute.xlu1 %3465 }
0x13c0   :  { %7373 = vmatpush3.xpose.msk.msra.mxu0 %vm589_vm2, %v3468_v37  ;;  %7374 = vmatprep.mubr.msk.f32.mxu0 %vm8186_vm1, %v8185_v14 }
0x13c1   :  { %7330 = vmatmul.mubr.msk.f32.vlgmr.msra.gmra.mrb[32].mxu1 %vm589_vm2, %v2706_v41  ;;  %7382 = vmatprep.subr.mxu0 %v8185_v14 }
0x13c2   :  { %7333 = vmatpush3.xpose.msk.msra.mxu1 %vm589_vm2, %v8770_v0  ;;  %7334 = vmatprep.mubr.msk.f32.mxu1 %vm8186_vm1, %v8185_v14 }
0x13c3   :  { %7375 = vmatmul.mubr.msk.f32.vlgmr.msra.gmra.mrb[30].mxu0 %vm589_vm2, %v3466_v43  ;;  %7337 = vmatprep.subr.mxu1 %v8185_v14  ;;  %v3633_v3 = vpop.permute.xlu1 %3632 }
0x13c4   :  { %7383 = vmatpush3.xpose.msk.msra.mxu0 %vm589_vm2, %v3635_v47  ;;  %7384 = vmatprep.mubr.msk.f32.mxu0 %vm8186_vm1, %v8185_v14 }
0x13c5   :  { %7335 = vmatmul.mubr.msk.f32.vlgmr.msra.gmra.mrb[34].mxu1 %vm589_vm2, %v2784_v32 }
0x13c6   :  { %7339 = vmatprep.mubr.msk.f32.mxu1 %vm8186_vm1, %v8185_v14 }
0x13c7   :  { %7385 = vmatmul.mubr.msk.f32.vlgmr.msra.gmra.mrb[32].mxu0 %vm589_vm2, %v3633_v3 }
0x13f5   :  { %v3024_v62 = vpop.f32.mrb[24].mxu0 }
0x13f6   :  { %v3028_v53 = vmul.f32 0.35355338, %v3024_v62  ;;  %v7346_v49 = vpop.f32.mrb[25].mxu0 }
0x13f8   :  { %v3029_v52 = vadd.f32 %v3028_v53, %v8463_v10 }
0x13fa   :  { %v3030_v56 = vsel %vm589_vm2, %v3029_v52, -inf }
0x13fb   :  { %3031 = vmax.xlane.f32.xlu1 %v3030_v56 }
0x1488   :  { %v3032_v57 = vpop.xlane.xlu1 %3031 }
0x1489   :  { %v3033_v50 = vsub.f32 %v3029_v52, %v3032_v57 }
0x148b   :  { %v3034_v60 = vmul.f32 1.442695, %v3033_v50 }
0x148d   :  { %7987 = vpow2.f32 %v3034_v60 }
0x148e   :  { %v3205_v58 = vpop.f32.mrb[26].mxu0 }
0x148f   :  { %v7356_v59 = vpop.f32.mrb[27].mxu0  ;;  %v3209_v7 = vmul.f32 0.35355338, %v3205_v58 }
0x1491   :  { %v3210_v32 = vadd.f32 %v3209_v7, %v8463_v10 }
0x1492   :  { %v3372_v61 = vpop.f32.mrb[28].mxu0 }
0x1493   :  { %v7366_v63 = vpop.f32.mrb[29].mxu0  ;;  %v3376_v27 = vmul.f32 0.35355338, %v3372_v61  ;;  %v3211_v35 = vsel %vm589_vm2, %v3210_v32, -inf }
0x1494   :  { %v8840_v0 = vpop.f32.mrb[32].mxu1 }
0x1495   :  { %v7331_v1 = vpop.f32.mrb[33].mxu1  ;;  %v3377_v36 = vadd.f32 %v3376_v27, %v8463_v10 }
0x1496   :  { %v3539_v2 = vpop.f32.mrb[30].mxu0 }
0x1497   :  { %v7376_v4 = vpop.f32.mrb[31].mxu0  ;;  %v8847_v22 = vpop.eup %7987  ;;  %v3543_v33 = vmul.f32 0.35355338, %v3539_v2  ;;  %v3378_v39 = vsel %vm589_vm2, %v3377_v36, -inf }
0x1498   :  { %v2857_v5 = vpop.f32.mrb[34].mxu1  ;;  %v3036_v29 = vsel %vm589_vm2, %v8847_v22, 0.0 }
0x1499   :  { %v2861_v8 = vmul.f32 0.35355338, %v2857_v5  ;;  %v7336_v54 = vpop.f32.mrb[35].mxu1  ;;  %v3544_v37 = vadd.f32 %v3543_v33, %v8463_v10 }
0x149a   :  { %v3706_v11 = vpop.f32.mrb[32].mxu0 }
0x149b   :  { %v3710_v12 = vmul.f32 0.35355338, %v3706_v11  ;;  %v7386_v23 = vpop.f32.mrb[33].mxu0  ;;  %v2862_v25 = vadd.f32 %v2861_v8, %v8463_v10  ;;  %v3545_v40 = vsel %vm589_vm2, %v3544_v37, -inf }
0x149d   :  { %v2863_v28 = vsel %vm589_vm2, %v2862_v25, -inf  ;;  %v3711_v30 = vadd.f32 %v3710_v12, %v8463_v10 }
0x149e   :  { %2864 = vmax.xlane.f32.xlu0 %v2863_v28 }
0x149f   :  { %v3712_v31 = vsel %vm589_vm2, %v3711_v30, -inf }
0x14a0   :  { %3713 = vmax.xlane.f32.xlu1 %v3712_v31 }
0x14a2   :  { %3212 = vmax.xlane.f32.xlu0 %v3211_v35 }
0x14a4   :  { %3037 = vadd.xlane.f32.xlu1 %v3036_v29 }
0x14a6   :  { %3379 = vmax.xlane.f32.xlu0 %v3378_v39 }
0x14aa   :  { %3546 = vmax.xlane.f32.xlu0 %v3545_v40 }
0x152b   :  { %v2865_v41 = vpop.xlane.xlu0 %2864 }
0x152c   :  { %v2866_v56 = vsub.f32 %v2862_v25, %v2865_v41 }
0x152d   :  { %v3714_v43 = vpop.xlane.xlu1 %3713 }
0x152e   :  { %v3715_v62 = vsub.f32 %v3711_v30, %v3714_v43  ;;  %v2867_v10 = vmul.f32 1.442695, %v2866_v56 }
0x152f   :  { %v3213_v47 = vpop.xlane.xlu0 %3212 }
0x1530   :  { %v3214_v3 = vsub.f32 %v3210_v32, %v3213_v47  ;;  %v3716_v57 = vmul.f32 1.442695, %v3715_v62 }
0x1531   :  { %v3038_v23 = vpop.xlane.xlu1 %3037 }
0x1532   :  { %v3215_v53 = vmul.f32 1.442695, %v3214_v3 }
0x1533   :  { %v3380_v49 = vpop.xlane.xlu0 %3379 }
0x1534   :  { %7989 = vpow2.f32 %v3215_v53  ;;  %v3381_v52 = vsub.f32 %v3377_v36, %v3380_v49  ;;  %v2298_v53 = vld [vmem:[%s9749_s3 + $0x228] sm:$0xff]  ;;  %v2299_v49 = vld [vmem:[%s9749_s3 + $0x230] sm:$0xff] }
0x1535   :  { %v7749_v56 = vpack.c.bf16 %v2299_v49, %v2298_v53 }
0x1536   :  { %v3382_v50 = vmul.f32 1.442695, %v3381_v52 }
0x1537   :  { %v3547_v58 = vpop.xlane.xlu0 %3546  ;;  %7750 = vmatprep.subr.bf16.mxu0 %v7749_v56 }
0x1538   :  { %7991 = vpow2.f32 %v3382_v50  ;;  %v3548_v59 = vsub.f32 %v3544_v37, %v3547_v58  ;;  %7752 = vmatpush3.bf16.msra.mxu0 %v7749_v56  ;;  %v2300_v50 = vld [vmem:[%s9749_s3 + $0x238] sm:$0xff]  ;;  %v2301_v58 = vld [vmem:[%s9749_s3 + $0x240] sm:$0xff]  ;;  %v2306_v56 = vld [vmem:[%s9749_s3 + $0x268] sm:$0xff] }
0x1539   :  { %7993 = vpow2.f32 %v3716_v57 }
0x153a   :  { %v3549_v60 = vmul.f32 1.442695, %v3548_v59 }
0x153c   :  { %7995 = vpow2.f32 %v3549_v60 }
0x153d   :  { %7997 = vpow2.f32 %v2867_v10  ;;  %v7753_v10 = vpack.c.bf16 %v2301_v58, %v2300_v50  ;;  %v2308_v58 = vld [vmem:[%s9749_s3 + $0x278] sm:$0xff] }
0x153e   :  { %v7990_v61 = vpop.eup %7989 }
0x153f   :  { %v3217_v63 = vsel %vm589_vm2, %v7990_v61, 0.0  ;;  %7754 = vmatprep.subr.bf16.mxu0 %v7753_v10 }
0x1540   :  { %3218 = vadd.xlane.f32.xlu0 %v3217_v63  ;;  %7756 = vmatpush3.bf16.msra.mxu0 %v7753_v10  ;;  %v2310_v10 = vld [vmem:[%s9749_s3 + $0x288] sm:$0xff] }
0x1542   :  { %v7992_v1 = vpop.eup %7991 }
0x1543   :  { %v3384_v2 = vsel %vm589_vm2, %v7992_v1, 0.0  ;;  %v8858_v4 = vpop.eup %7993 }
0x1544   :  { %3385 = vadd.xlane.f32.xlu1 %v3384_v2  ;;  %v3718_v7 = vsel %vm589_vm2, %v8858_v4, 0.0 }
0x1546   :  { %v7996_v5 = vpop.eup %7995 }
0x1547   :  { %v3551_v8 = vsel %vm589_vm2, %v7996_v5, 0.0  ;;  %v7998_v54 = vpop.eup %7997 }
0x1548   :  { %3719 = vadd.xlane.f32.xlu1 %v3718_v7  ;;  %3552 = vadd.xlane.f32.xlu0 %v3551_v8  ;;  %v2869_v11 = vsel %vm589_vm2, %v7998_v54, 0.0 }
0x154c   :  { %2870 = vadd.xlane.f32.xlu0 %v2869_v11 }
0x1559   :  { %3041 = vrot.lane.b32.xlu1 %v8746_v44, %s8197_s27 }
0x155d   :  { %3222 = vrot.lane.b32.xlu1 %v8744_v42, %s8195_s0 }
0x1561   :  { %3389 = vrot.lane.b32.xlu1 %v8744_v42, %s8198_s28 }
0x1562   :  { %2874 = vrot.lane.b32.xlu0 %v8746_v44, %s8196_s26 }
0x1565   :  { %3723 = vrot.lane.b32.xlu1 %v8744_v42, %s8197_s27 }
0x1566   :  { %3556 = vrot.lane.b32.xlu0 %v8744_v42, %s8196_s26 }
0x156a   :  { %3118 = vrot.lane.b32.xlu0 %v8840_v0, %s8199_s29 }
0x15cd   :  { %v3219_v12 = vpop.xlane.xlu0 %3218 }
0x15d1   :  { %v3386_v27 = vpop.xlane.xlu1 %3385 }
0x15d5   :  { %v3553_v25 = vpop.xlane.xlu0 %3552  ;;  %v3720_v30 = vpop.xlane.xlu1 %3719 }
0x15d9   :  { %v2871_v28 = vpop.xlane.xlu0 %2870  ;;  %v3042_v44 = vpop.permute.xlu1 %3041 }
0x15da   :  { %7999 = vrcp.f32 %v2871_v28 }
0x15db   :  { %8001 = vrcp.f32 %v3038_v23 }
0x15dc   :  { %8003 = vrcp.f32 %v3219_v12 }
0x15dd   :  { %v2875_v32 = vpop.permute.xlu0 %2874  ;;  %8005 = vrcp.f32 %v3386_v27  ;;  %v3223_v0 = vpop.permute.xlu1 %3222 }
0x15de   :  { %7338 = vmatpush3.msra.mxu1 %v2875_v32  ;;  %8007 = vrcp.f32 %v3553_v25 }
0x15df   :  { %7347 = vmatprep.subr.mxu1 %v8185_v14  ;;  %8009 = vrcp.f32 %v3720_v30 }
0x15e1   :  { %v3390_v37 = vpop.permute.xlu1 %3389  ;;  %v3557_v41 = vpop.permute.xlu0 %3556 }
0x15e4   :  { %v8000_v31 = vpop.eup %7999 }
0x15e5   :  { %v2873_v42 = vmul.f32 %v8000_v31, %v7998_v54  ;;  %v8002_v33 = vpop.eup %8001  ;;  %v3724_v3 = vpop.permute.xlu1 %3723 }
0x15e6   :  { %v3040_v35 = vmul.f32 %v8002_v33, %v8847_v22  ;;  %v8004_v36 = vpop.eup %8003  ;;  %v3119_v54 = vpop.permute.xlu0 %3118 }
0x15e7   :  { %7340 = vmatmul.mubr.msk.f32.vlgmr.msra.gmra.mrb[36].mxu1 %vm589_vm2, %v2873_v42  ;;  %v3221_v29 = vmul.f32 %v8004_v36, %v7990_v61  ;;  %v8006_v39 = vpop.eup %8005  ;;  %v3129_v12 = vsel %vm589_vm2, %v8782_v6, %v3119_v54  ;;  %v6767_v6 = vld [vmem:[%s9749_s3 + $0x248] ss:$0 sm:$0xff] }
0x15e8   :  { %7348 = vmatpush3.msra.mxu1 %v3042_v44  ;;  %7349 = vmatprep.mubr.msk.f32.mxu1 %vm8186_vm1, %v8185_v14  ;;  %v3388_v22 = vmul.f32 %v8006_v39, %v7992_v1  ;;  %v8008_v40 = vpop.eup %8007 }
0x15e9   :  { %7357 = vmatprep.subr.mxu1 %v8185_v14  ;;  %v3555_v43 = vmul.f32 %v8008_v40, %v7996_v5  ;;  %v8010_v47 = vpop.eup %8009 }
0x15ea   :  { %v3722_v62 = vmul.f32 %v8010_v47, %v8858_v4 }
0x15eb   :  { %7350 = vmatmul.mubr.msk.f32.vlgmr.msra.gmra.mrb[38].mxu1 %vm589_vm2, %v3040_v35 }
0x15ec   :  { %7358 = vmatpush3.msra.mxu1 %v3223_v0  ;;  %7359 = vmatprep.mubr.msk.f32.mxu1 %vm8186_vm1, %v8185_v14 }
0x15ed   :  { %7367 = vmatprep.subr.mxu1 %v8185_v14 }
0x15ef   :  { %7360 = vmatmul.mubr.msk.f32.vlgmr.msra.gmra.mrb[40].mxu1 %vm589_vm2, %v3221_v29 }
0x15f0   :  { %7368 = vmatpush3.msra.mxu1 %v3390_v37  ;;  %7369 = vmatprep.mubr.msk.f32.mxu1 %vm8186_vm1, %v8185_v14 }
0x15f1   :  { %7377 = vmatprep.subr.mxu1 %v8185_v14 }
0x15f3   :  { %7370 = vmatmul.mubr.msk.f32.vlgmr.msra.gmra.mrb[42].mxu1 %vm589_vm2, %v3388_v22 }
0x15f4   :  { %7378 = vmatpush3.msra.mxu1 %v3557_v41  ;;  %7379 = vmatprep.mubr.msk.f32.mxu1 %vm8186_vm1, %v8185_v14 }
0x15f5   :  { %7387 = vmatprep.subr.mxu1 %v8185_v14 }
0x15f7   :  { %7380 = vmatmul.mubr.msk.f32.vlgmr.msra.gmra.mrb[44].mxu1 %vm589_vm2, %v3555_v43 }
0x15f8   :  { %7388 = vmatpush3.msra.mxu1 %v3724_v3  ;;  %7389 = vmatprep.mubr.msk.f32.mxu1 %vm8186_vm1, %v8185_v14 }
0x15fb   :  { %7390 = vmatmul.mubr.msk.f32.vlgmr.msra.gmra.mrb[46].mxu1 %vm589_vm2, %v3722_v62 }
0x16ba   :  { %v2946_v52 = vpop.f32.mrb[36].mxu1 }
0x16bb   :  { %3122 = vrot.lane.b32.xlu1 %v2946_v52, %s8200_s9  ;;  %v7341_v57 = vpop.f32.mrb[37].mxu1  ;;  %v2305_v52 = vld [vmem:[%s9749_s3 + $0x260] sm:$0xff] }
0x16bc   :  { %v2307_v57 = vld [vmem:[%s9749_s3 + $0x270] sm:$0xff]  ;;  %v7757_v50 = vpack.c.bf16 %v2306_v56, %v2305_v52  ;;  %v6772_v56 = vld [vmem:[%s9749_s3 + $0x280] ss:$0 sm:$0xff] }
0x16be   :  { %v3113_v59 = vpop.f32.mrb[38].mxu1  ;;  %7758 = vmatprep.subr.bf16.mxu1 %v7757_v50 }
0x16bf   :  { %3126 = vrot.lane.b32.xlu1 %v3113_v59, %s8201_s14  ;;  %v7351_v60 = vpop.f32.mrb[39].mxu1  ;;  %v7761_v59 = vpack.c.bf16 %v2308_v58, %v2307_v57  ;;  %7760 = vmatpush3.bf16.msra.mxu1 %v7757_v50 }
0x16c0   :  { %v2311_v60 = vld [vmem:[%s9749_s3 + $0x290] sm:$0xff] }
0x16c1   :  { %7762 = vmatprep.subr.bf16.mxu1 %v7761_v59 }
0x16c2   :  { %v3294_v61 = vpop.f32.mrb[40].mxu1 }
0x16c3   :  { %v7361_v63 = vpop.f32.mrb[41].mxu1  ;;  %7764 = vmatpush3.bf16.msra.mxu1 %v7761_v59 }
0x16c4   :  { %v7765_v63 = vpack.c.bf16 %v2311_v60, %v2310_v10 }
0x16c6   :  { %v3461_v1 = vpop.f32.mrb[42].mxu1  ;;  %7766 = vmatprep.subr.bf16.mxu0 %v7765_v63 }
0x16c7   :  { %3800 = vrot.lane.b32.xlu0 %v3461_v1, %s8199_s29  ;;  %v7371_v2 = vpop.f32.mrb[43].mxu1  ;;  %v2313_v1 = vld [vmem:[%s9749_s3 + $0x2a0] sm:$0xff] }
0x16ca   :  { %v3628_v4 = vpop.f32.mrb[44].mxu1 }
0x16cb   :  { %3804 = vrot.lane.b32.xlu0 %v3628_v4, %s8200_s9  ;;  %v7381_v5 = vpop.f32.mrb[45].mxu1  ;;  %v2314_v4 = vld [vmem:[%s9749_s3 + $0x2a8] sm:$0xff] }
0x16cc   :  { %v2315_v5 = vld [vmem:[%s9749_s3 + $0x2b0] sm:$0xff] }
0x16ce   :  { %v3795_v7 = vpop.f32.mrb[46].mxu1 }
0x16cf   :  { %3808 = vrot.lane.b32.xlu1 %v3795_v7, %s8201_s14  ;;  %v7391_v8 = vpop.f32.mrb[47].mxu1  ;;  %v7773_v7 = vpack.c.bf16 %v2315_v5, %v2314_v4 }
0x172d   :  { %v3123_v11 = vpop.permute.xlu1 %3122 }
0x172e   :  { %v3130_v23 = vsel %vm206_vm13, %v3129_v12, %v3123_v11 }
0x1731   :  { %v3127_v25 = vpop.permute.xlu1 %3126 }
0x1732   :  { %v3131_v27 = vsel %vm1268_vm4, %v3130_v23, %v3127_v25 }
0x1733   :  { %7400 = vmatprep.mubr.msk.f32.mxu0 %vm461_vm15, %v3131_v27 }
0x1739   :  { %v3801_v28 = vpop.permute.xlu0 %3800 }
0x173a   :  { %v3811_v32 = vsel %vm589_vm2, %v3294_v61, %v3801_v28  ;;  %v2312_v61 = vld [vmem:[%s9749_s3 + $0x298] sm:$0xff]  ;;  %v6770_v28 = vld [vmem:[%s9749_s3 + $0x250] ss:$0 sm:$0xff] }
0x173b   :  { %v7769_v2 = vpack.c.bf16 %v2313_v1, %v2312_v61 }
0x173d   :  { %v3805_v30 = vpop.permute.xlu0 %3804 }
0x173e   :  { %v3812_v44 = vsel %vm206_vm13, %v3811_v32, %v3805_v30  ;;  %v6771_v32 = vld [vmem:[%s9749_s3 + $0x258] ss:$0 sm:$0xff] }
0x1741   :  { %v3809_v31 = vpop.permute.xlu1 %3808 }
0x1742   :  { %v3813_v42 = vsel %vm1268_vm4, %v3812_v44, %v3809_v31 }
0x1743   :  { %7401 = vmatmul.mubr.msk.f32.vlgmr.msra.gmra.mrb[34].mxu0 %vm461_vm15, %v3813_v42 }
0x1744   :  { %7768 = vmatpush3.bf16.msra.mxu0 %v7765_v63 }
0x1745   :  { %7770 = vmatprep.subr.bf16.mxu0 %v7769_v2 }
0x1748   :  { %7772 = vmatpush3.bf16.msra.mxu0 %v7769_v2 }
0x1749   :  { %7774 = vmatprep.subr.bf16.mxu0 %v7773_v7 }
0x174c   :  { %7776 = vmatpush3.bf16.msra.mxu0 %v7773_v7 }
0x1816   :  { %v7402_v33 = vpop.f32.mrb[34].mxu0 }
0x1817   :  { %v3896_v0 = vadd.f32 %v7402_v33, %v6767_v6  ;;  %v3890_v35 = vpop.f32.mrb[35].mxu0 }
0x1818   :  { %v3891_v36 = vadd.f32 %v6767_v6, %v3890_v35  ;;  %v2316_v35 = vld [vmem:[%s9749_s3 + $0x2b8] sm:$0xff] }
0x1819   :  { %v8931_v29 = vadd.f32 %v3896_v0, %v8705_v34 }
0x181a   :  { %v8934_v39 = vadd.f32 %v3891_v36, %v8708_v45  ;;  %v2317_v36 = vld [vmem:[%s9749_s3 + $0x2c0] sm:$0xff] }
0x181b   :  { %v3904_v37 = vsel %vm461_vm15, %v8931_v29, 0.0 }
0x181c   :  { %3905 = vadd.xlane.f32.xlu1 %v3904_v37  ;;  %v3901_v22 = vsel %vm461_vm15, %v8934_v39, 0.0  ;;  %v7777_v37 = vpack.c.bf16 %v2317_v36, %v2316_v35 }
0x181d   :  { %3902 = vadd.xlane.f32.xlu0 %v3901_v22  ;;  %v2318_v22 = vld [vmem:[%s9749_s3 + $0x2c8] sm:$0xff] }
0x181e   :  { %7778 = vmatprep.subr.bf16.mxu0 %v7777_v37 }
0x181f   :  { %7780 = vmatpush3.bf16.msra.mxu0 %v7777_v37 }
0x18a9   :  { %v3906_v40 = vpop.xlane.xlu1 %3905 }
0x18aa   :  { %v3908_v41 = vmul.f32 0.03125, %v3906_v40  ;;  %v3903_v43 = vpop.xlane.xlu0 %3902  ;;  %v2319_v40 = vld [vmem:[%s9749_s3 + $0x2d0] sm:$0xff] }
0x18ab   :  { %v3907_v47 = vmul.f32 0.03125, %v3903_v43  ;;  %v2320_v43 = vld [vmem:[%s9749_s3 + $0x2d8] sm:$0xff] }
0x18ac   :  { %v3910_v3 = vsub.f32 %v8931_v29, %v3908_v41  ;;  %v7781_v41 = vpack.c.bf16 %v2319_v40, %v2318_v22  ;;  %v4146_v22 = vld [vmem:[%s9749_s3 + $0x68] sm:$0xff] }
0x18ad   :  { %v3909_v34 = vsub.f32 %v8934_v39, %v3907_v47  ;;  %v2321_v47 = vld [vmem:[%s9749_s3 + $0x2e0] sm:$0xff] }
0x18ae   :  { %v3912_v53 = vmul.f32 %v3910_v3, %v3910_v3  ;;  %7782 = vmatprep.subr.bf16.mxu0 %v7781_v41 }
0x18af   :  { %v3911_v62 = vmul.f32 %v3909_v34, %v3909_v34  ;;  %7784 = vmatpush3.bf16.msra.mxu0 %v7781_v41  ;;  %v4147_v41 = vld [vmem:[%s9749_s3 + $0x70] sm:$0xff] }
0x18b0   :  { %v3916_v49 = vsel %vm461_vm15, %v3912_v53, 0.0  ;;  %v2324_v53 = vld [vmem:[%s9749_s3 + $0x2f8] sm:$0xff] }
0x18b1   :  { %v3913_v45 = vsel %vm461_vm15, %v3911_v62, 0.0  ;;  %v2323_v62 = vld [vmem:[%s9749_s3 + $0x2f0] sm:$0xff] }
0x18b2   :  { %3914 = vadd.xlane.f32.xlu0 %v3913_v45 }
0x18b6   :  { %3917 = vadd.xlane.f32.xlu0 %v3916_v49  ;;  %v2325_v49 = vld [vmem:[%s9749_s3 + $0x300] sm:$0xff] }
0x18b7   :  { %v7793_v52 = vpack.c.bf16 %v2325_v49, %v2324_v53 }
0x193f   :  { %v3915_v8 = vpop.xlane.xlu0 %3914 }
0x1940   :  { %v3919_v54 = vmul.f32 0.03125, %v3915_v8 }
0x1942   :  { %v3921_v11 = vadd.f32 1e-05, %v3919_v54  ;;  %v6775_v54 = vld [vmem:[%s9749_s3 + $0x308] ss:$0 sm:$0xff] }
0x1943   :  { %v3918_v12 = vpop.xlane.xlu0 %3917 }
0x1944   :  { %8011 = vrsqrt.f32 %v3921_v11  ;;  %v3920_v23 = vmul.f32 0.03125, %v3918_v12 }
0x1946   :  { %v3922_v25 = vadd.f32 1e-05, %v3920_v23 }
0x1948   :  { %8013 = vrsqrt.f32 %v3922_v25 }
0x194e   :  { %v8012_v27 = vpop.eup %8011 }
0x194f   :  { %v3925_v30 = vmul.f32 %v8012_v27, %v3909_v34  ;;  %v2322_v34 = vld [vmem:[%s9749_s3 + $0x2e8] sm:$0xff] }
0x1950   :  { %v7789_v45 = vpack.c.bf16 %v2323_v62, %v2322_v34 }
0x1951   :  { %v3931_v44 = vmul.f32 %v6770_v28, %v3925_v30 }
0x1952   :  { %v8014_v31 = vpop.eup %8013 }
0x1953   :  { %v3926_v42 = vmul.f32 %v8014_v31, %v3910_v3  ;;  %v3937_v6 = vadd.f32 %v6771_v32, %v3931_v44  ;;  %v7785_v3 = vpack.c.bf16 %v2321_v47, %v2320_v43  ;;  %v4148_v43 = vld [vmem:[%s9749_s3 + $0x78] sm:$0xff] }
0x1954   :  { %v7801_v47 = vpack.c.bf16 %v4148_v43, %v4147_v41 }
0x1955   :  { %v3932_v33 = vmul.f32 %v6770_v28, %v3926_v42  ;;  %7411 = vmatprep.mubr.msk.f32.mxu1 %vm461_vm15, %v3937_v6  ;;  %7786 = vmatprep.subr.bf16.mxu0 %v7785_v3 }
0x1956   :  { %7788 = vmatpush3.bf16.msra.mxu0 %v7785_v3 }
0x1957   :  { %v3938_v0 = vadd.f32 %v6771_v32, %v3932_v33  ;;  %7790 = vmatprep.subr.bf16.mxu0 %v7789_v45 }
0x1959   :  { %7412 = vmatmul.mubr.msk.f32.vlgmr.msra.gmra.mrb[48].mxu1 %vm461_vm15, %v3938_v0 }
0x195a   :  { %7792 = vmatpush3.bf16.msra.mxu0 %v7789_v45 }
0x195b   :  { %7794 = vmatprep.subr.bf16.mxu0 %v7793_v52 }
0x195e   :  { %7796 = vmatpush3.bf16.msra.mxu0 %v7793_v52 }
0x195f   :  { %7813 = vmatprep.subr.bf16.mxu0 %v8184_v13 }
0x1a2c   :  { %v7413_v57 = vpop.f32.mrb[48].mxu1 }
0x1a2d   :  { %v4021_v50 = vadd.f32 %v7413_v57, %v6772_v56  ;;  %v4015_v58 = vpop.f32.mrb[49].mxu1 }
0x1a2e   :  { %v4016_v59 = vadd.f32 %v6772_v56, %v4015_v58 }
0x1a2f   :  { %v4027_v10 = vmul.f32 0.70710677, %v4021_v50  ;;  %v4025_v5 = vmul.f32 0.5, %v4021_v50 }
0x1a30   :  { %v4026_v60 = vmul.f32 0.70710677, %v4016_v59  ;;  %v4024_v2 = vmul.f32 0.5, %v4016_v59 }
0x1a31   :  { %8015 = verf.f32 %v4027_v10 }
0x1a32   :  { %8017 = verf.f32 %v4026_v60  ;;  %v6776_v60 = vld [vmem:[%s9749_s3 + $0x80] ss:$0 sm:$0xff] }
0x1a3b   :  { %v8016_v61 = vpop.eup %8015 }
0x1a3c   :  { %v8018_v63 = vpop.eup %8017  ;;  %v4031_v1 = vadd.f32 1.0, %v8016_v61 }
0x1a3d   :  { %v4030_v4 = vadd.f32 1.0, %v8018_v63 }
0x1a3e   :  { %v4033_v8 = vmul.f32 %v4031_v1, %v4025_v5 }
0x1a3f   :  { %v4032_v7 = vmul.f32 %v4030_v4, %v4024_v2 }
0x1a41   :  { %7446 = vmatprep.mubr.f32.mxu0 %v4032_v7 }
0x1a42   :  { %7447 = vmatmul.mubr.f32.vlgmr.msra.gmra.mrb[36].mxu0 %v4033_v8  ;;  %v144_v8 = vshrl.u32 %v141_v15, 7 }
0x1a43   :  { %7504 = vmatprep.mubr.msk.f32.mxu0 %vm8186_vm1, %v8185_v14 }
0x1a44   :  { %vm153_vm10 = vcmp.eq.s32.totalorder %v144_v8, %v8281_v17  ;;  %vm166_vm11 = vcmp.eq.s32.totalorder %v144_v8, %v8283_v18  ;;  %vm179_vm3 = vcmp.eq.s32.totalorder %v144_v8, %v8289_v19 }
0x1b15   :  { %v7448_v11 = vpop.f32.mrb[36].mxu0 }
0x1b16   :  { %v4110_v12 = vadd.f32 %v7448_v11, %v6775_v54  ;;  %v4104_v23 = vpop.f32.mrb[37].mxu0 }
0x1b17   :  { %v4105_v25 = vadd.f32 %v6775_v54, %v4104_v23  ;;  %v145_v54 = vadd.s32 8, %v144_v8  ;;  %v6666_v23 = vsel %vm153_vm10, 1.0, %v8185_v14  ;;  %vm192_vm10 = vcmp.eq.s32.totalorder %v144_v8, %v8299_v24 }
0x1b18   :  { %v4114_v27 = vadd.f32 %v4110_v12, %v8931_v29 }
0x1b19   :  { %v4113_v28 = vadd.f32 %v4105_v25, %v8934_v39  ;;  %v4145_v39 = vld [vmem:[%s9749_s3 + $0x60] sm:$0xff]  ;;  %vm154_vm8 = vcmp.eq.s32.totalorder %v145_v54, %v8281_v17  ;;  %vm167_vm9 = vcmp.eq.s32.totalorder %v145_v54, %v8283_v18  ;;  %vm180_vm12 = vcmp.eq.s32.totalorder %v145_v54, %v8289_v19 }
0x1b1a   :  { %v4118_v30 = vsel %vm461_vm15, %v4114_v27, 0.0  ;;  %v7797_v40 = vpack.c.bf16 %v4146_v22, %v4145_v39  ;;  %v6667_v11 = vsel %vm154_vm8, 1.0, %v8185_v14  ;;  %v6671_v12 = vsel %vm167_vm9, 1.0, %v8185_v14  ;;  %v4236_v39 = vld [vmem:[%s9749_s3 + $0x98] sm:$0xff]  ;;  %v4237_v22 = vld [vmem:[%s9749_s3 + $0xa0] sm:$0x1] }
0x1b1b   :  { %4119 = vadd.xlane.f32.xlu1 %v4118_v30  ;;  %v4115_v32 = vsel %vm461_vm15, %v4113_v28, 0.0  ;;  %v6670_v25 = vsel %vm166_vm11, 1.0, %v8185_v14  ;;  %vm294_vm14 = vcmp.eq.s32.totalorder %v145_v54, %v8291_v20  ;;  %v173_v15 = vadd.f32 %v6671_v12, %v6667_v11 }
0x1b1c   :  { %4116 = vadd.xlane.f32.xlu0 %v4115_v32  ;;  %7798 = vmatprep.subr.bf16.mxu1 %v7797_v40  ;;  %vm193_vm8 = vcmp.eq.s32.totalorder %v145_v54, %v8299_v24  ;;  %v6675_v17 = vsel %vm180_vm12, 1.0, %v8185_v14  ;;  %v172_v18 = vadd.f32 %v6670_v25, %v6666_v23  ;;  %v6674_v30 = vsel %vm179_vm3, 1.0, %v8185_v14  ;;  %vm9259_vm3 = vmpackc.low %vm589_vm2, %vm589_vm2 }
0x1b1d   :  { %7800 = vmatpush3.bf16.msra.mxu1 %v7797_v40  ;;  %vm320_vm9 = vcmp.eq.s32.totalorder %v145_v54, %v8304_v26  ;;  %vm319_vm11 = vcmp.eq.s32.totalorder %v144_v8, %v8304_v26  ;;  %vm333_vm12 = vcmp.eq.s32.totalorder %v145_v54, %v8324_v38 }
0x1b1e   :  { %7802 = vmatprep.subr.bf16.mxu1 %v7801_v47  ;;  %v6696_v26 = vsel %vm333_vm12, 1.0, %v8185_v14 }
0x1b21   :  { %7804 = vmatpush3.bf16.msra.mxu1 %v7801_v47 }
0x1ba8   :  { %v4120_v44 = vpop.xlane.xlu1 %4119 }
0x1ba9   :  { %v4122_v31 = vmul.f32 0.03125, %v4120_v44  ;;  %v4117_v42 = vpop.xlane.xlu0 %4116  ;;  %v6679_v44 = vsel %vm193_vm8, 1.0, %v8185_v14 }
0x1baa   :  { %v4121_v6 = vmul.f32 0.03125, %v4117_v42  ;;  %v6692_v42 = vsel %vm320_vm9, 1.0, %v8185_v14 }
0x1bab   :  { %v4124_v33 = vsub.f32 %v4114_v27, %v4122_v31  ;;  %v6684_v27 = vsel %vm294_vm14, 1.0, %v8185_v14  ;;  %v185_v31 = vadd.f32 %v6674_v30, %v172_v18  ;;  %vm332_vm14 = vcmp.eq.s32.totalorder %v144_v8, %v8324_v38  ;;  %v6779_v38 = vld [vmem:[%s9749_s3 + $0x88] ss:$0 sm:$0xff] }
0x1bac   :  { %v4123_v0 = vsub.f32 %v4113_v28, %v4121_v6 }
0x1bad   :  { %v4126_v35 = vmul.f32 %v4124_v33, %v4124_v33 }
0x1bae   :  { %v4125_v36 = vmul.f32 %v4123_v0, %v4123_v0 }
0x1baf   :  { %v4130_v37 = vsel %vm461_vm15, %v4126_v35, 0.0 }
0x1bb0   :  { %4131 = vadd.xlane.f32.xlu1 %v4130_v37  ;;  %v4127_v29 = vsel %vm461_vm15, %v4125_v36, 0.0 }
0x1bb1   :  { %4128 = vadd.xlane.f32.xlu0 %v4127_v29  ;;  %v6695_v29 = vsel %vm332_vm14, 1.0, %v8185_v14 }
0x1bde   :  { %4248 = vxpose.xlu0.b32.start.end [1/1] (short) (narrow) %v8333_v51, 16 }
0x1be3   :  { %4395 = vxpose.xlu1.b32.start.end [1/1] (short) (narrow) %v8343_v55, 16 }
0x1c3d   :  { %v4132_v3 = vpop.xlane.xlu1 %4131 }
0x1c3e   :  { %v4134_v34 = vmul.f32 0.03125, %v4132_v3  ;;  %v4129_v62 = vpop.xlane.xlu0 %4128  ;;  %v4235_v3 = vld [vmem:[%s9749_s3 + $0x90] sm:$0xff] }
0x1c3f   :  { %v4133_v45 = vmul.f32 0.03125, %v4129_v62  ;;  %v4374_v62 = vrot.slane %v4237_v22, 1 }
0x1c40   :  { %v4136_v53 = vadd.f32 1e-05, %v4134_v34  ;;  %v4372_v34 = vrot.slane %v4236_v39, 1 }
0x1c41   :  { %v4135_v49 = vadd.f32 1e-05, %v4133_v45  ;;  %v4371_v45 = vrot.slane %v4235_v3, 1 }
0x1c42   :  { %8019 = vrsqrt.f32 %v4136_v53 }
0x1c43   :  { %8021 = vrsqrt.f32 %v4135_v49 }
0x1c4c   :  { %v8020_v52 = vpop.eup %8019 }
0x1c4d   :  { %v8022_v56 = vpop.eup %8021  ;;  %v4140_v57 = vmul.f32 %v8020_v52, %v4124_v33  ;;  %v6678_v33 = vsel %vm192_vm10, 1.0, %v8185_v14 }
0x1c4e   :  { %v4139_v50 = vmul.f32 %v8022_v56, %v4123_v0  ;;  %v6691_v0 = vsel %vm319_vm11, 1.0, %v8185_v14  ;;  %v198_v36 = vadd.f32 %v6678_v33, %v185_v31 }
0x1c4f   :  { %v4142_v58 = vmul.f32 %v8695_v46, %v4140_v57 }
0x1c50   :  { %v4141_v59 = vmul.f32 %v8695_v46, %v4139_v50  ;;  %v9104_v43 = vsub.f32 1.0, %v198_v36 }
0x1c51   :  { %v4144_v55 = vadd.f32 %v8700_v48, %v4142_v58 }
0x1c52   :  { %v4143_v51 = vadd.f32 %v8700_v48, %v4141_v59  ;;  %v4246_v52 = vmul.f32 %v6779_v38, %v9104_v43 }
0x1c54   :  { %7457 = vmatprep.mubr.msk.f32.mxu1 %vm461_vm15, %v4143_v51 }
0x1c55   :  { %7458 = vmatmul.mubr.msk.f32.vlgmr.msra.gmra.mrb[50].mxu1 %vm461_vm15, %v4144_v55  ;;  %vm307_vm15 = vcmp.eq.s32.totalorder %v145_v54, %v8293_v21 }
0x1c56   :  { %v6688_v28 = vsel %vm307_vm15, 1.0, %v8185_v14  ;;  %vm4370_vm15 = vcmask 1046528  }
0x1c57   :  { %v313_v32 = vadd.f32 %v6688_v28, %v6684_v27  ;;  %v4375_v50 = vsel %vm4370_vm15, %v4372_v34, %v4374_v62  ;;  %v4373_v51 = vsel %vm4370_vm15, %v4371_v45, %v4372_v34 }
0x1c59   :  { %v326_v24 = vadd.f32 %v6692_v42, %v313_v32 }
0x1c5b   :  { %v339_v41 = vadd.f32 %v6696_v26, %v326_v24 }
0x1c5d   :  { %v9110_v49 = vsub.f32 1.0, %v339_v41 }
0x1c5e   :  { %v4264_v10 = vpop.trf.xlu0 }
0x1c5f   :  { %7462 = vmatprep.mubr.msk.f32.mxu1 %vm4282_vm6, %v4264_v10  ;;  %v4394_v55 = vmul.f32 %v6779_v38, %v9110_v49 }
0x1c62   :  { %v4265_v4 = vpop.trf.xlu0 }
0x1c63   :  { %v4411_v48 = vpop.trf.xlu1 }
0x1c67   :  { %v4412_v7 = vpop.trf.xlu1 }
0x1d28   :  { %v7459_v61 = vpop.f32.mrb[50].mxu1 }
0x1d29   :  { %v4226_v63 = vpop.f32.mrb[51].mxu1  ;;  %v9051_v1 = vadd.f32 %v7459_v61, %v6776_v60 }
0x1d2a   :  { %v9053_v46 = vadd.f32 %v6776_v60, %v4226_v63 }
0x1d2b   :  { %v4428_v5 = vrot.slane %v9051_v1, 1  ;;  %v4390_v27 = vadd.f32 %v4235_v3, %v9051_v1 }
0x1d2c   :  { %v4281_v2 = vrot.slane %v9053_v46, 1 }
0x1d2e   :  { %7460 = vmatprep.subr.msk.mxu1 %vm4289_vm7, %v4281_v2 }
0x1d2f   :  { %7461 = vmatpush3.msk.msra.mxu1 %vm4289_vm7, %v4281_v2 }
0x1d30   :  { %7463 = vmatmul.mubr.msk.f32.vlgmr.msra.gmra.mrb[52].mxu1 %vm4282_vm6, %v4265_v4  ;;  %7465 = vmatprep.subr.msk.mxu1 %vm4289_vm7, %v4428_v5 }
0x1d31   :  { %7466 = vmatpush3.msk.msra.mxu1 %vm4289_vm7, %v4428_v5  ;;  %7467 = vmatprep.mubr.msk.f32.mxu1 %vm4282_vm6, %v4411_v48  ;;  %vm306_vm7 = vcmp.eq.s32.totalorder %v144_v8, %v8293_v21  ;;  %v186_v21 = vadd.f32 %v6675_v17, %v173_v15 }
0x1d33   :  { %v199_v35 = vadd.f32 %v6679_v44, %v186_v21 }
0x1d34   :  { %7468 = vmatmul.mubr.msk.f32.vlgmr.msra.gmra.mrb[54].mxu1 %vm4282_vm6, %v4412_v7  ;;  %vm293_vm6 = vcmp.eq.s32.totalorder %v144_v8, %v8291_v20  ;;  %v6687_v20 = vsel %vm306_vm7, 1.0, %v8185_v14  ;;  %v4239_v7 = vadd.f32 %v4235_v3, %v9053_v46 }
0x1d35   :  { %v6683_v19 = vsel %vm293_vm6, 1.0, %v8185_v14  ;;  %v9099_v40 = vsub.f32 1.0, %v199_v35  ;;  %vm4524_vm6 = vcmp.lt.s32.totalorder %v8279_v16, 17 }
0x1d36   :  { %v312_v6 = vadd.f32 %v6687_v20, %v6683_v19 }
0x1d37   :  { %v4247_v53 = vmul.f32 %v6779_v38, %v9099_v40 }
0x1d38   :  { %v325_v37 = vadd.f32 %v6691_v0, %v312_v6 }
0x1d3a   :  { %v338_v47 = vadd.f32 %v6695_v29, %v325_v37 }
0x1d3c   :  { %v9113_v56 = vsub.f32 1.0, %v338_v47 }
0x1d3e   :  { %v4393_v60 = vmul.f32 %v6779_v38, %v9113_v56 }
0x1e03   :  { %v7464_v57 = vpop.f32.mrb[52].mxu1 }
0x1e04   :  { %v4364_v58 = vadd.f32 %v7464_v57, %v4247_v53  ;;  %v4358_v59 = vpop.f32.mrb[53].mxu1 }
0x1e05   :  { %v4359_v10 = vadd.f32 %v4358_v59, %v4246_v52 }
0x1e06   :  { %v4379_v61 = vadd.f32 %v4375_v50, %v4364_v58 }
0x1e07   :  { %v4378_v63 = vadd.f32 %v4373_v51, %v4359_v10  ;;  %v7469_v48 = vpop.f32.mrb[54].mxu1 }
0x1e08   :  { %v4383_v2 = vrot.slane %v4379_v61, 7  ;;  %v4509_v4 = vadd.f32 %v7469_v48, %v4394_v55  ;;  %v4503_v5 = vpop.f32.mrb[55].mxu1  ;;  %v4528_v61 = vld [vmem:[%s9749_s3 + $0x320] sm:$0xff] }
0x1e09   :  { %v4382_v8 = vrot.slane %v4378_v63, 7  ;;  %v4504_v54 = vadd.f32 %v4503_v5, %v4393_v60  ;;  %v4529_v63 = vld [vmem:[%s9749_s3 + $0x328] sm:$0xff] }
0x1e0a   :  { %v4513_v11 = vadd.f32 %v4509_v4, %v4375_v50  ;;  %v9132_v28 = vsel %vm200_vm5, %v4383_v2, 0.0  ;;  %v7805_v48 = vpack.c.bf16 %v4529_v63, %v4528_v61 }
0x1e0b   :  { %v4512_v12 = vadd.f32 %v4504_v54, %v4373_v51  ;;  %v9121_v23 = vsel %vm200_vm5, %v4239_v7, %v4382_v8  ;;  %v9124_v25 = vsel %vm200_vm5, %v4382_v8, %v4383_v2  ;;  %v4554_v21 = vsel %vm206_vm13, %v9132_v28, 0.0 }
0x1e0c   :  { %v4517_v15 = vrot.slane %v4513_v11, 7  ;;  %v4548_v17 = vsel %vm206_vm13, %v9121_v23, 0.0  ;;  %v4551_v18 = vsel %vm206_vm13, %v9124_v25, 0.0  ;;  %7806 = vmatprep.subr.bf16.mxu1 %v7805_v48 }
0x1e0d   :  { %v4516_v46 = vrot.slane %v4512_v12, 7  ;;  %4549 = vadd.xlane.f32.xlu0 %v4548_v17  ;;  %4552 = vadd.xlane.f32.xlu1 %v4551_v18 }
0x1e0e   :  { %v9141_v20 = vsel %vm200_vm5, %v4517_v15, 0.0  ;;  %7808 = vmatpush3.bf16.msra.mxu1 %v7805_v48 }
0x1e0f   :  { %v9135_v30 = vsel %vm200_vm5, %v4390_v27, %v4516_v46  ;;  %v9138_v19 = vsel %vm200_vm5, %v4516_v46, %v4517_v15  ;;  %v4563_v44 = vsel %vm206_vm13, %v9141_v20, 0.0  ;;  %7809 = vmatprep.subr.bf16.mxu1 %v8184_v13 }
0x1e10   :  { %v4557_v1 = vsel %vm206_vm13, %v9135_v30, 0.0  ;;  %v4560_v32 = vsel %vm206_vm13, %v9138_v19, 0.0 }
0x1e11   :  { %4555 = vadd.xlane.f32.xlu0 %v4554_v21  ;;  %4558 = vadd.xlane.f32.xlu1 %v4557_v1 }
0x1e15   :  { %4561 = vadd.xlane.f32.xlu0 %v4560_v32  ;;  %4564 = vadd.xlane.f32.xlu1 %v4563_v44 }
0x1e9a   :  { %v4550_v31 = vpop.xlane.xlu0 %4549  ;;  %v4553_v42 = vpop.xlane.xlu1 %4552 }
0x1e9b   :  { %v4567_v6 = vmul.f32 0.0625, %v4550_v31  ;;  %v4568_v33 = vmul.f32 0.0625, %v4553_v42 }
0x1e9d   :  { %v9152_v0 = vsub.f32 %v9121_v23, %v4567_v6  ;;  %v9155_v35 = vsub.f32 %v9124_v25, %v4568_v33  ;;  %v6786_v6 = vld [vmem:[%s9749_s3 + $0x310] ss:$0 sm:$0xff] }
0x1e9e   :  { %v4556_v24 = vpop.xlane.xlu0 %4555  ;;  %v4559_v36 = vpop.xlane.xlu1 %4558 }
0x1e9f   :  { %v4569_v26 = vmul.f32 0.0625, %v4556_v24  ;;  %v4570_v37 = vmul.f32 0.0625, %v4559_v36  ;;  %v4579_v29 = vmul.f32 %v9152_v0, %v9152_v0  ;;  %v4580_v39 = vmul.f32 %v9155_v35, %v9155_v35 }
0x1ea1   :  { %v9162_v22 = vsub.f32 %v9132_v28, %v4569_v26  ;;  %v9165_v41 = vsub.f32 %v9135_v30, %v4570_v37  ;;  %v4585_v38 = vsel %vm206_vm13, %v4579_v29, 0.0  ;;  %v4588_v47 = vsel %vm206_vm13, %v4580_v39, 0.0  ;;  %v6787_v26 = vld [vmem:[%s9749_s3 + $0x318] ss:$0 sm:$0xff] }
0x1ea2   :  { %4586 = vadd.xlane.f32.xlu0 %v4585_v38  ;;  %v4562_v3 = vpop.xlane.xlu0 %4561  ;;  %4589 = vadd.xlane.f32.xlu1 %v4588_v47  ;;  %v4565_v34 = vpop.xlane.xlu1 %4564 }
0x1ea3   :  { %v4571_v62 = vmul.f32 0.0625, %v4562_v3  ;;  %v4572_v45 = vmul.f32 0.0625, %v4565_v34  ;;  %v4581_v53 = vmul.f32 %v9162_v22, %v9162_v22  ;;  %v4582_v52 = vmul.f32 %v9165_v41, %v9165_v41 }
0x1ea5   :  { %v9174_v57 = vsub.f32 %v9138_v19, %v4571_v62  ;;  %v9177_v50 = vsub.f32 %v9141_v20, %v4572_v45  ;;  %v4591_v58 = vsel %vm206_vm13, %v4581_v53, 0.0  ;;  %v4594_v59 = vsel %vm206_vm13, %v4582_v52, 0.0 }
0x1ea6   :  { %4592 = vadd.xlane.f32.xlu0 %v4591_v58  ;;  %4595 = vadd.xlane.f32.xlu1 %v4594_v59 }
0x1ea7   :  { %v4583_v51 = vmul.f32 %v9174_v57, %v9174_v57  ;;  %v4584_v55 = vmul.f32 %v9177_v50, %v9177_v50 }
0x1ea9   :  { %v4597_v10 = vsel %vm206_vm13, %v4583_v51, 0.0  ;;  %v4600_v60 = vsel %vm206_vm13, %v4584_v55, 0.0 }
0x1eaa   :  { %4598 = vadd.xlane.f32.xlu0 %v4597_v10  ;;  %4601 = vadd.xlane.f32.xlu1 %v4600_v60 }
0x1f2f   :  { %v4587_v2 = vpop.xlane.xlu0 %4586  ;;  %v4590_v4 = vpop.xlane.xlu1 %4589 }
0x1f30   :  { %v4603_v5 = vmul.f32 0.0625, %v4587_v2  ;;  %v4604_v7 = vmul.f32 0.0625, %v4590_v4 }
0x1f32   :  { %v4609_v8 = vadd.f32 1e-05, %v4603_v5  ;;  %v4610_v54 = vadd.f32 1e-05, %v4604_v7 }
0x1f33   :  { %v4593_v11 = vpop.xlane.xlu0 %4592  ;;  %v4596_v12 = vpop.xlane.xlu1 %4595 }
0x1f34   :  { %8023 = vrsqrt.f32 %v4609_v8  ;;  %v4605_v15 = vmul.f32 0.0625, %v4593_v11  ;;  %v4606_v17 = vmul.f32 0.0625, %v4596_v12 }
0x1f35   :  { %8025 = vrsqrt.f32 %v4610_v54 }
0x1f36   :  { %v4611_v18 = vadd.f32 1e-05, %v4605_v15  ;;  %v4612_v27 = vadd.f32 1e-05, %v4606_v17 }
0x1f37   :  { %v4599_v46 = vpop.xlane.xlu0 %4598  ;;  %v4602_v21 = vpop.xlane.xlu1 %4601 }
0x1f38   :  { %8027 = vrsqrt.f32 %v4611_v18  ;;  %v4607_v1 = vmul.f32 0.0625, %v4599_v46  ;;  %v4608_v32 = vmul.f32 0.0625, %v4602_v21 }
0x1f39   :  { %8029 = vrsqrt.f32 %v4612_v27 }
0x1f3a   :  { %v4613_v44 = vadd.f32 1e-05, %v4607_v1  ;;  %v4614_v31 = vadd.f32 1e-05, %v4608_v32 }
0x1f3c   :  { %8031 = vrsqrt.f32 %v4613_v44 }
0x1f3d   :  { %8033 = vrsqrt.f32 %v4614_v31 }
0x1f3e   :  { %v8024_v42 = vpop.eup %8023 }
0x1f3f   :  { %v8026_v33 = vpop.eup %8025  ;;  %v4621_v24 = vmul.f32 %v8024_v42, %v9152_v0 }
0x1f40   :  { %v4622_v36 = vmul.f32 %v8026_v33, %v9155_v35 }
0x1f41   :  { %v4631_v37 = vmul.f32 %v6786_v6, %v4621_v24 }
0x1f42   :  { %v8028_v29 = vpop.eup %8027  ;;  %v4632_v39 = vmul.f32 %v6786_v6, %v4622_v36 }
0x1f43   :  { %v8030_v38 = vpop.eup %8029  ;;  %v4641_v47 = vadd.f32 %v6787_v26, %v4631_v37  ;;  %v4623_v3 = vmul.f32 %v8028_v29, %v9162_v22 }
0x1f44   :  { %v4642_v34 = vadd.f32 %v6787_v26, %v4632_v39  ;;  %v4624_v62 = vmul.f32 %v8030_v38, %v9165_v41 }
0x1f45   :  { %7474 = vmatprep.mubr.msk.f32.mxu1 %vm206_vm13, %v4641_v47  ;;  %v4633_v45 = vmul.f32 %v6786_v6, %v4623_v3 }
0x1f46   :  { %v8032_v0 = vpop.eup %8031  ;;  %7475 = vmatmul.mubr.msk.f32.vlgmr.msra.gmra.mrb[56].mxu1 %vm206_vm13, %v4642_v34  ;;  %v4634_v35 = vmul.f32 %v6786_v6, %v4624_v62 }
0x1f47   :  { %v8034_v53 = vpop.eup %8033  ;;  %v4643_v52 = vadd.f32 %v6787_v26, %v4633_v45  ;;  %v4625_v58 = vmul.f32 %v8032_v0, %v9174_v57  ;;  %v6788_v57 = vld [vmem:[%s9749_s3 + $0x330] ss:$0 sm:$0xff] }
0x1f48   :  { %v4644_v59 = vadd.f32 %v6787_v26, %v4634_v35  ;;  %v4626_v51 = vmul.f32 %v8034_v53, %v9177_v50 }
0x1f49   :  { %7477 = vmatprep.mubr.msk.f32.mxu1 %vm206_vm13, %v4643_v52  ;;  %v4635_v22 = vmul.f32 %v6786_v6, %v4625_v58  ;;  %v9322_v52 = vsel %vm4524_vm6, 0.0, %v8194_v9 }
0x1f4a   :  { %7478 = vmatmul.mubr.msk.f32.gmra.mrb[58].mxu1 %vm206_vm13, %v4644_v59  ;;  %v4636_v41 = vmul.f32 %v6786_v6, %v4626_v51 }
0x1f4b   :  { %v4645_v55 = vadd.f32 %v6787_v26, %v4635_v22 }
0x1f4c   :  { %v4646_v10 = vadd.f32 %v6787_v26, %v4636_v41 }
0x1f4d   :  { %7480 = vmatprep.mubr.msk.f32.mxu1 %vm206_vm13, %v4645_v55 }
0x1f4e   :  { %7481 = vmatmul.mubr.msk.f32.gmra.mrb[60].mxu1 %vm206_vm13, %v4646_v10 }
0x1f4f   :  { %7489 = vmatprep.mubr.msk.f32.mxu1 %vm8186_vm1, %v8185_v14 }
0x2019   :  { %v7476_v50 = vpop.f32.mrb[56].mxu1 }
0x201a   :  { %v4741_v60 = vadd.f32 %v7476_v50, %v6788_v57  ;;  %v4735_v61 = vpop.f32.mrb[57].mxu1 }
0x201b   :  { %v4736_v63 = vadd.f32 %v6788_v57, %v4735_v61 }
0x201d   :  { %v7479_v48 = vpop.f32.mrb[58].mxu1  ;;  %v9217_v2 = vpack.i.bf16 %v4741_v60, %v4736_v63 }
0x201e   :  { %v4745_v4 = vpop.f32.mrb[59].mxu1  ;;  %v9225_v54 = vadd.f32 %v7479_v48, %v6788_v57 }
0x201f   :  { %v9219_v5 = vadd.f32 %v6788_v57, %v4745_v4  ;;  %7888 = vrot.lane.b32.xlu0 %v9217_v2, %s8190_s22 }
0x2021   :  { %4771 = vrot.lane.b32.xlu1 %v9219_v5, %s8190_s22  ;;  %v7482_v7 = vpop.f32.mrb[60].mxu1 }
0x2022   :  { %v4755_v8 = vpop.f32.mrb[61].mxu1  ;;  %v9240_v15 = vadd.f32 %v7482_v7, %v6788_v57 }
0x2023   :  { %v9227_v11 = vadd.f32 %v6788_v57, %v4755_v8 }
0x2025   :  { %7893 = vrot.lane.b32.xlu1 %v9217_v2, %s8192_s24  ;;  %v9233_v12 = vpack.i.bf16 %v9227_v11, %v9225_v54 }
0x2027   :  { %7898 = vrot.lane.b32.xlu0 %v9233_v12, %s8190_s22 }
0x2029   :  { %5012 = vrot.lane.b32.xlu1 %v9219_v5, %s8192_s24 }
0x202b   :  { %5004 = vrot.lane.b32.xlu0 %v4741_v60, %s8189_s21 }
0x202d   :  { %5002 = vrot.lane.b32.xlu1 %v4736_v63, %s8189_s21 }
0x202f   :  { %5265 = vrot.lane.b32.xlu0 %v9240_v15, %s8190_s22 }
0x2031   :  { %5006 = vrot.lane.b32.xlu1 %v9219_v5, %s8189_s21 }
0x2033   :  { %5506 = vrot.lane.b32.xlu0 %v9240_v15, %s8192_s24 }
0x2035   :  { %7903 = vrot.lane.b32.xlu1 %v9233_v12, %s8192_s24 }
0x2037   :  { %5498 = vrot.lane.b32.xlu0 %v9227_v11, %s8189_s21 }
0x2039   :  { %5496 = vrot.lane.b32.xlu1 %v9225_v54, %s8189_s21 }
0x203d   :  { %5500 = vrot.lane.b32.xlu1 %v9240_v15, %s8189_s21 }
0x2091   :  { %v7889_v17 = vpop.permute.xlu0 %7888 }
0x2092   :  { %v7891_v18 = vunpack.i.h.bf16 %v7889_v17  ;;  %v7890_v27 = vunpack.i.l.bf16 %v7889_v17 }
0x2093   :  { %v4772_v46 = vpop.permute.xlu1 %4771 }
0x2094   :  { %v7810_v1 = vpack.c.bf16 %v7891_v18, %v7890_v27 }
0x2096   :  { %7812 = vmatpush3.bf16.xpose.msk.msra.mxu1 %vm9259_vm3, %v7810_v1 }
0x2097   :  { %7487 = vmatprep.subr.mxu1 %v8185_v14  ;;  %v7894_v32 = vpop.permute.xlu1 %7893 }
0x2098   :  { %v7896_v44 = vunpack.i.h.bf16 %v7894_v32  ;;  %v7895_v31 = vunpack.i.l.bf16 %v7894_v32 }
0x2099   :  { %v7899_v33 = vpop.permute.xlu0 %7898 }
0x209a   :  { %v7817_v6 = vpack.c.bf16 %v7896_v44, %v7895_v31  ;;  %v7901_v36 = vunpack.i.h.bf16 %v7899_v33  ;;  %v7900_v26 = vunpack.i.l.bf16 %v7899_v33 }
0x209b   :  { %v5013_v42 = vpop.permute.xlu1 %5012 }
0x209c   :  { %v7824_v29 = vpack.c.bf16 %v7901_v36, %v7900_v26 }
0x209d   :  { %v5005_v39 = vpop.permute.xlu0 %5004 }
0x209e   :  { %7488 = vmatpush3.xpose.msk.msra.mxu1 %vm589_vm2, %v4772_v46 }
0x209f   :  { %7816 = vmatprep.subr.bf16.mxu1 %v8184_v13  ;;  %v5003_v24 = vpop.permute.xlu1 %5002 }
0x20a1   :  { %7490 = vmatmul.mubr.msk.f32.vlgmr.msra.gmra.mrb[62].mxu1 %vm589_vm2, %v4736_v63  ;;  %v5266_v34 = vpop.permute.xlu0 %5265 }
0x20a2   :  { %7819 = vmatpush3.bf16.xpose.msk.msra.mxu1 %vm9259_vm3, %v7817_v6  ;;  %7492 = vmatprep.mubr.msk.f32.mxu1 %vm8186_vm1, %v8185_v14 }
0x20a3   :  { %7517 = vmatprep.subr.mxu1 %v8185_v14  ;;  %v5007_v37 = vpop.permute.xlu1 %5006 }
0x20a5   :  { %7493 = vmatmul.mubr.msk.f32.gmra.mrb[64].mxu1 %vm589_vm2, %v4741_v60  ;;  %v5507_v45 = vpop.permute.xlu0 %5506 }
0x20a6   :  { %7495 = vmatprep.mubr.msk.f32.mxu1 %vm8186_vm1, %v8185_v14 }
0x20a7   :  { %v7904_v38 = vpop.permute.xlu1 %7903 }
0x20a8   :  { %v7906_v47 = vunpack.i.h.bf16 %v7904_v38  ;;  %v7905_v3 = vunpack.i.l.bf16 %v7904_v38 }
0x20a9   :  { %7496 = vmatmul.mubr.msk.f32.gmra.mrb[66].mxu1 %vm589_vm2, %v9219_v5  ;;  %v5499_v35 = vpop.permute.xlu0 %5498 }
0x20aa   :  { %7518 = vmatpush3.xpose.msk.msra.mxu1 %vm589_vm2, %v5013_v42  ;;  %7519 = vmatprep.mubr.msk.f32.mxu1 %vm8186_vm1, %v8185_v14  ;;  %v7831_v62 = vpack.c.bf16 %v7906_v47, %v7905_v3 }
0x20ab   :  { %7823 = vmatprep.subr.bf16.mxu1 %v8184_v13  ;;  %v5497_v0 = vpop.permute.xlu1 %5496 }
0x20ad   :  { %7520 = vmatmul.mubr.msk.f32.vlgmr.msra.gmra.mrb[68].mxu1 %vm589_vm2, %v5003_v24 }
0x20ae   :  { %7826 = vmatpush3.bf16.xpose.msk.msra.mxu1 %vm9259_vm3, %v7824_v29  ;;  %7522 = vmatprep.mubr.msk.f32.mxu1 %vm8186_vm1, %v8185_v14 }
0x20af   :  { %7547 = vmatprep.subr.mxu1 %v8185_v14  ;;  %v5501_v53 = vpop.permute.xlu1 %5500 }
0x20b1   :  { %7523 = vmatmul.mubr.msk.f32.gmra.mrb[70].mxu1 %vm589_vm2, %v5005_v39 }
0x20b2   :  { %7525 = vmatprep.mubr.msk.f32.mxu1 %vm8186_vm1, %v8185_v14 }
0x20b5   :  { %7526 = vmatmul.mubr.msk.f32.gmra.mrb[72].mxu1 %vm589_vm2, %v5007_v37 }
0x20b6   :  { %7548 = vmatpush3.xpose.msk.msra.mxu1 %vm589_vm2, %v5266_v34  ;;  %7549 = vmatprep.mubr.msk.f32.mxu1 %vm8186_vm1, %v8185_v14 }
0x20b7   :  { %7830 = vmatprep.subr.bf16.mxu1 %v8184_v13 }
0x20b9   :  { %7550 = vmatmul.mubr.msk.f32.vlgmr.msra.gmra.mrb[74].mxu1 %vm589_vm2, %v9225_v54 }
0x20ba   :  { %7833 = vmatpush3.bf16.xpose.msk.msra.mxu1 %vm9259_vm3, %v7831_v62  ;;  %7552 = vmatprep.mubr.msk.f32.mxu1 %vm8186_vm1, %v8185_v14 }
0x20bb   :  { %7577 = vmatprep.subr.mxu1 %v8185_v14 }
0x20bd   :  { %7553 = vmatmul.mubr.msk.f32.gmra.mrb[76].mxu1 %vm589_vm2, %v9227_v11 }
0x20be   :  { %7555 = vmatprep.mubr.msk.f32.mxu1 %vm8186_vm1, %v8185_v14 }
0x20c1   :  { %7556 = vmatmul.mubr.msk.f32.gmra.mrb[78].mxu1 %vm589_vm2, %v9240_v15 }
0x20c2   :  { %7578 = vmatpush3.xpose.msk.msra.mxu1 %vm589_vm2, %v5507_v45  ;;  %7579 = vmatprep.mubr.msk.f32.mxu1 %vm8186_vm1, %v8185_v14 }
0x20c5   :  { %7580 = vmatmul.mubr.msk.f32.vlgmr.msra.gmra.mrb[80].mxu1 %vm589_vm2, %v5497_v0 }
0x20c6   :  { %7582 = vmatprep.mubr.msk.f32.mxu1 %vm8186_vm1, %v8185_v14 }
0x20c9   :  { %7583 = vmatmul.mubr.msk.f32.gmra.mrb[82].mxu1 %vm589_vm2, %v5499_v35 }
0x20ca   :  { %7585 = vmatprep.mubr.msk.f32.mxu1 %vm8186_vm1, %v8185_v14 }
0x20cd   :  { %7586 = vmatmul.mubr.msk.f32.gmra.mrb[84].mxu1 %vm589_vm2, %v5501_v53 }
0x2174   :  { %v4851_v58 = vpop.f32.mrb[62].mxu1 }
0x2175   :  { %v4865_v59 = vmul.f32 0.35355338, %v4851_v58  ;;  %v7491_v51 = vpop.f32.mrb[63].mxu1 }
0x2177   :  { %v9325_v22 = vadd.f32 %v4865_v59, %v9322_v52 }
0x2178   :  { %v4856_v41 = vpop.f32.mrb[64].mxu1 }
0x2179   :  { %v4866_v55 = vmul.f32 0.35355338, %v4856_v41  ;;  %v7494_v10 = vpop.f32.mrb[65].mxu1  ;;  %v4871_v57 = vsel %vm1268_vm4, %v9325_v22, -inf }
0x217a   :  { %4872 = vmax.xlane.f32.xlu0 %v4871_v57 }
0x217b   :  { %v9330_v50 = vadd.f32 %v4866_v55, %v9322_v52 }
0x217c   :  { %v4861_v16 = vpop.f32.mrb[66].mxu1 }
0x217d   :  { %v4867_v60 = vmul.f32 0.35355338, %v4861_v16  ;;  %v7497_v9 = vpop.f32.mrb[67].mxu1  ;;  %v4874_v61 = vsel %vm1268_vm4, %v9330_v50, -inf }
0x217e   :  { %4875 = vmax.xlane.f32.xlu1 %v4874_v61 }
0x217f   :  { %v9335_v63 = vadd.f32 %v4867_v60, %v9322_v52 }
0x2180   :  { %v5092_v48 = vpop.f32.mrb[68].mxu1 }
0x2181   :  { %v5106_v4 = vmul.f32 0.35355338, %v5092_v48  ;;  %v7521_v7 = vpop.f32.mrb[69].mxu1  ;;  %v4877_v8 = vsel %vm1268_vm4, %v9335_v63, -inf }
0x2182   :  { %4878 = vmax.xlane.f32.xlu0 %v4877_v8 }
0x2183   :  { %v9340_v54 = vadd.f32 %v5106_v4, %v9322_v52 }
0x2184   :  { %v5097_v11 = vpop.f32.mrb[70].mxu1 }
0x2185   :  { %v5107_v17 = vmul.f32 0.35355338, %v5097_v11  ;;  %v7524_v18 = vpop.f32.mrb[71].mxu1  ;;  %v5112_v27 = vsel %vm1268_vm4, %v9340_v54, -inf }
0x2186   :  { %5113 = vmax.xlane.f32.xlu0 %v5112_v27 }
0x2187   :  { %v9345_v46 = vadd.f32 %v5107_v17, %v9322_v52 }
0x2188   :  { %v5102_v21 = vpop.f32.mrb[72].mxu1 }
0x2189   :  { %v5108_v1 = vmul.f32 0.35355338, %v5102_v21  ;;  %v7527_v32 = vpop.f32.mrb[73].mxu1  ;;  %v5115_v44 = vsel %vm1268_vm4, %v9345_v46, -inf }
0x218a   :  { %5116 = vmax.xlane.f32.xlu0 %v5115_v44 }
0x218b   :  { %v9350_v31 = vadd.f32 %v5108_v1, %v9322_v52 }
0x218c   :  { %v5345_v42 = vpop.f32.mrb[74].mxu1 }
0x218d   :  { %v5359_v6 = vmul.f32 0.35355338, %v5345_v42  ;;  %v7551_v33 = vpop.f32.mrb[75].mxu1  ;;  %v5118_v24 = vsel %vm1268_vm4, %v9350_v31, -inf }
0x218e   :  { %5119 = vmax.xlane.f32.xlu1 %v5118_v24 }
0x218f   :  { %v9355_v36 = vadd.f32 %v5359_v6, %v9322_v52 }
0x2190   :  { %v5350_v26 = vpop.f32.mrb[76].mxu1 }
0x2191   :  { %v5360_v37 = vmul.f32 0.35355338, %v5350_v26  ;;  %v7554_v29 = vpop.f32.mrb[77].mxu1  ;;  %v5365_v39 = vsel %vm1268_vm4, %v9355_v36, -inf }
0x2192   :  { %5366 = vmax.xlane.f32.xlu0 %v5365_v39 }
0x2193   :  { %v9360_v38 = vadd.f32 %v5360_v37, %v9322_v52 }
0x2194   :  { %v5355_v47 = vpop.f32.mrb[78].mxu1 }
0x2195   :  { %v5361_v3 = vmul.f32 0.35355338, %v5355_v47  ;;  %v7557_v34 = vpop.f32.mrb[79].mxu1  ;;  %v5368_v62 = vsel %vm1268_vm4, %v9360_v38, -inf }
0x2196   :  { %5369 = vmax.xlane.f32.xlu1 %v5368_v62 }
0x2197   :  { %v9365_v45 = vadd.f32 %v5361_v3, %v9322_v52 }
0x2198   :  { %v5586_v0 = vpop.f32.mrb[80].mxu1 }
0x2199   :  { %v5600_v35 = vmul.f32 0.35355338, %v5586_v0  ;;  %v7581_v53 = vpop.f32.mrb[81].mxu1  ;;  %v5371_v58 = vsel %vm1268_vm4, %v9365_v45, -inf }
0x219a   :  { %5372 = vmax.xlane.f32.xlu0 %v5371_v58 }
0x219b   :  { %v9370_v59 = vadd.f32 %v5600_v35, %v9322_v52 }
0x219c   :  { %v5591_v51 = vpop.f32.mrb[82].mxu1 }
0x219d   :  { %v5601_v41 = vmul.f32 0.35355338, %v5591_v51  ;;  %v7584_v55 = vpop.f32.mrb[83].mxu1  ;;  %v5606_v10 = vsel %vm1268_vm4, %v9370_v59, -inf }
0x219e   :  { %5607 = vmax.xlane.f32.xlu1 %v5606_v10 }
0x219f   :  { %v9375_v57 = vadd.f32 %v5601_v41, %v9322_v52 }
0x21a0   :  { %v5596_v16 = vpop.f32.mrb[84].mxu1 }
0x21a1   :  { %v5602_v60 = vmul.f32 0.35355338, %v5596_v16  ;;  %v7587_v9 = vpop.f32.mrb[85].mxu1  ;;  %v5609_v61 = vsel %vm1268_vm4, %v9375_v57, -inf }
0x21a2   :  { %5610 = vmax.xlane.f32.xlu0 %v5609_v61 }
0x21a3   :  { %v9380_v48 = vadd.f32 %v5602_v60, %v9322_v52 }
0x21a5   :  { %v5612_v4 = vsel %vm1268_vm4, %v9380_v48, -inf }
0x21a6   :  { %5613 = vmax.xlane.f32.xlu1 %v5612_v4 }
0x21b7   :  { %7908 = vrot.lane.b32.xlu1 %v9217_v2, %s8188_s20 }
0x21b8   :  { %4908 = vrot.lane.b32.xlu0 %v9219_v5, %s8188_s20 }
0x21bc   :  { %7913 = vrot.lane.b32.xlu0 %v9217_v2, %s8187_s1 }
0x2207   :  { %v4873_v7 = vpop.xlane.xlu0 %4872 }
0x2208   :  { %v4880_v8 = vsub.f32 %v9325_v22, %v4873_v7 }
0x220a   :  { %v4883_v11 = vmul.f32 1.442695, %v4880_v8 }
0x220b   :  { %v4876_v17 = vpop.xlane.xlu1 %4875 }
0x220c   :  { %8035 = vpow2.f32 %v4883_v11  ;;  %v4881_v52 = vsub.f32 %v9330_v50, %v4876_v17 }
0x220e   :  { %v4885_v18 = vmul.f32 1.442695, %v4881_v52 }
0x220f   :  { %v4879_v27 = vpop.xlane.xlu0 %4878 }
0x2210   :  { %8037 = vpow2.f32 %v4885_v18  ;;  %v4882_v21 = vsub.f32 %v9335_v63, %v4879_v27 }
0x2212   :  { %v4887_v1 = vmul.f32 1.442695, %v4882_v21 }
0x2213   :  { %v5114_v32 = vpop.xlane.xlu0 %5113 }
0x2214   :  { %8039 = vpow2.f32 %v4887_v1  ;;  %v5121_v44 = vsub.f32 %v9340_v54, %v5114_v32 }
0x2216   :  { %v9394_v42 = vpop.eup %8035  ;;  %v5124_v2 = vmul.f32 1.442695, %v5121_v44 }
0x2217   :  { %v5117_v6 = vpop.xlane.xlu0 %5116  ;;  %v4889_v22 = vsel %vm1268_vm4, %v9394_v42, 0.0 }
0x2218   :  { %8041 = vpow2.f32 %v5124_v2  ;;  %v5122_v50 = vsub.f32 %v9345_v46, %v5117_v6  ;;  %4890 = vadd.xlane.f32.xlu0 %v4889_v22 }
0x221a   :  { %v9399_v33 = vpop.eup %8037  ;;  %v5126_v24 = vmul.f32 1.442695, %v5122_v50 }
0x221b   :  { %v5120_v63 = vpop.xlane.xlu1 %5119  ;;  %v4892_v26 = vsel %vm1268_vm4, %v9399_v33, 0.0 }
0x221c   :  { %8043 = vpow2.f32 %v5126_v24  ;;  %v5123_v54 = vsub.f32 %v9350_v31, %v5120_v63  ;;  %4893 = vadd.xlane.f32.xlu1 %v4892_v26 }
0x221e   :  { %v9404_v37 = vpop.eup %8039  ;;  %v5128_v29 = vmul.f32 1.442695, %v5123_v54 }
0x221f   :  { %v5367_v39 = vpop.xlane.xlu0 %5366  ;;  %v4895_v47 = vsel %vm1268_vm4, %v9404_v37, 0.0 }
0x2220   :  { %8045 = vpow2.f32 %v5128_v29  ;;  %v5374_v46 = vsub.f32 %v9355_v36, %v5367_v39  ;;  %4896 = vadd.xlane.f32.xlu0 %v4895_v47 }
0x2222   :  { %v9409_v3 = vpop.eup %8041  ;;  %v5377_v34 = vmul.f32 1.442695, %v5374_v46 }
0x2223   :  { %v5370_v62 = vpop.xlane.xlu1 %5369  ;;  %v5130_v0 = vsel %vm1268_vm4, %v9409_v3, 0.0 }
0x2224   :  { %8047 = vpow2.f32 %v5377_v34  ;;  %v5375_v31 = vsub.f32 %v9360_v38, %v5370_v62  ;;  %5131 = vadd.xlane.f32.xlu1 %v5130_v0 }
0x2226   :  { %v9414_v35 = vpop.eup %8043  ;;  %v5379_v53 = vmul.f32 1.442695, %v5375_v31 }
0x2227   :  { %v5373_v58 = vpop.xlane.xlu0 %5372  ;;  %v5133_v51 = vsel %vm1268_vm4, %v9414_v35, 0.0 }
0x2228   :  { %8049 = vpow2.f32 %v5379_v53  ;;  %v5376_v36 = vsub.f32 %v9365_v45, %v5373_v58  ;;  %5134 = vadd.xlane.f32.xlu0 %v5133_v51 }
0x222a   :  { %v9419_v41 = vpop.eup %8045  ;;  %v5381_v55 = vmul.f32 1.442695, %v5376_v36 }
0x222b   :  { %v5608_v10 = vpop.xlane.xlu1 %5607  ;;  %v5136_v16 = vsel %vm1268_vm4, %v9419_v41, 0.0 }
0x222c   :  { %8051 = vpow2.f32 %v5381_v55  ;;  %v5615_v38 = vsub.f32 %v9370_v59, %v5608_v10  ;;  %5137 = vadd.xlane.f32.xlu0 %v5136_v16 }
0x222e   :  { %v9424_v60 = vpop.eup %8047  ;;  %v5618_v9 = vmul.f32 1.442695, %v5615_v38 }
0x222f   :  { %v5383_v61 = vsel %vm1268_vm4, %v9424_v60, 0.0  ;;  %v5611_v27 = vpop.xlane.xlu0 %5610 }
0x2230   :  { %8053 = vpow2.f32 %v5618_v9  ;;  %5384 = vadd.xlane.f32.xlu0 %v5383_v61  ;;  %v5616_v44 = vsub.f32 %v9375_v57, %v5611_v27 }
0x2232   :  { %v9428_v45 = vpop.eup %8049  ;;  %v5620_v2 = vmul.f32 1.442695, %v5616_v44 }
0x2233   :  { %v5614_v4 = vpop.xlane.xlu1 %5613  ;;  %v5386_v7 = vsel %vm1268_vm4, %v9428_v45, 0.0  ;;  %v4909_v32 = vpop.permute.xlu0 %4908 }
0x2234   :  { %5387 = vadd.xlane.f32.xlu1 %v5386_v7  ;;  %v5617_v6 = vsub.f32 %v9380_v48, %v5614_v4  ;;  %8055 = vpow2.f32 %v5620_v2 }
0x2236   :  { %v9432_v8 = vpop.eup %8051  ;;  %v5622_v22 = vmul.f32 1.442695, %v5617_v6 }
0x2237   :  { %v7909_v11 = vpop.permute.xlu1 %7908  ;;  %v5389_v59 = vsel %vm1268_vm4, %v9432_v8, 0.0  ;;  %v7914_v57 = vpop.permute.xlu0 %7913 }
0x2238   :  { %v7911_v17 = vunpack.i.h.bf16 %v7909_v11  ;;  %5390 = vadd.xlane.f32.xlu0 %v5389_v59  ;;  %v7910_v52 = vunpack.i.l.bf16 %v7909_v11  ;;  %8057 = vpow2.f32 %v5622_v22  ;;  %v7916_v29 = vunpack.i.h.bf16 %v7914_v57 }
0x2239   :  { %v7915_v39 = vunpack.i.l.bf16 %v7914_v57 }
0x223a   :  { %v9436_v18 = vpop.eup %8053  ;;  %v7814_v21 = vpack.c.bf16 %v7911_v17, %v7910_v52 }
0x223b   :  { %v5624_v1 = vsel %vm1268_vm4, %v9436_v18, 0.0  ;;  %v7821_v34 = vpack.c.bf16 %v7916_v29, %v7915_v39 }
0x223c   :  { %5625 = vadd.xlane.f32.xlu1 %v5624_v1  ;;  %7815 = vmatpush3.bf16.msra.mxu0 %v7814_v21 }
0x223d   :  { %7502 = vmatprep.subr.mxu0 %v8185_v14 }
0x223e   :  { %v9448_v50 = vpop.eup %8055 }
0x223f   :  { %v5627_v24 = vsel %vm1268_vm4, %v9448_v50, 0.0 }
0x2240   :  { %7503 = vmatpush3.msra.mxu0 %v4909_v32 }
0x2241   :  { %7820 = vmatprep.subr.bf16.mxu0 %v8184_v13 }
0x2242   :  { %v9452_v63 = vpop.eup %8057 }
0x224d   :  { %5149 = vrot.lane.b32.xlu1 %v9219_v5, %s8187_s1  ;;  %v5630_v5 = vsel %vm1268_vm4, %v9452_v63, 0.0 }
0x224e   :  { %7918 = vrot.lane.b32.xlu0 %v9233_v12, %s8188_s20 }
0x226d   :  { %5628 = vadd.xlane.f32.xlu0 %v5627_v24 }
0x2271   :  { %5631 = vadd.xlane.f32.xlu1 %v5630_v5 }
0x2283   :  { %5402 = vrot.lane.b32.xlu0 %v9240_v15, %s8188_s20 }
0x2287   :  { %7923 = vrot.lane.b32.xlu0 %v9233_v12, %s8187_s1 }
0x228b   :  { %5643 = vrot.lane.b32.xlu0 %v9240_v15, %s8187_s1 }
0x22a5   :  { %v4891_v48 = vpop.xlane.xlu0 %4890 }
0x22a6   :  { %8059 = vrcp.f32 %v4891_v48 }
0x22a9   :  { %v4894_v26 = vpop.xlane.xlu1 %4893 }
0x22aa   :  { %8061 = vrcp.f32 %v4894_v26 }
0x22ad   :  { %v4897_v54 = vpop.xlane.xlu0 %4896 }
0x22ae   :  { %8063 = vrcp.f32 %v4897_v54 }
0x22b0   :  { %v8060_v47 = vpop.eup %8059 }
0x22b1   :  { %v4901_v46 = vmul.f32 %v8060_v47, %v9394_v42  ;;  %v5132_v53 = vpop.xlane.xlu1 %5131  ;;  %v4532_v47 = vld [vmem:[%s9749_s3 + $0x340] sm:$0xff] }
0x22b2   :  { %8065 = vrcp.f32 %v5132_v53 }
0x22b3   :  { %7505 = vmatmul.mubr.msk.f32.vlgmr.msra.gmra.mrb[38].mxu0 %vm1268_vm4, %v4901_v46 }
0x22b4   :  { %v8062_v62 = vpop.eup %8061  ;;  %7822 = vmatpush3.bf16.msra.mxu0 %v7821_v34  ;;  %7507 = vmatprep.mubr.msk.f32.mxu0 %vm8186_vm1, %v8185_v14 }
0x22b5   :  { %v5135_v12 = vpop.xlane.xlu0 %5134  ;;  %v4902_v15 = vmul.f32 %v8062_v62, %v9399_v33  ;;  %7532 = vmatprep.subr.mxu0 %v8185_v14 }
0x22b6   :  { %8067 = vrcp.f32 %v5135_v12 }
0x22b7   :  { %7508 = vmatmul.mubr.msk.f32.gmra.mrb[40].mxu0 %vm1268_vm4, %v4902_v15 }
0x22b8   :  { %v8064_v0 = vpop.eup %8063  ;;  %7510 = vmatprep.mubr.msk.f32.mxu0 %vm8186_vm1, %v8185_v14 }
0x22b9   :  { %v4903_v42 = vmul.f32 %v8064_v0, %v9404_v37  ;;  %v5138_v31 = vpop.xlane.xlu0 %5137 }
0x22ba   :  { %8069 = vrcp.f32 %v5138_v31 }
0x22bb   :  { %7511 = vmatmul.mubr.msk.f32.gmra.mrb[42].mxu0 %vm1268_vm4, %v4903_v42 }
0x22bc   :  { %7534 = vmatprep.mubr.msk.f32.mxu0 %vm8186_vm1, %v8185_v14  ;;  %v8066_v10 = vpop.eup %8065 }
0x22bd   :  { %v5385_v58 = vpop.xlane.xlu0 %5384  ;;  %v5142_v37 = vmul.f32 %v8066_v10, %v9409_v3 }
0x22be   :  { %8071 = vrcp.f32 %v5385_v58 }
0x22c0   :  { %v8068_v61 = vpop.eup %8067 }
0x22c1   :  { %v5388_v33 = vpop.xlane.xlu1 %5387  ;;  %v5143_v7 = vmul.f32 %v8068_v61, %v9414_v35 }
0x22c2   :  { %8073 = vrcp.f32 %v5388_v33 }
0x22c4   :  { %v8070_v11 = vpop.eup %8069 }
0x22c5   :  { %v5391_v51 = vpop.xlane.xlu0 %5390  ;;  %v5144_v3 = vmul.f32 %v8070_v11, %v9419_v41 }
0x22c6   :  { %8075 = vrcp.f32 %v5391_v51 }
0x22c8   :  { %v8072_v35 = vpop.eup %8071 }
0x22c9   :  { %v7919_v36 = vpop.permute.xlu0 %7918  ;;  %v5626_v55 = vpop.xlane.xlu1 %5625  ;;  %v5395_v17 = vmul.f32 %v8072_v35, %v9424_v60 }
0x22ca   :  { %v7921_v16 = vunpack.i.h.bf16 %v7919_v36  ;;  %v7920_v38 = vunpack.i.l.bf16 %v7919_v36  ;;  %8077 = vrcp.f32 %v5626_v55 }
0x22cc   :  { %v7828_v4 = vpack.c.bf16 %v7921_v16, %v7920_v38  ;;  %v8074_v27 = vpop.eup %8073 }
0x22cd   :  { %v5150_v9 = vpop.permute.xlu1 %5149  ;;  %v5396_v1 = vmul.f32 %v8074_v27, %v9428_v45 }
0x22ce   :  { %7533 = vmatpush3.msra.mxu0 %v5150_v9 }
0x22cf   :  { %7535 = vmatmul.mubr.msk.f32.vlgmr.msra.gmra.mrb[44].mxu0 %vm1268_vm4, %v5142_v37  ;;  %7827 = vmatprep.subr.bf16.mxu0 %v8184_v13 }
0x22d0   :  { %7829 = vmatpush3.bf16.msra.mxu0 %v7828_v4  ;;  %7537 = vmatprep.mubr.msk.f32.mxu0 %vm8186_vm1, %v8185_v14  ;;  %v8076_v32 = vpop.eup %8075 }
0x22d1   :  { %7562 = vmatprep.subr.mxu0 %v8185_v14 }
0x22d3   :  { %7538 = vmatmul.mubr.msk.f32.gmra.mrb[46].mxu0 %vm1268_vm4, %v5143_v7 }
0x22d4   :  { %7540 = vmatprep.mubr.msk.f32.mxu0 %vm8186_vm1, %v8185_v14  ;;  %v8078_v6 = vpop.eup %8077 }
0x22d5   :  { %v5636_v45 = vmul.f32 %v8078_v6, %v9436_v18 }
0x22d7   :  { %7541 = vmatmul.mubr.msk.f32.gmra.mrb[48].mxu0 %vm1268_vm4, %v5144_v3 }
0x22d8   :  { %7564 = vmatprep.mubr.msk.f32.mxu0 %vm8186_vm1, %v8185_v14 }
0x22fa   :  { %v5629_v59 = vpop.xlane.xlu0 %5628 }
0x22fb   :  { %8079 = vrcp.f32 %v5629_v59 }
0x22fe   :  { %v5403_v52 = vpop.permute.xlu0 %5402  ;;  %v5632_v41 = vpop.xlane.xlu1 %5631 }
0x22ff   :  { %7563 = vmatpush3.msra.mxu0 %v5403_v52  ;;  %8081 = vrcp.f32 %v5632_v41  ;;  %v6831_v41 = vld [vmem:[%s9749_s3 + $0x348] ss:$0 sm:$0xff] }
0x2300   :  { %7565 = vmatmul.mubr.msk.f32.vlgmr.msra.gmra.mrb[50].mxu0 %vm1268_vm4, %v5395_v17  ;;  %7834 = vmatprep.subr.bf16.mxu0 %v8184_v13  ;;  %v5397_v13 = vmul.f32 %v8076_v32, %v9432_v8 }
0x2301   :  { %7567 = vmatprep.mubr.msk.f32.mxu0 %vm8186_vm1, %v8185_v14 }
0x2302   :  { %v7924_v21 = vpop.permute.xlu0 %7923 }
0x2303   :  { %v7926_v44 = vunpack.i.h.bf16 %v7924_v21  ;;  %v7925_v2 = vunpack.i.l.bf16 %v7924_v21 }
0x2304   :  { %7568 = vmatmul.mubr.msk.f32.gmra.mrb[52].mxu0 %vm1268_vm4, %v5396_v1 }
0x2305   :  { %v7835_v60 = vpack.c.bf16 %v7926_v44, %v7925_v2  ;;  %7570 = vmatprep.mubr.msk.f32.mxu0 %vm8186_vm1, %v8185_v14  ;;  %v8080_v24 = vpop.eup %8079 }
0x2306   :  { %v5644_v22 = vpop.permute.xlu0 %5643  ;;  %v5637_v8 = vmul.f32 %v8080_v24, %v9448_v50  ;;  %v4531_v50 = vld [vmem:[%s9749_s3 + $0x338] sm:$0xff] }
0x2307   :  { %7836 = vmatpush3.bf16.msra.mxu0 %v7835_v60  ;;  %v7837_v46 = vpack.c.bf16 %v4532_v47, %v4531_v50 }
0x2308   :  { %7571 = vmatmul.mubr.msk.f32.gmra.mrb[54].mxu0 %vm1268_vm4, %v5397_v13  ;;  %7592 = vmatprep.subr.mxu0 %v8185_v14 }
0x2309   :  { %7594 = vmatprep.mubr.msk.f32.mxu0 %vm8186_vm1, %v8185_v14  ;;  %v8082_v5 = vpop.eup %8081  ;;  %7838 = vmatprep.subr.bf16.mxu1 %v7837_v46 }
0x230a   :  { %v5638_v57 = vmul.f32 %v8082_v5, %v9452_v63  ;;  %7840 = vmatpush3.bf16.msra.mxu1 %v7837_v46 }
0x230b   :  { %7593 = vmatpush3.msra.mxu0 %v5644_v22 }
0x230c   :  { %7595 = vmatmul.mubr.msk.f32.vlgmr.msra.gmra.mrb[56].mxu0 %vm1268_vm4, %v5636_v45 }
0x230d   :  { %7597 = vmatprep.mubr.msk.f32.mxu0 %vm8186_vm1, %v8185_v14 }
0x2310   :  { %7598 = vmatmul.mubr.msk.f32.gmra.mrb[58].mxu0 %vm1268_vm4, %v5637_v8 }
0x2311   :  { %7600 = vmatprep.mubr.msk.f32.mxu0 %vm8186_vm1, %v8185_v14  ;;  %vm6124_vm1 = vcmask 523264  }
0x2314   :  { %7601 = vmatmul.mubr.msk.f32.gmra.mrb[60].mxu0 %vm1268_vm4, %v5638_v57 }
0x2386   :  { %v4988_v18 = vpop.f32.mrb[38].mxu0 }
0x2387   :  { %v7506_v48 = vpop.f32.mrb[39].mxu0 }
0x238a   :  { %v4993_v26 = vpop.f32.mrb[40].mxu0 }
0x238b   :  { %v7509_v54 = vpop.f32.mrb[41].mxu0 }
0x238e   :  { %v4998_v29 = vpop.f32.mrb[42].mxu0 }
0x238f   :  { %v7512_v39 = vpop.f32.mrb[43].mxu0 }
0x23a2   :  { %v5229_v14 = vpop.f32.mrb[44].mxu0 }
0x23a3   :  { %5246 = vrot.lane.b32.xlu0 %v5229_v14, %s8199_s29  ;;  %v7536_v63 = vpop.f32.mrb[45].mxu0 }
0x23a6   :  { %v5234_v34 = vpop.f32.mrb[46].mxu0 }
0x23a7   :  { %5248 = vrot.lane.b32.xlu1 %v5234_v34, %s8199_s29  ;;  %v7539_v62 = vpop.f32.mrb[47].mxu0 }
0x23aa   :  { %v5239_v12 = vpop.f32.mrb[48].mxu0 }
0x23ab   :  { %5250 = vrot.lane.b32.xlu0 %v5239_v12, %s8199_s29  ;;  %v7542_v15 = vpop.f32.mrb[49].mxu0 }
0x23ac   :  { %v4536_v15 = vld [vmem:[%s9749_s3 + $0x360] sm:$0xff] }
0x23d3   :  { %v5482_v0 = vpop.f32.mrb[50].mxu0 }
0x23d4   :  { %v7566_v42 = vpop.f32.mrb[51].mxu0 }
0x23d7   :  { %v5487_v31 = vpop.f32.mrb[52].mxu0 }
0x23d8   :  { %v7569_v53 = vpop.f32.mrb[53].mxu0 }
0x23db   :  { %v5492_v58 = vpop.f32.mrb[54].mxu0 }
0x23dc   :  { %v7572_v33 = vpop.f32.mrb[55].mxu0 }
0x23df   :  { %v5723_v51 = vpop.f32.mrb[56].mxu0 }
0x23e0   :  { %5740 = vrot.lane.b32.xlu0 %v5723_v51, %s8199_s29  ;;  %v7596_v36 = vpop.f32.mrb[57].mxu0 }
0x23e3   :  { %v5728_v55 = vpop.f32.mrb[58].mxu0 }
0x23e4   :  { %5742 = vrot.lane.b32.xlu0 %v5728_v55, %s8199_s29  ;;  %v7599_v10 = vpop.f32.mrb[59].mxu0 }
0x23e7   :  { %v5733_v16 = vpop.f32.mrb[60].mxu0 }
0x23e8   :  { %5744 = vrot.lane.b32.xlu0 %v5733_v16, %s8199_s29  ;;  %v7602_v38 = vpop.f32.mrb[61].mxu0 }
0x2415   :  { %v5247_v37 = vpop.permute.xlu0 %5246 }
0x2416   :  { %v5255_v9 = vsel %vm589_vm2, %v4988_v18, %v5247_v37 }
0x2417   :  { %7607 = vmatprep.mubr.msk.f32.mxu1 %vm206_vm13, %v5255_v9 }
0x2419   :  { %v5249_v61 = vpop.permute.xlu1 %5248 }
0x241a   :  { %v5256_v4 = vsel %vm589_vm2, %v4993_v26, %v5249_v61 }
0x241b   :  { %7608 = vmatmul.mubr.msk.f32.vlgmr.msra.gmra.mrb[86].mxu1 %vm206_vm13, %v5256_v4 }
0x241d   :  { %v5251_v7 = vpop.permute.xlu0 %5250 }
0x241e   :  { %v5257_v11 = vsel %vm589_vm2, %v4998_v29, %v5251_v7 }
0x241f   :  { %7610 = vmatprep.mubr.msk.f32.mxu1 %vm206_vm13, %v5257_v11 }
0x2452   :  { %v5741_v3 = vpop.permute.xlu0 %5740 }
0x2453   :  { %v5749_v59 = vsel %vm589_vm2, %v5482_v0, %v5741_v3  ;;  %v4537_v0 = vld [vmem:[%s9749_s3 + $0x368] sm:$0xff] }
0x2454   :  { %7611 = vmatmul.mubr.msk.f32.gmra.mrb[88].mxu1 %vm206_vm13, %v5749_v59  ;;  %v7841_v42 = vpack.c.bf16 %v4537_v0, %v4536_v15 }
0x2456   :  { %v5743_v35 = vpop.permute.xlu0 %5742  ;;  %7842 = vmatprep.subr.bf16.mxu0 %v7841_v42 }
0x2457   :  { %v5750_v17 = vsel %vm589_vm2, %v5487_v31, %v5743_v35  ;;  %7844 = vmatpush3.bf16.msra.mxu0 %v7841_v42 }
0x2458   :  { %7613 = vmatprep.mubr.msk.f32.mxu1 %vm206_vm13, %v5750_v17 }
0x245a   :  { %v5745_v52 = vpop.permute.xlu0 %5744 }
0x245b   :  { %v5751_v27 = vsel %vm589_vm2, %v5492_v58, %v5745_v52  ;;  %vm6487_vm2 = vcmask 385024  }
0x245c   :  { %7614 = vmatmul.mubr.msk.f32.gmra.mrb[90].mxu1 %vm206_vm13, %v5751_v27 }
0x24ee   :  { %v7609_v21 = vpop.f32.mrb[86].mxu1 }
0x24ef   :  { %v5846_v1 = vadd.f32 %v7609_v21, %v6831_v41  ;;  %v5840_v32 = vpop.f32.mrb[87].mxu1 }
0x24f0   :  { %v5841_v44 = vadd.f32 %v6831_v41, %v5840_v32 }
0x24f1   :  { %v9541_v2 = vadd.f32 %v5846_v1, %v9124_v25 }
0x24f2   :  { %v9544_v60 = vadd.f32 %v5841_v44, %v9121_v23 }
0x24f3   :  { %v5878_v13 = vsel %vm206_vm13, %v9541_v2, 0.0 }
0x24f4   :  { %5879 = vadd.xlane.f32.xlu1 %v5878_v13  ;;  %v5875_v6 = vsel %vm206_vm13, %v9544_v60, 0.0  ;;  %v6838_v13 = vld [vmem:[%s9749_s3 + $0x350] ss:$0 sm:$0xff] }
0x24f5   :  { %5876 = vadd.xlane.f32.xlu0 %v5875_v6 }
0x2527   :  { %v7612_v45 = vpop.f32.mrb[88].mxu1 }
0x2528   :  { %v5850_v22 = vpop.f32.mrb[89].mxu1  ;;  %v5856_v24 = vadd.f32 %v7612_v45, %v6831_v41 }
0x2529   :  { %v5851_v8 = vadd.f32 %v6831_v41, %v5850_v22 }
0x252a   :  { %v9554_v25 = vadd.f32 %v5856_v24, %v9135_v30  ;;  %v6839_v24 = vld [vmem:[%s9749_s3 + $0x358] ss:$0 sm:$0xff] }
0x252b   :  { %v9551_v5 = vadd.f32 %v5851_v8, %v9132_v28 }
0x252c   :  { %v5884_v54 = vsel %vm206_vm13, %v9554_v25, 0.0 }
0x252d   :  { %v5881_v23 = vsel %vm206_vm13, %v9551_v5, 0.0 }
0x252e   :  { %5882 = vadd.xlane.f32.xlu0 %v5881_v23 }
0x252f   :  { %v7615_v57 = vpop.f32.mrb[90].mxu1 }
0x2530   :  { %v5866_v18 = vadd.f32 %v7615_v57, %v6831_v41  ;;  %v5860_v48 = vpop.f32.mrb[91].mxu1 }
0x2531   :  { %v5861_v26 = vadd.f32 %v6831_v41, %v5860_v48 }
0x2532   :  { %v9561_v29 = vadd.f32 %v5866_v18, %v9141_v20  ;;  %5885 = vadd.xlane.f32.xlu0 %v5884_v54 }
0x2533   :  { %v9564_v28 = vadd.f32 %v5861_v26, %v9138_v19 }
0x2534   :  { %v5890_v30 = vsel %vm206_vm13, %v9561_v29, 0.0 }
0x2535   :  { %v5887_v39 = vsel %vm206_vm13, %v9564_v28, 0.0 }
0x2536   :  { %5888 = vadd.xlane.f32.xlu1 %v5887_v39  ;;  %5891 = vadd.xlane.f32.xlu0 %v5890_v30 }
0x2581   :  { %v5880_v50 = vpop.xlane.xlu1 %5879 }
0x2582   :  { %v5894_v47 = vmul.f32 0.0625, %v5880_v50  ;;  %v5877_v46 = vpop.xlane.xlu0 %5876 }
0x2583   :  { %v5893_v14 = vmul.f32 0.0625, %v5877_v46 }
0x2584   :  { %v5900_v63 = vsub.f32 %v9541_v2, %v5894_v47 }
0x2585   :  { %v5899_v20 = vsub.f32 %v9544_v60, %v5893_v14 }
0x2586   :  { %v5906_v34 = vmul.f32 %v5900_v63, %v5900_v63 }
0x2587   :  { %v5905_v62 = vmul.f32 %v5899_v20, %v5899_v20 }
0x2588   :  { %v5914_v19 = vsel %vm206_vm13, %v5906_v34, 0.0 }
0x2589   :  { %5915 = vadd.xlane.f32.xlu0 %v5914_v19  ;;  %v5911_v12 = vsel %vm206_vm13, %v5905_v62, 0.0 }
0x258a   :  { %5912 = vadd.xlane.f32.xlu1 %v5911_v12 }
0x25bb   :  { %v5883_v31 = vpop.xlane.xlu0 %5882 }
0x25bc   :  { %v5895_v53 = vmul.f32 0.0625, %v5883_v31 }
0x25be   :  { %v5901_v58 = vsub.f32 %v9551_v5, %v5895_v53 }
0x25bf   :  { %v5886_v33 = vpop.xlane.xlu0 %5885 }
0x25c0   :  { %v5896_v51 = vmul.f32 0.0625, %v5886_v33  ;;  %v5907_v36 = vmul.f32 %v5901_v58, %v5901_v58 }
0x25c2   :  { %v5902_v55 = vsub.f32 %v9554_v25, %v5896_v51  ;;  %v5917_v10 = vsel %vm206_vm13, %v5907_v36, 0.0 }
0x25c3   :  { %v5889_v16 = vpop.xlane.xlu1 %5888  ;;  %5918 = vadd.xlane.f32.xlu1 %v5917_v10  ;;  %v5892_v38 = vpop.xlane.xlu0 %5891 }
0x25c4   :  { %v5897_v37 = vmul.f32 0.0625, %v5889_v16  ;;  %v5898_v9 = vmul.f32 0.0625, %v5892_v38  ;;  %v5908_v61 = vmul.f32 %v5902_v55, %v5902_v55 }
0x25c6   :  { %v5903_v4 = vsub.f32 %v9564_v28, %v5897_v37  ;;  %v5904_v7 = vsub.f32 %v9561_v29, %v5898_v9  ;;  %v5920_v11 = vsel %vm206_vm13, %v5908_v61, 0.0 }
0x25c7   :  { %5921 = vadd.xlane.f32.xlu0 %v5920_v11 }
0x25c8   :  { %v5909_v3 = vmul.f32 %v5903_v4, %v5903_v4  ;;  %v5910_v59 = vmul.f32 %v5904_v7, %v5904_v7 }
0x25ca   :  { %v5923_v35 = vsel %vm206_vm13, %v5909_v3, 0.0  ;;  %v5926_v17 = vsel %vm206_vm13, %v5910_v59, 0.0  ;;  %v4543_v3 = vld [vmem:[%s9749_s3 + $0x398] sm:$0xff]  ;;  %v4544_v59 = vld [vmem:[%s9749_s3 + $0x3a0] sm:$0xff] }
0x25cb   :  { %5924 = vadd.xlane.f32.xlu1 %v5923_v35  ;;  %5927 = vadd.xlane.f32.xlu0 %v5926_v17  ;;  %v7853_v35 = vpack.c.bf16 %v4544_v59, %v4543_v3  ;;  %v4545_v17 = vld [vmem:[%s9749_s3 + $0x3a8] sm:$0xff] }
0x2616   :  { %v5916_v52 = vpop.xlane.xlu0 %5915 }
0x2617   :  { %v5930_v27 = vmul.f32 0.0625, %v5916_v52  ;;  %v5913_v41 = vpop.xlane.xlu1 %5912  ;;  %v4546_v52 = vld [vmem:[%s9749_s3 + $0x3b0] sm:$0xff] }
0x2618   :  { %v5929_v21 = vmul.f32 0.0625, %v5913_v41  ;;  %v6840_v41 = vld [vmem:[%s9749_s3 + $0x370] ss:$0 sm:$0xff] }
0x2619   :  { %v5936_v1 = vadd.f32 1e-05, %v5930_v27  ;;  %v7857_v27 = vpack.c.bf16 %v4546_v52, %v4545_v17 }
0x261a   :  { %v5935_v32 = vadd.f32 1e-05, %v5929_v21 }
0x261b   :  { %8083 = vrsqrt.f32 %v5936_v1 }
0x261c   :  { %8085 = vrsqrt.f32 %v5935_v32 }
0x2625   :  { %v8084_v44 = vpop.eup %8083 }
0x2626   :  { %v8086_v6 = vpop.eup %8085  ;;  %v5948_v45 = vmul.f32 %v8084_v44, %v5900_v63 }
0x2627   :  { %v5947_v22 = vmul.f32 %v8086_v6, %v5899_v20 }
0x2628   :  { %v5958_v8 = vmul.f32 %v6838_v13, %v5948_v45 }
0x2629   :  { %v5957_v23 = vmul.f32 %v6838_v13, %v5947_v22 }
0x262a   :  { %v5968_v18 = vadd.f32 %v6839_v24, %v5958_v8 }
0x262b   :  { %v5967_v57 = vadd.f32 %v6839_v24, %v5957_v23 }
0x262d   :  { %7620 = vmatprep.mubr.msk.f32.mxu0 %vm206_vm13, %v5967_v57 }
0x262e   :  { %7621 = vmatmul.mubr.msk.f32.vlgmr.msra.gmra.mrb[62].mxu0 %vm206_vm13, %v5968_v18 }
0x2650   :  { %v5919_v48 = vpop.xlane.xlu1 %5918 }
0x2651   :  { %v5931_v26 = vmul.f32 0.0625, %v5919_v48 }
0x2653   :  { %v5937_v54 = vadd.f32 1e-05, %v5931_v26 }
0x2654   :  { %v5922_v30 = vpop.xlane.xlu0 %5921 }
0x2655   :  { %8087 = vrsqrt.f32 %v5937_v54  ;;  %v5932_v39 = vmul.f32 0.0625, %v5922_v30 }
0x2657   :  { %v5938_v50 = vadd.f32 1e-05, %v5932_v39 }
0x2658   :  { %v5925_v47 = vpop.xlane.xlu1 %5924  ;;  %v5928_v46 = vpop.xlane.xlu0 %5927 }
0x2659   :  { %8089 = vrsqrt.f32 %v5938_v50  ;;  %v5933_v14 = vmul.f32 0.0625, %v5925_v47  ;;  %v5934_v63 = vmul.f32 0.0625, %v5928_v46 }
0x265b   :  { %v5939_v20 = vadd.f32 1e-05, %v5933_v14  ;;  %v5940_v34 = vadd.f32 1e-05, %v5934_v63 }
0x265d   :  { %8091 = vrsqrt.f32 %v5939_v20 }
0x265e   :  { %8093 = vrsqrt.f32 %v5940_v34 }
0x265f   :  { %v8088_v62 = vpop.eup %8087 }
0x2660   :  { %v5949_v19 = vmul.f32 %v8088_v62, %v5901_v58  ;;  %v4539_v58 = vld [vmem:[%s9749_s3 + $0x378] sm:$0xff] }
0x2662   :  { %v5959_v12 = vmul.f32 %v6838_v13, %v5949_v19 }
0x2663   :  { %v8090_v15 = vpop.eup %8089 }
0x2664   :  { %v5969_v0 = vadd.f32 %v6839_v24, %v5959_v12  ;;  %v5950_v42 = vmul.f32 %v8090_v15, %v5902_v55  ;;  %v4540_v55 = vld [vmem:[%s9749_s3 + $0x380] sm:$0xff] }
0x2665   :  { %v7845_v61 = vpack.c.bf16 %v4540_v55, %v4539_v58  ;;  %v6847_v55 = vld [vmem:[%s9749_s3 + $0x3b8] ss:$0 sm:$0xff] }
0x2666   :  { %7623 = vmatprep.mubr.msk.f32.mxu0 %vm206_vm13, %v5969_v0  ;;  %v5960_v31 = vmul.f32 %v6838_v13, %v5950_v42 }
0x2667   :  { %v8092_v53 = vpop.eup %8091  ;;  %7846 = vmatprep.subr.bf16.mxu1 %v7845_v61 }
0x2668   :  { %v8094_v33 = vpop.eup %8093  ;;  %v5970_v51 = vadd.f32 %v6839_v24, %v5960_v31  ;;  %v5951_v36 = vmul.f32 %v8092_v53, %v5903_v4  ;;  %7848 = vmatpush3.bf16.msra.mxu1 %v7845_v61  ;;  %v4541_v4 = vld [vmem:[%s9749_s3 + $0x388] sm:$0xff] }
0x2669   :  { %v5952_v10 = vmul.f32 %v8094_v33, %v5904_v7  ;;  %v4542_v7 = vld [vmem:[%s9749_s3 + $0x390] sm:$0xff] }
0x266a   :  { %7624 = vmatmul.mubr.msk.f32.gmra.mrb[64].mxu0 %vm206_vm13, %v5970_v51  ;;  %v5961_v16 = vmul.f32 %v6838_v13, %v5951_v36  ;;  %v7849_v11 = vpack.c.bf16 %v4542_v7, %v4541_v4 }
0x266b   :  { %v5962_v38 = vmul.f32 %v6838_v13, %v5952_v10 }
0x266c   :  { %v5971_v37 = vadd.f32 %v6839_v24, %v5961_v16  ;;  %7850 = vmatprep.subr.bf16.mxu1 %v7849_v11 }
0x266d   :  { %v5972_v9 = vadd.f32 %v6839_v24, %v5962_v38  ;;  %7852 = vmatpush3.bf16.msra.mxu1 %v7849_v11 }
0x266e   :  { %7626 = vmatprep.mubr.msk.f32.mxu0 %vm206_vm13, %v5971_v37  ;;  %7854 = vmatprep.subr.bf16.mxu1 %v7853_v35 }
0x266f   :  { %7627 = vmatmul.mubr.msk.f32.gmra.mrb[66].mxu0 %vm206_vm13, %v5972_v9 }
0x2671   :  { %7856 = vmatpush3.bf16.msra.mxu1 %v7853_v35 }
0x2672   :  { %7858 = vmatprep.subr.bf16.mxu1 %v7857_v27 }
0x2675   :  { %7860 = vmatpush3.bf16.msra.mxu1 %v7857_v27 }
0x2701   :  { %v7622_v21 = vpop.f32.mrb[62].mxu0 }
0x2702   :  { %v6067_v1 = vadd.f32 %v7622_v21, %v6840_v41  ;;  %v6061_v32 = vpop.f32.mrb[63].mxu0 }
0x2703   :  { %v6062_v44 = vadd.f32 %v6840_v41, %v6061_v32 }
0x2704   :  { %v6097_v13 = vmul.f32 0.70710677, %v6067_v1  ;;  %v6091_v57 = vmul.f32 0.5, %v6067_v1 }
0x2705   :  { %v6096_v6 = vmul.f32 0.70710677, %v6062_v44  ;;  %v6090_v8 = vmul.f32 0.5, %v6062_v44 }
0x2706   :  { %8095 = verf.f32 %v6097_v13 }
0x2707   :  { %8097 = verf.f32 %v6096_v6 }
0x2710   :  { %v8096_v45 = vpop.eup %8095 }
0x2711   :  { %v8098_v22 = vpop.eup %8097  ;;  %v6109_v24 = vadd.f32 1.0, %v8096_v45 }
0x2712   :  { %v6108_v23 = vadd.f32 1.0, %v8098_v22 }
0x2713   :  { %v6115_v48 = vmul.f32 %v6109_v24, %v6091_v57 }
0x2714   :  { %v6114_v18 = vmul.f32 %v6108_v23, %v6090_v8 }
0x2716   :  { %7645 = vmatprep.mubr.msk.f32.mxu1 %vm6124_vm1, %v6114_v18 }
0x2717   :  { %7646 = vmatmul.mubr.msk.f32.vlgmr.msra.gmra.mrb[92].mxu1 %vm6124_vm1, %v6115_v48 }
0x273d   :  { %v7625_v26 = vpop.f32.mrb[64].mxu0 }
0x273e   :  { %v6077_v54 = vadd.f32 %v7625_v26, %v6840_v41  ;;  %v6071_v30 = vpop.f32.mrb[65].mxu0 }
0x273f   :  { %v6072_v39 = vadd.f32 %v6840_v41, %v6071_v30 }
0x2740   :  { %v6099_v50 = vmul.f32 0.70710677, %v6077_v54  ;;  %v6093_v31 = vmul.f32 0.5, %v6077_v54 }
0x2741   :  { %v6098_v47 = vmul.f32 0.70710677, %v6072_v39  ;;  %v6092_v0 = vmul.f32 0.5, %v6072_v39 }
0x2742   :  { %8099 = verf.f32 %v6099_v50  ;;  %v7628_v46 = vpop.f32.mrb[66].mxu0  ;;  %v6345_v50 = vld [vmem:[%s9749_s3 + $0xc0] sm:$0xff] }
0x2743   :  { %8101 = verf.f32 %v6098_v47  ;;  %v6087_v14 = vadd.f32 %v7628_v46, %v6840_v41  ;;  %v6081_v63 = vpop.f32.mrb[67].mxu0 }
0x2744   :  { %v6082_v20 = vadd.f32 %v6840_v41, %v6081_v63 }
0x2745   :  { %v6101_v34 = vmul.f32 0.70710677, %v6087_v14  ;;  %v6095_v37 = vmul.f32 0.5, %v6087_v14 }
0x2746   :  { %v6100_v62 = vmul.f32 0.70710677, %v6082_v20  ;;  %v6094_v16 = vmul.f32 0.5, %v6082_v20 }
0x2747   :  { %8103 = verf.f32 %v6101_v34 }
0x2748   :  { %8105 = verf.f32 %v6100_v62 }
0x274c   :  { %v8100_v19 = vpop.eup %8099 }
0x274d   :  { %v8102_v12 = vpop.eup %8101  ;;  %v6111_v15 = vadd.f32 1.0, %v8100_v19 }
0x274e   :  { %v6110_v42 = vadd.f32 1.0, %v8102_v12 }
0x274f   :  { %v6117_v51 = vmul.f32 %v6111_v15, %v6093_v31 }
0x2750   :  { %v6116_v53 = vmul.f32 %v6110_v42, %v6092_v0 }
0x2751   :  { %v8104_v33 = vpop.eup %8103 }
0x2752   :  { %v8106_v36 = vpop.eup %8105  ;;  %v6113_v10 = vadd.f32 1.0, %v8104_v33  ;;  %7648 = vmatprep.mubr.msk.f32.mxu1 %vm6124_vm1, %v6116_v53 }
0x2753   :  { %v6112_v38 = vadd.f32 1.0, %v8106_v36  ;;  %7649 = vmatmul.mubr.msk.f32.gmra.mrb[94].mxu1 %vm6124_vm1, %v6117_v51 }
0x2754   :  { %v6119_v58 = vmul.f32 %v6113_v10, %v6095_v37 }
0x2755   :  { %v6118_v9 = vmul.f32 %v6112_v38, %v6094_v16 }
0x2757   :  { %7651 = vmatprep.mubr.msk.f32.mxu1 %vm6124_vm1, %v6118_v9 }
0x2758   :  { %7652 = vmatmul.mubr.msk.f32.gmra.mrb[96].mxu1 %vm6124_vm1, %v6119_v58 }
0x27ea   :  { %v7647_v61 = vpop.f32.mrb[92].mxu1 }
0x27eb   :  { %v6215_v4 = vadd.f32 %v7647_v61, %v6847_v55  ;;  %v6209_v7 = vpop.f32.mrb[93].mxu1 }
0x27ec   :  { %v6210_v11 = vadd.f32 %v6847_v55, %v6209_v7 }
0x27ed   :  { %v6239_v3 = vadd.f32 %v6215_v4, %v9541_v2 }
0x27ee   :  { %v6238_v59 = vadd.f32 %v6210_v11, %v9544_v60 }
0x27ef   :  { %v6249_v35 = vsel %vm206_vm13, %v6239_v3, 0.0 }
0x27f0   :  { %6250 = vadd.xlane.f32.xlu0 %v6249_v35  ;;  %v6246_v17 = vsel %vm206_vm13, %v6238_v59, 0.0 }
0x27f1   :  { %6247 = vadd.xlane.f32.xlu1 %v6246_v17 }
0x2826   :  { %v7650_v52 = vpop.f32.mrb[94].mxu1 }
0x2827   :  { %v6225_v27 = vadd.f32 %v7650_v52, %v6847_v55  ;;  %v6219_v41 = vpop.f32.mrb[95].mxu1  ;;  %v6855_v52 = vld [vmem:[%s9749_s3 + $0xb0] ss:$0 sm:$0xff] }
0x2828   :  { %v6220_v21 = vadd.f32 %v6847_v55, %v6219_v41 }
0x2829   :  { %v6241_v1 = vadd.f32 %v6225_v27, %v9554_v25 }
0x282a   :  { %v6240_v32 = vadd.f32 %v6220_v21, %v9551_v5 }
0x282b   :  { %v7653_v44 = vpop.f32.mrb[96].mxu1  ;;  %v6255_v13 = vsel %vm206_vm13, %v6241_v1, 0.0 }
0x282c   :  { %v6235_v2 = vadd.f32 %v7653_v44, %v6847_v55  ;;  %6256 = vadd.xlane.f32.xlu0 %v6255_v13  ;;  %v6229_v60 = vpop.f32.mrb[97].mxu1  ;;  %v6252_v6 = vsel %vm206_vm13, %v6240_v32, 0.0 }
0x282d   :  { %v6230_v45 = vadd.f32 %v6847_v55, %v6229_v60  ;;  %6253 = vadd.xlane.f32.xlu1 %v6252_v6 }
0x282e   :  { %v6243_v22 = vadd.f32 %v6235_v2, %v9561_v29 }
0x282f   :  { %v6242_v24 = vadd.f32 %v6230_v45, %v9564_v28  ;;  %v6344_v28 = vld [vmem:[%s9749_s3 + $0xb8] sm:$0xff] }
0x2830   :  { %v6261_v8 = vsel %vm206_vm13, %v6243_v22, 0.0  ;;  %v7861_v47 = vpack.c.bf16 %v6345_v50, %v6344_v28 }
0x2831   :  { %6262 = vadd.xlane.f32.xlu0 %v6261_v8  ;;  %v6258_v25 = vsel %vm206_vm13, %v6242_v24, 0.0 }
0x2832   :  { %6259 = vadd.xlane.f32.xlu1 %v6258_v25  ;;  %7862 = vmatprep.subr.bf16.mxu0 %v7861_v47 }
0x2833   :  { %7864 = vmatpush3.bf16.msra.mxu0 %v7861_v47 }
0x287d   :  { %v6251_v5 = vpop.xlane.xlu0 %6250 }
0x287e   :  { %v6265_v23 = vmul.f32 0.0625, %v6251_v5  ;;  %v6248_v57 = vpop.xlane.xlu1 %6247 }
0x287f   :  { %v6264_v18 = vmul.f32 0.0625, %v6248_v57 }
0x2880   :  { %v6271_v48 = vsub.f32 %v6239_v3, %v6265_v23  ;;  %v6854_v3 = vld [vmem:[%s9749_s3 + $0xa8] ss:$0 sm:$0xff] }
0x2881   :  { %v6270_v26 = vsub.f32 %v6238_v59, %v6264_v18 }
0x2882   :  { %v6277_v54 = vmul.f32 %v6271_v48, %v6271_v48 }
0x2883   :  { %v6276_v30 = vmul.f32 %v6270_v26, %v6270_v26 }
0x2884   :  { %v6285_v39 = vsel %vm206_vm13, %v6277_v54, 0.0 }
0x2885   :  { %6286 = vadd.xlane.f32.xlu0 %v6285_v39  ;;  %v6282_v29 = vsel %vm206_vm13, %v6276_v30, 0.0 }
0x2886   :  { %6283 = vadd.xlane.f32.xlu1 %v6282_v29 }
0x28b9   :  { %v6257_v46 = vpop.xlane.xlu0 %6256 }
0x28ba   :  { %v6267_v14 = vmul.f32 0.0625, %v6257_v46  ;;  %v6254_v63 = vpop.xlane.xlu1 %6253 }
0x28bb   :  { %v6266_v20 = vmul.f32 0.0625, %v6254_v63 }
0x28bc   :  { %v6273_v34 = vsub.f32 %v6241_v1, %v6267_v14 }
0x28bd   :  { %v6272_v62 = vsub.f32 %v6240_v32, %v6266_v20 }
0x28be   :  { %v6263_v19 = vpop.xlane.xlu0 %6262  ;;  %v6279_v12 = vmul.f32 %v6273_v34, %v6273_v34 }
0x28bf   :  { %v6269_v15 = vmul.f32 0.0625, %v6263_v19  ;;  %v6260_v0 = vpop.xlane.xlu1 %6259  ;;  %v6278_v42 = vmul.f32 %v6272_v62, %v6272_v62 }
0x28c0   :  { %v6268_v31 = vmul.f32 0.0625, %v6260_v0  ;;  %v6291_v53 = vsel %vm206_vm13, %v6279_v12, 0.0 }
0x28c1   :  { %v6275_v33 = vsub.f32 %v6243_v22, %v6269_v15  ;;  %6292 = vadd.xlane.f32.xlu0 %v6291_v53  ;;  %v6288_v51 = vsel %vm206_vm13, %v6278_v42, 0.0  ;;  %v6856_v15 = vld [vmem:[%s9749_s3 + $0xc8] ss:$0 sm:$0xff] }
0x28c2   :  { %v6274_v36 = vsub.f32 %v6242_v24, %v6268_v31  ;;  %6289 = vadd.xlane.f32.xlu1 %v6288_v51 }
0x28c3   :  { %v6281_v10 = vmul.f32 %v6275_v33, %v6275_v33 }
0x28c4   :  { %v6280_v16 = vmul.f32 %v6274_v36, %v6274_v36 }
0x28c5   :  { %v6297_v38 = vsel %vm206_vm13, %v6281_v10, 0.0 }
0x28c6   :  { %6298 = vadd.xlane.f32.xlu0 %v6297_v38  ;;  %v6294_v37 = vsel %vm206_vm13, %v6280_v16, 0.0 }
0x28c7   :  { %6295 = vadd.xlane.f32.xlu1 %v6294_v37 }
0x2912   :  { %v6287_v9 = vpop.xlane.xlu0 %6286 }
0x2913   :  { %v6301_v58 = vmul.f32 0.0625, %v6287_v9  ;;  %v6284_v55 = vpop.xlane.xlu1 %6283 }
0x2914   :  { %v6300_v61 = vmul.f32 0.0625, %v6284_v55 }
0x2915   :  { %v6307_v4 = vadd.f32 1e-05, %v6301_v58 }
0x2916   :  { %v6306_v7 = vadd.f32 1e-05, %v6300_v61  ;;  %v6535_v61 = vld [vmem:[%s9748_s2 + $0x10] sm:$0xff] }
0x2917   :  { %8107 = vrsqrt.f32 %v6307_v4  ;;  %v6539_v4 = vrot.slane %v6535_v61, 7 }
0x2918   :  { %8109 = vrsqrt.f32 %v6306_v7  ;;  %v6536_v7 = vld [vmem:[%s9748_s2 + $0x18] sm:$0xff] }
0x2921   :  { %v8108_v11 = vpop.eup %8107 }
0x2922   :  { %v8110_v59 = vpop.eup %8109  ;;  %v6319_v35 = vmul.f32 %v8108_v11, %v6271_v48 }
0x2923   :  { %v6318_v17 = vmul.f32 %v8110_v59, %v6270_v26 }
0x2924   :  { %v6329_v27 = vmul.f32 %v6854_v3, %v6319_v35 }
0x2925   :  { %v6328_v41 = vmul.f32 %v6854_v3, %v6318_v17  ;;  %v6540_v17 = vrot.slane %v6536_v7, 7 }
0x2926   :  { %v6339_v1 = vadd.f32 %v6855_v52, %v6329_v27 }
0x2927   :  { %v6338_v21 = vadd.f32 %v6855_v52, %v6328_v41 }
0x2929   :  { %7658 = vmatprep.mubr.msk.f32.mxu0 %vm206_vm13, %v6338_v21 }
0x292a   :  { %7659 = vmatmul.mubr.msk.f32.vlgmr.msra.gmra.mrb[68].mxu0 %vm206_vm13, %v6339_v1 }
0x294e   :  { %v6293_v32 = vpop.xlane.xlu0 %6292 }
0x294f   :  { %v6303_v44 = vmul.f32 0.0625, %v6293_v32  ;;  %v6290_v13 = vpop.xlane.xlu1 %6289 }
0x2950   :  { %v6302_v2 = vmul.f32 0.0625, %v6290_v13 }
0x2951   :  { %v6309_v60 = vadd.f32 1e-05, %v6303_v44 }
0x2952   :  { %v6308_v6 = vadd.f32 1e-05, %v6302_v2 }
0x2953   :  { %8111 = vrsqrt.f32 %v6309_v60  ;;  %v6299_v45 = vpop.xlane.xlu0 %6298  ;;  %v6541_v60 = vsel %vm200_vm5, %v6539_v4, %v6540_v17 }
0x2954   :  { %8113 = vrsqrt.f32 %v6308_v6  ;;  %v6305_v22 = vmul.f32 0.0625, %v6299_v45  ;;  %v6296_v24 = vpop.xlane.xlu1 %6295 }
0x2955   :  { %v6304_v8 = vmul.f32 0.0625, %v6296_v24 }
0x2956   :  { %v6311_v25 = vadd.f32 1e-05, %v6305_v22 }
0x2957   :  { %v6310_v5 = vadd.f32 1e-05, %v6304_v8 }
0x2958   :  { %8115 = vrsqrt.f32 %v6311_v25 }
0x2959   :  { %8117 = vrsqrt.f32 %v6310_v5 }
0x295d   :  { %v8112_v23 = vpop.eup %8111 }
0x295e   :  { %v8114_v57 = vpop.eup %8113  ;;  %v6321_v18 = vmul.f32 %v8112_v23, %v6273_v34  ;;  %v6464_v34 = vld [vmem:[%s9748_s2] sm:$0xff] }
0x295f   :  { %v6320_v48 = vmul.f32 %v8114_v57, %v6272_v62  ;;  %v6465_v62 = vld [vmem:[%s9748_s2 + $0x8] sm:$0xff]  ;;  %v6468_v19 = vrot.slane %v6464_v34, 7  ;;  %s8202_s2 = smov [#allocation4]  }
0x2960   :  { %v6331_v26 = vmul.f32 %v6854_v3, %v6321_v18  ;;  %v6469_v12 = vrot.slane %v6465_v62, 7  ;;  %s6635_s25 = sshll.u32 %s8202_s2, 4  ;;  %s6636_s25 = int_to_ptr.vmem [resolvable:$true] %s6635_s25 }
0x2961   :  { %v6330_v54 = vmul.f32 %v6854_v3, %v6320_v48  ;;  %s8133_s1 = scalar_lea.vmem %s6636_s25, 512  ;;  %p8138_p6 = scmp.lt.s32.totalorder %s6636_s25, %s6636_s25 }
0x2962   :  { %v8116_v30 = vpop.eup %8115  ;;  %v6341_v50 = vadd.f32 %v6855_v52, %v6331_v26  ;;  %v6470_v42 = vsel %vm200_vm5, %v6468_v19, %v6469_v12  ;;  %p8134_p5 = scmp.ne.s32.totalorder %s6636_s25, %s8133_s1  ;;  %p8139_p7 = scmp.lt.s32.totalorder %s8133_s1, %s8133_s1 }
0x2963   :  { %v8118_v39 = vpop.eup %8117  ;;  %v6340_v29 = vadd.f32 %v6855_v52, %v6330_v54  ;;  %v6323_v28 = vmul.f32 %v8116_v30, %v6275_v33 }
0x2964   :  { %v6322_v47 = vmul.f32 %v8118_v39, %v6274_v36  ;;  %p8140_p8 = por %p8139_p7, %p8138_p6 }
0x2965   :  { %7661 = vmatprep.mubr.msk.f32.mxu0 %vm206_vm13, %v6340_v29  ;;  %v6333_v46 = vmul.f32 %v6854_v3, %v6323_v28 }
0x2966   :  { %7662 = vmatmul.mubr.msk.f32.gmra.mrb[70].mxu0 %vm206_vm13, %v6341_v50  ;;  %v6332_v14 = vmul.f32 %v6854_v3, %v6322_v47  ;;  %p8141_p9 = pnand %p8140_p8, %p8134_p5 }
0x2967   :  { %v6343_v20 = vadd.f32 %v6855_v52, %v6333_v46 }
0x2968   :  { %v6342_v63 = vadd.f32 %v6855_v52, %v6332_v14 }
0x296a   :  { %7664 = vmatprep.mubr.msk.f32.mxu0 %vm206_vm13, %v6342_v63 }
0x296b   :  { %7665 = vmatmul.mubr.msk.f32.gmra.mrb[72].mxu0 %vm206_vm13, %v6343_v20  ;;  %vm6480_vm13 = vcmask 392193  }
0x29fd   :  { %v7660_v0 = vpop.f32.mrb[68].mxu0 }
0x29fe   :  { %v6441_v31 = vadd.f32 %v7660_v0, %v6856_v15  ;;  %v6435_v53 = vpop.f32.mrb[69].mxu0 }
0x29ff   :  { %v6436_v33 = vadd.f32 %v6856_v15, %v6435_v53 }
0x2a00   :  { %v6475_v51 = vsub.f32 %v6441_v31, %v6470_v42  ;;  %v6606_v36 = vrot.slane %v6441_v31, 1 }
0x2a01   :  { %v6474_v10 = vsub.f32 %v6436_v33, %v6468_v19  ;;  %v6605_v16 = vrot.slane %v6436_v33, 1 }
0x2a02   :  { %v6478_v38 = vmul.f32 %v6475_v51, %v6475_v51 }
0x2a03   :  { %v6477_v37 = vmul.f32 %v6474_v10, %v6474_v10  ;;  %v6607_v9 = vsel %vm4370_vm15, %v6605_v16, %v6606_v36 }
0x2a04   :  { %6622 = vst.msk [vmem:[#allocation4] sm:$0xff] %vm40_vm0, %v6607_v9  ;;  %v6484_v58 = vsel %vm40_vm0, %v6478_v38, 0.0 }
0x2a05   :  { %6485 = vadd.xlane.f32.xlu0 %v6484_v58  ;;  %v6481_v55 = vsel %vm6480_vm13, %v6477_v37, 0.0 }
0x2a06   :  { %6482 = vadd.xlane.f32.xlu1 %v6481_v55 }
0x2a39   :  { %v7663_v11 = vpop.f32.mrb[70].mxu0 }
0x2a3a   :  { %v6451_v3 = vadd.f32 %v7663_v11, %v6856_v15  ;;  %v6445_v59 = vpop.f32.mrb[71].mxu0 }
0x2a3b   :  { %v6446_v35 = vadd.f32 %v6856_v15, %v6445_v59 }
0x2a3c   :  { %v6545_v52 = vsub.f32 %v6451_v3, %v6539_v4  ;;  %v6615_v25 = vrot.slane %v6451_v3, 1 }
0x2a3d   :  { %v6476_v27 = vsub.f32 %v6446_v35, %v6469_v12  ;;  %v6608_v41 = vrot.slane %v6446_v35, 1 }
0x2a3e   :  { %v6548_v21 = vmul.f32 %v6545_v52, %v6545_v52  ;;  %v7666_v1 = vpop.f32.mrb[72].mxu0 }
0x2a3f   :  { %v6479_v32 = vmul.f32 %v6476_v27, %v6476_v27  ;;  %v6609_v44 = vsel %vm4370_vm15, %v6606_v36, %v6608_v41  ;;  %v6461_v13 = vadd.f32 %v7666_v1, %v6856_v15  ;;  %v6455_v2 = vpop.f32.mrb[73].mxu0 }
0x2a40   :  { %6623 = vst.msk [vmem:[#allocation4 + $0x8] sm:$0xff] %vm40_vm0, %v6609_v44  ;;  %v6456_v6 = vadd.f32 %v6856_v15, %v6455_v2  ;;  %v6551_v45 = vsel %vm6480_vm13, %v6548_v21, 0.0 }
0x2a41   :  { %v6547_v22 = vsub.f32 %v6461_v13, %v6540_v17  ;;  %v6618_v24 = vrot.slane %v6461_v13, 1  ;;  %6552 = vadd.xlane.f32.xlu0 %v6551_v45  ;;  %v6488_v8 = vsel %vm6487_vm2, %v6479_v32, 0.0 }
0x2a42   :  { %v6546_v5 = vsub.f32 %v6456_v6, %v6541_v60  ;;  %v6616_v23 = vrot.slane %v6456_v6, 1  ;;  %6489 = vadd.xlane.f32.xlu1 %v6488_v8 }
0x2a43   :  { %v6550_v57 = vmul.f32 %v6547_v22, %v6547_v22 }
0x2a44   :  { %v6549_v18 = vmul.f32 %v6546_v5, %v6546_v5  ;;  %v6617_v48 = vsel %vm4370_vm15, %v6615_v25, %v6616_v23  ;;  %v6619_v26 = vsel %vm4370_vm15, %v6616_v23, %v6618_v24 }
0x2a45   :  { %6624 = vst.msk [vmem:[#allocation4 + $0x10] sm:$0xff] %vm40_vm0, %v6617_v48  ;;  %6625 = vst.msk [vmem:[#allocation4 + $0x18] sm:$0xff] %vm40_vm0, %v6619_v26  ;;  %v6557_v54 = vsel %vm6487_vm2, %v6550_v57, 0.0 }
0x2a46   :  { %6558 = vadd.xlane.f32.xlu0 %v6557_v54  ;;  %v6554_v30 = vsel %vm40_vm0, %v6549_v18, 0.0 }
0x2a47   :  { %6555 = vadd.xlane.f32.xlu1 %v6554_v30 }
0x2a48   :  { %8144 = shalt.err (!%p8141_p9)
}
0x2a49   :  { %s8145_s22 = scalar_lea.hbm %s9750_s4, 512 }
0x2a4a   :  { %p8146_p10 = scmp.ne.s32.totalorder %s9750_s4, %s8145_s22  ;;  %p8149_p11 = scmp.lt.u32.totalorder %s8145_s22, %s9750_s4 }
0x2a4c   :  { %p8151_p12 = pnand %p8149_p11, %p8146_p10 }
0x2a4e   :  { %8154 = shalt.err (!%p8151_p12)
}
0x2a4f   :  { %s8203_s28 = smov 128   ;;  %v6527_v39 = vadd.f32 %v9099_v40, %v9104_v43  ;;  %v6594_v29 = vadd.f32 %v9110_v49, %v9113_v56  ;;  %v6497_v47 = vrot.slane %v9104_v43, 7  ;;  %v6498_v46 = vrot.slane %v9099_v40, 7 }
0x2a50   :  { %6641 = dma.vmem_to_hbm [thread:$0]  %s6636_s25, 512, %s9750_s4, [#allocation5], %s8203_s28, %s8203_s28, %s8199_s29   ;;  %v6566_v40 = vrot.slane %v9110_v49, 7  ;;  %v6565_v38 = vrot.slane %v9113_v56, 7  ;;  %vm6516_vm0 = vcmask 7168  }
0x2a51   :  { %v6528_v28 = vrot.slane %v6527_v39, 4  ;;  %v6595_v50 = vrot.slane %v6594_v29, 4  ;;  %v6499_v12 = vsel %vm200_vm5, %v6497_v47, %v6498_v46  ;;  %s8204_s4 = smov [#allocation6]  }
0x2a52   :  { %v6567_v3 = vsel %vm200_vm5, %v6565_v38, %v6566_v40  ;;  %s6648_s29 = sshll.u32 %s8204_s4, 4  ;;  %vm6628_vm5 = vcmask 0   ;;  %s6649_s29 = int_to_ptr.vmem [resolvable:$true] %s6648_s29 }
0x2a53   :  { %v6529_v20 = vadd.f32 %v6528_v28, %v6527_v39  ;;  %v6596_v34 = vadd.f32 %v6595_v50, %v6594_v29  ;;  %s8155_s9 = scalar_lea.vmem %s6649_s29, 16  ;;  %s8159_s14 = scalar_lea.vmem %s6649_s29, 32 }
0x2a54   :  { %p8156_p13 = scmp.ne.s32.totalorder %s6649_s29, %s8155_s9  ;;  %p8160_p0 = scmp.lt.s32.totalorder %s6649_s29, %s6649_s29 }
0x2a55   :  { %v6530_v15 = vrot.slane %v6529_v20, 2  ;;  %v6597_v0 = vrot.slane %v6596_v34, 2  ;;  %p8161_p1 = scmp.lt.s32.totalorder %s8159_s14, %s8155_s9 }
0x2a57   :  { %v6531_v33 = vadd.f32 %v6530_v15, %v6529_v20  ;;  %v6598_v51 = vadd.f32 %v6597_v0, %v6596_v34  ;;  %p8162_p2 = por %p8161_p1, %p8160_p0 }
0x2a59   :  { %v6532_v58 = vrot.slane %v6531_v33, 1  ;;  %v6599_v55 = vrot.slane %v6598_v51, 1  ;;  %p8163_p3 = pnand %p8162_p2, %p8156_p13 }
0x2a5b   :  { %v6533_v32 = vadd.f32 %v6532_v58, %v6531_v33  ;;  %v6600_v44 = vadd.f32 %v6599_v55, %v6598_v51 }
0x2a5d   :  { %v6601_v25 = vadd.f32 %v6600_v44, %v6533_v32 }
0x2a5f   :  { %8119 = vrcp.f32 %v6601_v25 }
0x2a69   :  { %v8120_v50 = vpop.eup %8119 }
0x2a92   :  { %v6486_v14 = vpop.xlane.xlu0 %6485 }
0x2a93   :  { %v6483_v63 = vpop.xlane.xlu1 %6482  ;;  %v6493_v62 = vmul.f32 0.020833334, %v6486_v14 }
0x2a94   :  { %v6492_v19 = vmul.f32 0.020833334, %v6483_v63 }
0x2a95   :  { %v6504_v42 = vmul.f32 %v6499_v12, %v6493_v62 }
0x2a96   :  { %v6503_v31 = vmul.f32 %v6497_v47, %v6492_v19 }
0x2a97   :  { %v6510_v10 = vrot.slane %v6504_v42, 1 }
0x2a98   :  { %v6509_v43 = vrot.slane %v6503_v31, 1 }
0x2a9a   :  { %v6511_v4 = vsel %vm4370_vm15, %v6509_v43, %v6510_v10 }
0x2a9b   :  { %v6517_v56 = vsel %vm6516_vm0, %v6511_v4, 0.0 }
0x2ace   :  { %v6553_v53 = vpop.xlane.xlu0 %6552 }
0x2acf   :  { %v6490_v36 = vpop.xlane.xlu1 %6489  ;;  %v6560_v37 = vmul.f32 0.020833334, %v6553_v53 }
0x2ad0   :  { %v6494_v16 = vmul.f32 0.020833334, %v6490_v36 }
0x2ad1   :  { %v6571_v35 = vmul.f32 %v6565_v38, %v6560_v37 }
0x2ad2   :  { %v6505_v9 = vmul.f32 %v6498_v46, %v6494_v16 }
0x2ad3   :  { %v6559_v61 = vpop.xlane.xlu0 %6558  ;;  %v6577_v13 = vrot.slane %v6571_v35, 1 }
0x2ad4   :  { %v6512_v7 = vrot.slane %v6505_v9, 1  ;;  %v6562_v11 = vmul.f32 0.020833334, %v6559_v61  ;;  %v6556_v59 = vpop.xlane.xlu1 %6555 }
0x2ad5   :  { %v6561_v17 = vmul.f32 0.020833334, %v6556_v59 }
0x2ad6   :  { %v6513_v52 = vsel %vm4370_vm15, %v6510_v10, %v6512_v7  ;;  %v6573_v49 = vmul.f32 %v6566_v40, %v6562_v11 }
0x2ad7   :  { %v6518_v27 = vsel %vm6516_vm0, %v6513_v52, 0.0  ;;  %v6572_v41 = vmul.f32 %v6567_v3, %v6561_v17 }
0x2ad8   :  { %v6519_v21 = vadd.f32 %v6518_v27, %v6517_v56  ;;  %v6580_v1 = vrot.slane %v6573_v49, 1 }
0x2ad9   :  { %v6578_v2 = vrot.slane %v6572_v41, 1 }
0x2ada   :  { %v6520_v60 = vrot.slane %v6519_v21, 4 }
0x2adb   :  { %v6579_v6 = vsel %vm4370_vm15, %v6577_v13, %v6578_v2  ;;  %v6581_v45 = vsel %vm4370_vm15, %v6578_v2, %v6580_v1 }
0x2adc   :  { %v6521_v22 = vadd.f32 %v6520_v60, %v6519_v21  ;;  %v6584_v24 = vsel %vm6516_vm0, %v6579_v6, 0.0  ;;  %v6585_v8 = vsel %vm6516_vm0, %v6581_v45, 0.0 }
0x2add   :  { %v6586_v5 = vadd.f32 %v6585_v8, %v6584_v24 }
0x2ade   :  { %v6522_v23 = vrot.slane %v6521_v22, 2 }
0x2adf   :  { %v6587_v57 = vrot.slane %v6586_v5, 4 }
0x2ae0   :  { %v6523_v48 = vadd.f32 %v6522_v23, %v6521_v22 }
0x2ae1   :  { %v6588_v18 = vadd.f32 %v6587_v57, %v6586_v5 }
0x2ae2   :  { %v6524_v54 = vrot.slane %v6523_v48, 1 }
0x2ae3   :  { %v6589_v26 = vrot.slane %v6588_v18, 2 }
0x2ae4   :  { %v6525_v29 = vadd.f32 %v6524_v54, %v6523_v48 }
0x2ae5   :  { %v6590_v30 = vadd.f32 %v6589_v26, %v6588_v18 }
0x2ae7   :  { %v6591_v39 = vrot.slane %v6590_v30, 1 }
0x2ae9   :  { %v6592_v28 = vadd.f32 %v6591_v39, %v6590_v30 }
0x2aeb   :  { %v6593_v47 = vadd.f32 %v6592_v28, %v6525_v29 }
0x2aed   :  { %v6627_v46 = vmul.f32 %v8120_v50, %v6593_v47 }
0x2aef   :  { %6629 = vst.msk [vmem:[#allocation6] sm:$0x1] %vm6628_vm5, %v6627_v46 }
0x2af0   :  { %8166 = shalt.err (!%p8163_p3)
}
0x2af1   :  { %s8167_s7 = scalar_lea.hbm %s9751_s5, 16 }
0x2af2   :  { %p8168_p4 = scmp.ne.s32.totalorder %s9751_s5, %s8167_s7  ;;  %p8171_p5 = scmp.lt.u32.totalorder %s8167_s7, %s9751_s5 }
0x2af4   :  { %p8173_p6 = pnand %p8171_p5, %p8168_p4 }
0x2af6   :  { %8176 = shalt.err (!%p8173_p6)
}
0x2af7   :  { %6651 = dma.vmem_to_hbm [thread:$0]  %s6649_s29, 16, %s9751_s5, [#allocation7]  }
0x2af8   :  { %8179 = dma.done.wait [#allocation5], 512  }
0x2af9   :  { %8180 = vsyncadd [#allocation5], 4294966784 }
0x2afa   :  { %8181 = dma.done.wait [#allocation7], 16  }
0x2afb   :  { %8182 = vsyncadd [#allocation7], 4294967280 }
0x2afc   :  { %6658 = vsyncpa [#allocation5], 1 }
0x2afd   :  { %6659 = vsyncpa [#allocation7], 1 }

</bundles_post_ra>
